<compile_context>
chip_gen: v6e
topology: v6e:2x2x1
jax: 0.10.0
libtpu: 0.0.40
codegen_flags: <defaults>
</compile_context>

<pallas_src>
import functools

import numpy as np
import jax
import jax.numpy as jnp
from jax.experimental import pallas as pl
from jax.experimental.pallas import tpu as pltpu


# 3x3 conv taps enumerated as k = (dy+1)*3 + (dx+1), dy,dx in {-1,0,1}.
_TAPS = [(dy, dx) for dy in (-1, 0, 1) for dx in (-1, 0, 1)]


@functools.lru_cache(maxsize=None)
def _tap_masks(H, W):
    """(9, H*W) f32: 1 where tap (dy,dx) lands inside the image, else 0 (SAME pad)."""
    m = np.zeros((9, H, W), np.float32)
    for k, (dy, dx) in enumerate(_TAPS):
        m[k, max(0, -dy):H - max(0, dy), max(0, -dx):W - max(0, dx)] = 1.0
    return jnp.asarray(m.reshape(9, H * W))


def _pad_base(W):
    # lane-aligned center offset of the padded row buffer, >= W+1
    return ((W + 1 + 127) // 128) * 128


# ----------------------------------------------------------------------------
# In-kernel helpers (operate on (C, L) values; `pad_ref` is a zero-bordered
# VMEM scratch used to realize the shifted taps of the flattened layout).
# ----------------------------------------------------------------------------
def _leaky(v):
    return jnp.where(v >= 0.0, v, 0.05 * v)          # nn.LeakyReLU(0.05)


def _taps(pad_ref, x, masks, base, W, L):
    """The 9 zero-padded shifted slabs of x, each (C, L)."""
    C = x.shape[0]
    pad_ref[:C, base:base + L] = x
    out = []
    for k, (dy, dx) in enumerate(_TAPS):
        if dy == 0 and dx == 0:
            out.append(x)
        else:
            s = dy * W + dx
            out.append(pad_ref[:C, base + s:base + s + L] * masks[k:k + 1])
    return out


def _conv3x3(taps, w9, b):
    """taps: 9 x (Cin, L); w9: (9, Cout, Cin); b: (Cout, 1) -> (Cout, L)."""
    acc = jnp.dot(w9[0], taps[0], preferred_element_type=jnp.float32)
    for k in range(1, 9):
        acc = acc + jnp.dot(w9[k], taps[k], preferred_element_type=jnp.float32)
    return acc + b


def _max_op(pad_ref, x, masks, base, W, L):
    """2x2 max over taps (0,0),(0,1),(1,0),(1,1) with zero outside (== torch code)."""
    C = x.shape[0]
    pad_ref[:C, base:base + L] = x
    m = x
    for dy, dx in ((0, 1), (1, 0), (1, 1)):
        k = (dy + 1) * 3 + (dx + 1)
        s = dy * W + dx
        m = jnp.maximum(m, pad_ref[:C, base + s:base + s + L] * masks[k:k + 1])
    return m


def _search_block(pad_ref, x, masks, base, W, L, w3, b3, w5, b5):
    """SearchBlock. w3: (63, C, C) (7 convs x 9 taps), b3: (7C, 1),
    w5: (C, 4C) 1x1 conv, b5: (C, 1)."""
    C = x.shape[0]

    def conv(j, taps):
        return _conv3x3(taps, w3[9 * j:9 * (j + 1)], b3[C * j:C * (j + 1)])

    t0 = _taps(pad_ref, x, masks, base, W, L)
    d1 = _leaky(conv(0, t0))                  # c1_d
    r1 = _leaky(conv(1, t0) + x)              # c1_r + input
    t1 = _taps(pad_ref, r1, masks, base, W, L)
    d2 = _leaky(conv(2, t1))                  # c2_d
    r2 = _leaky(conv(3, t1) + r1)             # c2_r + r1
    t2 = _taps(pad_ref, r2, masks, base, W, L)
    d3 = _leaky(conv(4, t2))                  # c3_d
    r3 = _leaky(conv(5, t2) + r2)             # c3_r + r2
    t3 = _taps(pad_ref, r3, masks, base, W, L)
    r4 = _leaky(conv(6, t3))                  # c4
    # c5: 1x1 conv over concat([d1, d2, d3, r4], channel) as 4 partial dots
    out = (jnp.dot(w5[:, 0 * C:1 * C], d1, preferred_element_type=jnp.float32)
           + jnp.dot(w5[:, 1 * C:2 * C], d2, preferred_element_type=jnp.float32)
           + jnp.dot(w5[:, 2 * C:3 * C], d3, preferred_element_type=jnp.float32)
           + jnp.dot(w5[:, 3 * C:4 * C], r4, preferred_element_type=jnp.float32)
           + b5)
    return out


# ----------------------------------------------------------------------------
# Fused kernels
# ----------------------------------------------------------------------------
def _make_iem_kernel(H, W, first):
    L, base = H * W, _pad_base(W)

    def kernel(masks_ref, y_ref, u_ref, w3_ref, b3_ref, w5_ref, b5_ref,
               u_out_ref, t_out_ref, pad_ref):
        pad_ref[...] = jnp.zeros_like(pad_ref)
        masks = masks_ref[...]
        y = y_ref[0]
        if first:
            t_hat = _max_op(pad_ref, y, masks, base, W, L)
        else:
            u = u_ref[0]
            t_hat = _max_op(pad_ref, u, masks, base, W, L) - 0.5 * (u - y)
        t_raw = _search_block(pad_ref, t_hat, masks, base, W, L,
                              w3_ref[...], b3_ref[...], w5_ref[...], b5_ref[...])
        # sigmoid (EUP exp) + clamp, then u = clamp(y / t, 0, 1) with the divide
        # as an EUP reciprocal (t >= 1e-4, so the approx reciprocal is safe).
        t = jnp.clip(1.0 / (1.0 + jnp.exp(-t_raw)), 0.0001, 1.0)
        u_new = jnp.clip(y * pl.reciprocal(t, approx=True), 0.0, 1.0)
        u_out_ref[0] = u_new
        t_out_ref[0] = t

    return kernel


@functools.lru_cache(maxsize=None)
def _iem_call(N, C, H, W, first):
    L, base = H * W, _pad_base(W)
    img = pl.BlockSpec((1, C, L), lambda n: (n, 0, 0))
    full = lambda *s: pl.BlockSpec(s, lambda n: (0,) * len(s))
    call = pl.pallas_call(
        _make_iem_kernel(H, W, first),
        grid=(N,),
        in_specs=[full(9, L), img, img,
                  full(63, C, C), full(7 * C, 1), full(C, 4 * C), full(C, 1)],
        out_specs=(img, img),
        out_shape=(jax.ShapeDtypeStruct((N, C, L), jnp.float32),) * 2,
        scratch_shapes=[pltpu.VMEM((C, L + 2 * base), jnp.float32)],
        compiler_params=pltpu.CompilerParams(dimension_semantics=("parallel",)),
    )
    return jax.jit(call)


def _make_denoise_kernel(H, W):
    L, base = H * W, _pad_base(W)

    def kernel(masks_ref, x_ref, sw_ref, sb_ref, w3_ref, b3_ref, w5_ref, b5_ref,
               aw_ref, ab_ref, out_ref, pad_ref):
        pad_ref[...] = jnp.zeros_like(pad_ref)
        masks = masks_ref[...]
        x = x_ref[0]                                                # (3, L)
        feat = _conv3x3(_taps(pad_ref, x, masks, base, W, L),
                        sw_ref[...], sb_ref[...])                   # stem (no act)
        for i in range(3):
            feat = _search_block(pad_ref, feat, masks, base, W, L,
                                 w3_ref[i], b3_ref[i], w5_ref[i], b5_ref[i])
        noise = _conv3x3(_taps(pad_ref, feat, masks, base, W, L),
                         aw_ref[...], ab_ref[...])                  # activate (no act)
        out_ref[0] = x - noise

    return kernel


@functools.lru_cache(maxsize=None)
def _denoise_call(N, H, W, Cd):
    L, base = H * W, _pad_base(W)
    img3 = pl.BlockSpec((1, 3, L), lambda n: (n, 0, 0))
    full = lambda *s: pl.BlockSpec(s, lambda n: (0,) * len(s))
    call = pl.pallas_call(
        _make_denoise_kernel(H, W),
        grid=(N,),
        in_specs=[full(9, L), img3,
                  full(9, Cd, 3), full(Cd, 1),
                  full(3, 63, Cd, Cd), full(3, 7 * Cd, 1),
                  full(3, Cd, 4 * Cd), full(3, Cd, 1),
                  full(9, 3, Cd), full(3, 1)],
        out_specs=img3,
        out_shape=jax.ShapeDtypeStruct((N, 3, L), jnp.float32),
        scratch_shapes=[pltpu.VMEM((Cd, L + 2 * base), jnp.float32)],
        compiler_params=pltpu.CompilerParams(dimension_semantics=("parallel",)),
    )
    return jax.jit(call)


def _make_est_kernel(H, W, denom):
    L, base = H * W, _pad_base(W)
    inv = 1.0 / float(denom)

    def kernel(masks_ref, x_ref, w1_ref, b1_ref, wm_ref, bm_ref, w5_ref, b5_ref,
               out_ref, pad_ref):
        n = pl.program_id(0)

        @pl.when(n == 0)
        def _():
            out_ref[...] = jnp.zeros_like(out_ref)

        pad_ref[...] = jnp.zeros_like(pad_ref)
        masks = masks_ref[...]
        h = x_ref[0]                                                # (3, L)
        h = jnp.maximum(_conv3x3(_taps(pad_ref, h, masks, base, W, L),
                                 w1_ref[...], b1_ref[...]), 0.0)
        for i in range(3):
            h = jnp.maximum(_conv3x3(_taps(pad_ref, h, masks, base, W, L),
                                     wm_ref[i], bm_ref[i]), 0.0)
        es = _conv3x3(_taps(pad_ref, h, masks, base, W, L),
                      w5_ref[...], b5_ref[...])
        out_ref[...] = out_ref[...] + jnp.sum(jnp.abs(es), keepdims=True)

        @pl.when(n == pl.num_programs(0) - 1)
        def _():
            out_ref[...] = out_ref[...] * inv

    return kernel


@functools.lru_cache(maxsize=None)
def _est_call(N, H, W, C):
    L, base = H * W, _pad_base(W)
    img3 = pl.BlockSpec((1, 3, L), lambda n: (n, 0, 0))
    full = lambda *s: pl.BlockSpec(s, lambda n: (0,) * len(s))
    call = pl.pallas_call(
        _make_est_kernel(H, W, C * H * W),          # size[3]*size[1]*size[2]
        grid=(N,),
        in_specs=[full(9, L), img3,
                  full(9, 32, 3), full(32, 1),
                  full(3, 9, 32, 32), full(3, 32, 1),
                  full(9, 3, 32), full(3, 1)],
        out_specs=pl.BlockSpec((1, 1), lambda n: (0, 0)),
        out_shape=jax.ShapeDtypeStruct((1, 1), jnp.float32),
        scratch_shapes=[pltpu.VMEM((32, L + 2 * base), jnp.float32)],
        compiler_params=pltpu.CompilerParams(dimension_semantics=("arbitrary",)),
    )
    return jax.jit(call)


# ----------------------------------------------------------------------------
# Network forward (thin host glue: 3 IEM calls + 1 estimation call (+1 denoise))
# ----------------------------------------------------------------------------
def network_forward(x_nchw, params):
    N, C, H, W = x_nchw.shape
    L = H * W
    x = jnp.asarray(x_nchw, jnp.float32).reshape(N, C, L)   # free NCHW -> (N,C,L)
    masks = _tap_masks(H, W)

    u = jnp.ones_like(x)
    u_list, t_list = [], []
    for k, cell in enumerate(params["enhance"]):
        u, t = _iem_call(N, C, H, W, k == 0)(
            masks, x, u, cell["w3"], cell["b3"], cell["w5"], cell["b5"])
        u_list.append(u)
        t_list.append(t)

    ep = params["estimation"]
    noise_label = _est_call(N, H, W, C)(
        masks, u_list[-1], ep["w1"], ep["b1"], ep["wm"], ep["bm"],
        ep["w5"], ep["b5"])[0, 0]

    # Mirrors `noise_label.item() >= 0.035`: the Python list length is data
    # dependent in the original module, so this host sync is inherent to spec.
    if float(jax.device_get(noise_label)) >= 0.035:
        dp = params["denoise"]
        u_d = _denoise_call(N, H, W, 6)(
            masks, u_list[-1], dp["sw"], dp["sb"], dp["w3"], dp["b3"],
            dp["w5"], dp["b5"], dp["aw"], dp["ab"])
        u_list.append(u_d)

    unflat = lambda a: a.reshape(N, C, H, W)
    return [unflat(a) for a in u_list], [unflat(a) for a in t_list], noise_label


# ----------------------------------------------------------------------------
# Deterministic parameter init (weights stored in kernel "tap" layout:
# a PyTorch conv weight w[co, ci, ky, kx] maps to w9[(ky*3+kx), co, ci]).
# ----------------------------------------------------------------------------
def _conv_taps_init(key, cout, cin, scale=0.1):
    kw, kb = jax.random.split(key)
    return (scale * jax.random.normal(kw, (9, cout, cin), jnp.float32),
            scale * jax.random.normal(kb, (cout, 1), jnp.float32))


def _search_block_init(key, c, scale=0.1):
    keys = jax.random.split(key, 8)
    w3, b3 = [], []
    for i in range(7):                       # c1_d, c1_r, c2_d, c2_r, c3_d, c3_r, c4
        w, b = _conv_taps_init(keys[i], c, c, scale)
        w3.append(w)
        b3.append(b)
    kw, kb = jax.random.split(keys[7])
    return {"w3": jnp.concatenate(w3, axis=0),              # (63, c, c)
            "b3": jnp.concatenate(b3, axis=0),              # (7c, 1)
            "w5": scale * jax.random.normal(kw, (c, 4 * c), jnp.float32),
            "b5": scale * jax.random.normal(kb, (c, 1), jnp.float32)}


def init_params(key, c_enh=3, c_den=6):
    k_enh, k_den, k_est = jax.random.split(key, 3)

    enhance = [_search_block_init(k, c_enh) for k in jax.random.split(k_enh, 3)]

    dk = jax.random.split(k_den, 5)
    sw, sb = _conv_taps_init(dk[0], c_den, 3)
    blocks = [_search_block_init(dk[i + 1], c_den) for i in range(3)]
    aw, ab = _conv_taps_init(dk[4], 3, c_den)
    denoise = {"sw": sw, "sb": sb,
               "w3": jnp.stack([b["w3"] for b in blocks]),   # (3, 63, 6, 6)
               "b3": jnp.stack([b["b3"] for b in blocks]),   # (3, 42, 1)
               "w5": jnp.stack([b["w5"] for b in blocks]),   # (3, 6, 24)
               "b5": jnp.stack([b["b5"] for b in blocks]),   # (3, 6, 1)
               "aw": aw, "ab": ab}

    ek = jax.random.split(k_est, 5)
    w1, b1 = _conv_taps_init(ek[0], 32, 3)
    mids = [_conv_taps_init(ek[i + 1], 32, 32) for i in range(3)]
    w5, b5 = _conv_taps_init(ek[4], 3, 32)
    estimation = {"w1": w1, "b1": b1,
                  "wm": jnp.stack([m[0] for m in mids]),     # (3, 9, 32, 32)
                  "bm": jnp.stack([m[1] for m in mids]),     # (3, 32, 1)
                  "w5": w5, "b5": b5}

    return {"enhance": enhance, "denoise": denoise, "estimation": estimation}


if __name__ == "__main__":
    params = init_params(jax.random.PRNGKey(1))
    x = jax.random.uniform(jax.random.PRNGKey(0), (2, 3, 16, 16), dtype=jnp.float32)
    u_list, t_list, noise_label = network_forward(x, params)
    jax.block_until_ready((u_list, t_list, noise_label))
    print("KERNEL_OK")
</pallas_src>

<mosaic_0001>
module attributes {stable_mosaic.version = 11 : i64} {
  func.func @kernel(%arg0: i32, %arg1: memref<9x256xf32, #tpu.memory_space<vmem>>, %arg2: memref<1x3x256xf32, #tpu.memory_space<vmem>>, %arg3: memref<1x3x256xf32, #tpu.memory_space<vmem>>, %arg4: memref<63x3x3xf32, #tpu.memory_space<vmem>>, %arg5: memref<21x1xf32, #tpu.memory_space<vmem>>, %arg6: memref<3x12xf32, #tpu.memory_space<vmem>>, %arg7: memref<3x1xf32, #tpu.memory_space<vmem>>, %arg8: memref<1x3x256xf32, #tpu.memory_space<vmem>>, %arg9: memref<1x3x256xf32, #tpu.memory_space<vmem>>, %arg10: memref<3x512xf32, #tpu.memory_space<vmem>>) attributes {dimension_semantics = [#tpu.dimension_semantics<parallel>], iteration_bounds = array<i64: 2>, scalar_prefetch = 0 : i64, scratch_operands = 1 : i64, tpu.core_type = #tpu.core_type<tc>, window_params = [{pipeline_mode = #tpu.pipeline_mode<synchronous>, transform_indices = @transform_0, window_bounds = array<i64: 9, 256>}, {transform_indices = @transform_1, window_bounds = array<i64: 1, 3, 256>}, {transform_indices = @transform_2, window_bounds = array<i64: 1, 3, 256>}, {pipeline_mode = #tpu.pipeline_mode<synchronous>, transform_indices = @transform_3, window_bounds = array<i64: 63, 3, 3>}, {pipeline_mode = #tpu.pipeline_mode<synchronous>, transform_indices = @transform_4, window_bounds = array<i64: 21, 1>}, {pipeline_mode = #tpu.pipeline_mode<synchronous>, transform_indices = @transform_5, window_bounds = array<i64: 3, 12>}, {pipeline_mode = #tpu.pipeline_mode<synchronous>, transform_indices = @transform_6, window_bounds = array<i64: 3, 1>}, {transform_indices = @transform_7, window_bounds = array<i64: 1, 3, 256>}, {transform_indices = @transform_8, window_bounds = array<i64: 1, 3, 256>}]} {
    %cst = arith.constant 0.000000e+00 : f32
    %0 = vector.broadcast %cst : f32 to vector<3x512xf32>
    %c0 = arith.constant 0 : index
    %c0_0 = arith.constant 0 : index
    %1 = vector.load %arg10[%c0, %c0_0] : memref<3x512xf32, #tpu.memory_space<vmem>>, vector<3x512xf32>
    tpu.vector_store %arg10[%c0, %c0_0], %0 {strides = array<i32>} : memref<3x512xf32, #tpu.memory_space<vmem>>, vector<3x512xf32>,
    %c0_1 = arith.constant 0 : index
    %c0_2 = arith.constant 0 : index
    %2 = vector.load %arg1[%c0_1, %c0_2] : memref<9x256xf32, #tpu.memory_space<vmem>>, vector<9x256xf32>
    %c0_3 = arith.constant 0 : index
    %c0_4 = arith.constant 0 : index
    %c0_5 = arith.constant 0 : index
    %3 = vector.load %arg2[%c0_3, %c0_4, %c0_5] : memref<1x3x256xf32, #tpu.memory_space<vmem>>, vector<1x3x256xf32>
    %4 = vector.shape_cast %3 : vector<1x3x256xf32> to vector<3x256xf32>
    %c0_6 = arith.constant 0 : index
    %c128 = arith.constant 128 : index
    %5 = vector.load %arg10[%c0_6, %c128] : memref<3x512xf32, #tpu.memory_space<vmem>>, vector<3x256xf32>
    tpu.vector_store %arg10[%c0_6, %c128], %4 {strides = array<i32>} : memref<3x512xf32, #tpu.memory_space<vmem>>, vector<3x256xf32>,
    %c0_7 = arith.constant 0 : index
    %c129 = arith.constant 129 : index
    %6 = vector.load %arg10[%c0_7, %c129] : memref<3x512xf32, #tpu.memory_space<vmem>>, vector<3x256xf32>
    %7 = vector.extract_strided_slice %2 {offsets = [5, 0], sizes = [1, 256], strides = [1, 1]} : vector<9x256xf32> to vector<1x256xf32>
    %8 = vector.broadcast %7 : vector<1x256xf32> to vector<3x256xf32>
    %9 = arith.mulf %6, %8 : vector<3x256xf32>
    %10 = arith.maximumf %4, %9 : vector<3x256xf32>
    %c0_8 = arith.constant 0 : index
    %c144 = arith.constant 144 : index
    %11 = vector.load %arg10[%c0_8, %c144] : memref<3x512xf32, #tpu.memory_space<vmem>>, vector<3x256xf32>
    %12 = vector.extract_strided_slice %2 {offsets = [7, 0], sizes = [1, 256], strides = [1, 1]} : vector<9x256xf32> to vector<1x256xf32>
    %13 = vector.broadcast %12 : vector<1x256xf32> to vector<3x256xf32>
    %14 = arith.mulf %11, %13 : vector<3x256xf32>
    %15 = arith.maximumf %10, %14 : vector<3x256xf32>
    %c0_9 = arith.constant 0 : index
    %c145 = arith.constant 145 : index
    %16 = vector.load %arg10[%c0_9, %c145] : memref<3x512xf32, #tpu.memory_space<vmem>>, vector<3x256xf32>
    %17 = vector.extract_strided_slice %2 {offsets = [8, 0], sizes = [1, 256], strides = [1, 1]} : vector<9x256xf32> to vector<1x256xf32>
    %18 = vector.broadcast %17 : vector<1x256xf32> to vector<3x256xf32>
    %19 = arith.mulf %16, %18 : vector<3x256xf32>
    %20 = arith.maximumf %15, %19 : vector<3x256xf32>
    %c0_10 = arith.constant 0 : index
    %c0_11 = arith.constant 0 : index
    %c0_12 = arith.constant 0 : index
    %21 = vector.load %arg4[%c0_10, %c0_11, %c0_12] : memref<63x3x3xf32, #tpu.memory_space<vmem>>, vector<63x3x3xf32>
    %c0_13 = arith.constant 0 : index
    %c0_14 = arith.constant 0 : index
    %22 = vector.load %arg5[%c0_13, %c0_14] : memref<21x1xf32, #tpu.memory_space<vmem>>, vector<21x1xf32>
    %c0_15 = arith.constant 0 : index
    %c0_16 = arith.constant 0 : index
    %23 = vector.load %arg6[%c0_15, %c0_16] : memref<3x12xf32, #tpu.memory_space<vmem>>, vector<3x12xf32>
    %c0_17 = arith.constant 0 : index
    %c0_18 = arith.constant 0 : index
    %24 = vector.load %arg7[%c0_17, %c0_18] : memref<3x1xf32, #tpu.memory_space<vmem>>, vector<3x1xf32>
    %c0_19 = arith.constant 0 : index
    %c128_20 = arith.constant 128 : index
    %25 = vector.load %arg10[%c0_19, %c128_20] : memref<3x512xf32, #tpu.memory_space<vmem>>, vector<3x256xf32>
    tpu.vector_store %arg10[%c0_19, %c128_20], %20 {strides = array<i32>} : memref<3x512xf32, #tpu.memory_space<vmem>>, vector<3x256xf32>,
    %c0_21 = arith.constant 0 : index
    %c111 = arith.constant 111 : index
    %26 = vector.load %arg10[%c0_21, %c111] : memref<3x512xf32, #tpu.memory_space<vmem>>, vector<3x256xf32>
    %27 = vector.extract_strided_slice %2 {offsets = [0, 0], sizes = [1, 256], strides = [1, 1]} : vector<9x256xf32> to vector<1x256xf32>
    %28 = vector.broadcast %27 : vector<1x256xf32> to vector<3x256xf32>
    %29 = arith.mulf %26, %28 : vector<3x256xf32>
    %c0_22 = arith.constant 0 : index
    %c112 = arith.constant 112 : index
    %30 = vector.load %arg10[%c0_22, %c112] : memref<3x512xf32, #tpu.memory_space<vmem>>, vector<3x256xf32>
    %31 = vector.extract_strided_slice %2 {offsets = [1, 0], sizes = [1, 256], strides = [1, 1]} : vector<9x256xf32> to vector<1x256xf32>
    %32 = vector.broadcast %31 : vector<1x256xf32> to vector<3x256xf32>
    %33 = arith.mulf %30, %32 : vector<3x256xf32>
    %c0_23 = arith.constant 0 : index
    %c113 = arith.constant 113 : index
    %34 = vector.load %arg10[%c0_23, %c113] : memref<3x512xf32, #tpu.memory_space<vmem>>, vector<3x256xf32>
    %35 = vector.extract_strided_slice %2 {offsets = [2, 0], sizes = [1, 256], strides = [1, 1]} : vector<9x256xf32> to vector<1x256xf32>
    %36 = vector.broadcast %35 : vector<1x256xf32> to vector<3x256xf32>
    %37 = arith.mulf %34, %36 : vector<3x256xf32>
    %c0_24 = arith.constant 0 : index
    %c127 = arith.constant 127 : index
    %38 = vector.load %arg10[%c0_24, %c127] : memref<3x512xf32, #tpu.memory_space<vmem>>, vector<3x256xf32>
    %39 = vector.extract_strided_slice %2 {offsets = [3, 0], sizes = [1, 256], strides = [1, 1]} : vector<9x256xf32> to vector<1x256xf32>
    %40 = vector.broadcast %39 : vector<1x256xf32> to vector<3x256xf32>
    %41 = arith.mulf %38, %40 : vector<3x256xf32>
    %c0_25 = arith.constant 0 : index
    %c129_26 = arith.constant 129 : index
    %42 = vector.load %arg10[%c0_25, %c129_26] : memref<3x512xf32, #tpu.memory_space<vmem>>, vector<3x256xf32>
    %43 = vector.extract_strided_slice %2 {offsets = [5, 0], sizes = [1, 256], strides = [1, 1]} : vector<9x256xf32> to vector<1x256xf32>
    %44 = vector.broadcast %43 : vector<1x256xf32> to vector<3x256xf32>
    %45 = arith.mulf %42, %44 : vector<3x256xf32>
    %c0_27 = arith.constant 0 : index
    %c143 = arith.constant 143 : index
    %46 = vector.load %arg10[%c0_27, %c143] : memref<3x512xf32, #tpu.memory_space<vmem>>, vector<3x256xf32>
    %47 = vector.extract_strided_slice %2 {offsets = [6, 0], sizes = [1, 256], strides = [1, 1]} : vector<9x256xf32> to vector<1x256xf32>
    %48 = vector.broadcast %47 : vector<1x256xf32> to vector<3x256xf32>
    %49 = arith.mulf %46, %48 : vector<3x256xf32>
    %c0_28 = arith.constant 0 : index
    %c144_29 = arith.constant 144 : index
    %50 = vector.load %arg10[%c0_28, %c144_29] : memref<3x512xf32, #tpu.memory_space<vmem>>, vector<3x256xf32>
    %51 = vector.extract_strided_slice %2 {offsets = [7, 0], sizes = [1, 256], strides = [1, 1]} : vector<9x256xf32> to vector<1x256xf32>
    %52 = vector.broadcast %51 : vector<1x256xf32> to vector<3x256xf32>
    %53 = arith.mulf %50, %52 : vector<3x256xf32>
    %c0_30 = arith.constant 0 : index
    %c145_31 = arith.constant 145 : index
    %54 = vector.load %arg10[%c0_30, %c145_31] : memref<3x512xf32, #tpu.memory_space<vmem>>, vector<3x256xf32>
    %55 = vector.extract_strided_slice %2 {offsets = [8, 0], sizes = [1, 256], strides = [1, 1]} : vector<9x256xf32> to vector<1x256xf32>
    %56 = vector.broadcast %55 : vector<1x256xf32> to vector<3x256xf32>
    %57 = arith.mulf %54, %56 : vector<3x256xf32>
    %58 = vector.extract_strided_slice %21 {offsets = [0, 0, 0], sizes = [9, 3, 3], strides = [1, 1, 1]} : vector<63x3x3xf32> to vector<9x3x3xf32>
    %59 = vector.extract_strided_slice %22 {offsets = [0, 0], sizes = [3, 1], strides = [1, 1]} : vector<21x1xf32> to vector<3x1xf32>
    %60 = vector.extract_strided_slice %58 {offsets = [0, 0, 0], sizes = [1, 3, 3], strides = [1, 1, 1]} : vector<9x3x3xf32> to vector<1x3x3xf32>
    %61 = vector.shape_cast %60 : vector<1x3x3xf32> to vector<3x3xf32>
    %cst_32 = arith.constant dense<0.000000e+00> : vector<3x256xf32>
    %62 = tpu.matmul %61, %29, %cst_32 {dimension_numbers = #tpu.dot_dimension_numbers<[1], [0], [0], [1], [0, 0, 1, 1], [], []>} : vector<3x3xf32>, vector<3x256xf32>, vector<3x256xf32> -> vector<3x256xf32>
    %63 = vector.extract_strided_slice %58 {offsets = [1, 0, 0], sizes = [1, 3, 3], strides = [1, 1, 1]} : vector<9x3x3xf32> to vector<1x3x3xf32>
    %64 = vector.shape_cast %63 : vector<1x3x3xf32> to vector<3x3xf32>
    %cst_33 = arith.constant dense<0.000000e+00> : vector<3x256xf32>
    %65 = tpu.matmul %64, %33, %cst_33 {dimension_numbers = #tpu.dot_dimension_numbers<[1], [0], [0], [1], [0, 0, 1, 1], [], []>} : vector<3x3xf32>, vector<3x256xf32>, vector<3x256xf32> -> vector<3x256xf32>
    %66 = arith.addf %62, %65 : vector<3x256xf32>
    %67 = vector.extract_strided_slice %58 {offsets = [2, 0, 0], sizes = [1, 3, 3], strides = [1, 1, 1]} : vector<9x3x3xf32> to vector<1x3x3xf32>
    %68 = vector.shape_cast %67 : vector<1x3x3xf32> to vector<3x3xf32>
    %cst_34 = arith.constant dense<0.000000e+00> : vector<3x256xf32>
    %69 = tpu.matmul %68, %37, %cst_34 {dimension_numbers = #tpu.dot_dimension_numbers<[1], [0], [0], [1], [0, 0, 1, 1], [], []>} : vector<3x3xf32>, vector<3x256xf32>, vector<3x256xf32> -> vector<3x256xf32>
    %70 = arith.addf %66, %69 : vector<3x256xf32>
    %71 = vector.extract_strided_slice %58 {offsets = [3, 0, 0], sizes = [1, 3, 3], strides = [1, 1, 1]} : vector<9x3x3xf32> to vector<1x3x3xf32>
    %72 = vector.shape_cast %71 : vector<1x3x3xf32> to vector<3x3xf32>
    %cst_35 = arith.constant dense<0.000000e+00> : vector<3x256xf32>
    %73 = tpu.matmul %72, %41, %cst_35 {dimension_numbers = #tpu.dot_dimension_numbers<[1], [0], [0], [1], [0, 0, 1, 1], [], []>} : vector<3x3xf32>, vector<3x256xf32>, vector<3x256xf32> -> vector<3x256xf32>
    %74 = arith.addf %70, %73 : vector<3x256xf32>
    %75 = vector.extract_strided_slice %58 {offsets = [4, 0, 0], sizes = [1, 3, 3], strides = [1, 1, 1]} : vector<9x3x3xf32> to vector<1x3x3xf32>
    %76 = vector.shape_cast %75 : vector<1x3x3xf32> to vector<3x3xf32>
    %cst_36 = arith.constant dense<0.000000e+00> : vector<3x256xf32>
    %77 = tpu.matmul %76, %20, %cst_36 {dimension_numbers = #tpu.dot_dimension_numbers<[1], [0], [0], [1], [0, 0, 1, 1], [], []>} : vector<3x3xf32>, vector<3x256xf32>, vector<3x256xf32> -> vector<3x256xf32>
    %78 = arith.addf %74, %77 : vector<3x256xf32>
    %79 = vector.extract_strided_slice %58 {offsets = [5, 0, 0], sizes = [1, 3, 3], strides = [1, 1, 1]} : vector<9x3x3xf32> to vector<1x3x3xf32>
    %80 = vector.shape_cast %79 : vector<1x3x3xf32> to vector<3x3xf32>
    %cst_37 = arith.constant dense<0.000000e+00> : vector<3x256xf32>
    %81 = tpu.matmul %80, %45, %cst_37 {dimension_numbers = #tpu.dot_dimension_numbers<[1], [0], [0], [1], [0, 0, 1, 1], [], []>} : vector<3x3xf32>, vector<3x256xf32>, vector<3x256xf32> -> vector<3x256xf32>
    %82 = arith.addf %78, %81 : vector<3x256xf32>
    %83 = vector.extract_strided_slice %58 {offsets = [6, 0, 0], sizes = [1, 3, 3], strides = [1, 1, 1]} : vector<9x3x3xf32> to vector<1x3x3xf32>
    %84 = vector.shape_cast %83 : vector<1x3x3xf32> to vector<3x3xf32>
    %cst_38 = arith.constant dense<0.000000e+00> : vector<3x256xf32>
    %85 = tpu.matmul %84, %49, %cst_38 {dimension_numbers = #tpu.dot_dimension_numbers<[1], [0], [0], [1], [0, 0, 1, 1], [], []>} : vector<3x3xf32>, vector<3x256xf32>, vector<3x256xf32> -> vector<3x256xf32>
    %86 = arith.addf %82, %85 : vector<3x256xf32>
    %87 = vector.extract_strided_slice %58 {offsets = [7, 0, 0], sizes = [1, 3, 3], strides = [1, 1, 1]} : vector<9x3x3xf32> to vector<1x3x3xf32>
    %88 = vector.shape_cast %87 : vector<1x3x3xf32> to vector<3x3xf32>
    %cst_39 = arith.constant dense<0.000000e+00> : vector<3x256xf32>
    %89 = tpu.matmul %88, %53, %cst_39 {dimension_numbers = #tpu.dot_dimension_numbers<[1], [0], [0], [1], [0, 0, 1, 1], [], []>} : vector<3x3xf32>, vector<3x256xf32>, vector<3x256xf32> -> vector<3x256xf32>
    %90 = arith.addf %86, %89 : vector<3x256xf32>
    %91 = vector.extract_strided_slice %58 {offsets = [8, 0, 0], sizes = [1, 3, 3], strides = [1, 1, 1]} : vector<9x3x3xf32> to vector<1x3x3xf32>
    %92 = vector.shape_cast %91 : vector<1x3x3xf32> to vector<3x3xf32>
    %cst_40 = arith.constant dense<0.000000e+00> : vector<3x256xf32>
    %93 = tpu.matmul %92, %57, %cst_40 {dimension_numbers = #tpu.dot_dimension_numbers<[1], [0], [0], [1], [0, 0, 1, 1], [], []>} : vector<3x3xf32>, vector<3x256xf32>, vector<3x256xf32> -> vector<3x256xf32>
    %94 = arith.addf %90, %93 : vector<3x256xf32>
    %95 = vector.broadcast %59 : vector<3x1xf32> to vector<3x256xf32>
    %96 = arith.addf %94, %95 : vector<3x256xf32>
    %cst_41 = arith.constant 0.000000e+00 : f32
    %97 = vector.broadcast %cst_41 : f32 to vector<3x256xf32>
    %98 = arith.cmpf oge, %96, %97 : vector<3x256xf32>
    %cst_42 = arith.constant 5.000000e-02 : f32
    %99 = vector.broadcast %cst_42 : f32 to vector<3x256xf32>
    %100 = arith.mulf %99, %96 : vector<3x256xf32>
    %101 = arith.select %98, %96, %100 : vector<3x256xi1>, vector<3x256xf32>
    %102 = vector.extract_strided_slice %21 {offsets = [9, 0, 0], sizes = [9, 3, 3], strides = [1, 1, 1]} : vector<63x3x3xf32> to vector<9x3x3xf32>
    %103 = vector.extract_strided_slice %22 {offsets = [3, 0], sizes = [3, 1], strides = [1, 1]} : vector<21x1xf32> to vector<3x1xf32>
    %104 = vector.extract_strided_slice %102 {offsets = [0, 0, 0], sizes = [1, 3, 3], strides = [1, 1, 1]} : vector<9x3x3xf32> to vector<1x3x3xf32>
    %105 = vector.shape_cast %104 : vector<1x3x3xf32> to vector<3x3xf32>
    %cst_43 = arith.constant dense<0.000000e+00> : vector<3x256xf32>
    %106 = tpu.matmul %105, %29, %cst_43 {dimension_numbers = #tpu.dot_dimension_numbers<[1], [0], [0], [1], [0, 0, 1, 1], [], []>} : vector<3x3xf32>, vector<3x256xf32>, vector<3x256xf32> -> vector<3x256xf32>
    %107 = vector.extract_strided_slice %102 {offsets = [1, 0, 0], sizes = [1, 3, 3], strides = [1, 1, 1]} : vector<9x3x3xf32> to vector<1x3x3xf32>
    %108 = vector.shape_cast %107 : vector<1x3x3xf32> to vector<3x3xf32>
    %cst_44 = arith.constant dense<0.000000e+00> : vector<3x256xf32>
    %109 = tpu.matmul %108, %33, %cst_44 {dimension_numbers = #tpu.dot_dimension_numbers<[1], [0], [0], [1], [0, 0, 1, 1], [], []>} : vector<3x3xf32>, vector<3x256xf32>, vector<3x256xf32> -> vector<3x256xf32>
    %110 = arith.addf %106, %109 : vector<3x256xf32>
    %111 = vector.extract_strided_slice %102 {offsets = [2, 0, 0], sizes = [1, 3, 3], strides = [1, 1, 1]} : vector<9x3x3xf32> to vector<1x3x3xf32>
    %112 = vector.shape_cast %111 : vector<1x3x3xf32> to vector<3x3xf32>
    %cst_45 = arith.constant dense<0.000000e+00> : vector<3x256xf32>
    %113 = tpu.matmul %112, %37, %cst_45 {dimension_numbers = #tpu.dot_dimension_numbers<[1], [0], [0], [1], [0, 0, 1, 1], [], []>} : vector<3x3xf32>, vector<3x256xf32>, vector<3x256xf32> -> vector<3x256xf32>
    %114 = arith.addf %110, %113 : vector<3x256xf32>
    %115 = vector.extract_strided_slice %102 {offsets = [3, 0, 0], sizes = [1, 3, 3], strides = [1, 1, 1]} : vector<9x3x3xf32> to vector<1x3x3xf32>
    %116 = vector.shape_cast %115 : vector<1x3x3xf32> to vector<3x3xf32>
    %cst_46 = arith.constant dense<0.000000e+00> : vector<3x256xf32>
    %117 = tpu.matmul %116, %41, %cst_46 {dimension_numbers = #tpu.dot_dimension_numbers<[1], [0], [0], [1], [0, 0, 1, 1], [], []>} : vector<3x3xf32>, vector<3x256xf32>, vector<3x256xf32> -> vector<3x256xf32>
    %118 = arith.addf %114, %117 : vector<3x256xf32>
    %119 = vector.extract_strided_slice %102 {offsets = [4, 0, 0], sizes = [1, 3, 3], strides = [1, 1, 1]} : vector<9x3x3xf32> to vector<1x3x3xf32>
    %120 = vector.shape_cast %119 : vector<1x3x3xf32> to vector<3x3xf32>
    %cst_47 = arith.constant dense<0.000000e+00> : vector<3x256xf32>
    %121 = tpu.matmul %120, %20, %cst_47 {dimension_numbers = #tpu.dot_dimension_numbers<[1], [0], [0], [1], [0, 0, 1, 1], [], []>} : vector<3x3xf32>, vector<3x256xf32>, vector<3x256xf32> -> vector<3x256xf32>
    %122 = arith.addf %118, %121 : vector<3x256xf32>
    %123 = vector.extract_strided_slice %102 {offsets = [5, 0, 0], sizes = [1, 3, 3], strides = [1, 1, 1]} : vector<9x3x3xf32> to vector<1x3x3xf32>
    %124 = vector.shape_cast %123 : vector<1x3x3xf32> to vector<3x3xf32>
    %cst_48 = arith.constant dense<0.000000e+00> : vector<3x256xf32>
    %125 = tpu.matmul %124, %45, %cst_48 {dimension_numbers = #tpu.dot_dimension_numbers<[1], [0], [0], [1], [0, 0, 1, 1], [], []>} : vector<3x3xf32>, vector<3x256xf32>, vector<3x256xf32> -> vector<3x256xf32>
    %126 = arith.addf %122, %125 : vector<3x256xf32>
    %127 = vector.extract_strided_slice %102 {offsets = [6, 0, 0], sizes = [1, 3, 3], strides = [1, 1, 1]} : vector<9x3x3xf32> to vector<1x3x3xf32>
    %128 = vector.shape_cast %127 : vector<1x3x3xf32> to vector<3x3xf32>
    %cst_49 = arith.constant dense<0.000000e+00> : vector<3x256xf32>
    %129 = tpu.matmul %128, %49, %cst_49 {dimension_numbers = #tpu.dot_dimension_numbers<[1], [0], [0], [1], [0, 0, 1, 1], [], []>} : vector<3x3xf32>, vector<3x256xf32>, vector<3x256xf32> -> vector<3x256xf32>
    %130 = arith.addf %126, %129 : vector<3x256xf32>
    %131 = vector.extract_strided_slice %102 {offsets = [7, 0, 0], sizes = [1, 3, 3], strides = [1, 1, 1]} : vector<9x3x3xf32> to vector<1x3x3xf32>
    %132 = vector.shape_cast %131 : vector<1x3x3xf32> to vector<3x3xf32>
    %cst_50 = arith.constant dense<0.000000e+00> : vector<3x256xf32>
    %133 = tpu.matmul %132, %53, %cst_50 {dimension_numbers = #tpu.dot_dimension_numbers<[1], [0], [0], [1], [0, 0, 1, 1], [], []>} : vector<3x3xf32>, vector<3x256xf32>, vector<3x256xf32> -> vector<3x256xf32>
    %134 = arith.addf %130, %133 : vector<3x256xf32>
    %135 = vector.extract_strided_slice %102 {offsets = [8, 0, 0], sizes = [1, 3, 3], strides = [1, 1, 1]} : vector<9x3x3xf32> to vector<1x3x3xf32>
    %136 = vector.shape_cast %135 : vector<1x3x3xf32> to vector<3x3xf32>
    %cst_51 = arith.constant dense<0.000000e+00> : vector<3x256xf32>
    %137 = tpu.matmul %136, %57, %cst_51 {dimension_numbers = #tpu.dot_dimension_numbers<[1], [0], [0], [1], [0, 0, 1, 1], [], []>} : vector<3x3xf32>, vector<3x256xf32>, vector<3x256xf32> -> vector<3x256xf32>
    %138 = arith.addf %134, %137 : vector<3x256xf32>
    %139 = vector.broadcast %103 : vector<3x1xf32> to vector<3x256xf32>
    %140 = arith.addf %138, %139 : vector<3x256xf32>
    %141 = arith.addf %140, %20 : vector<3x256xf32>
    %cst_52 = arith.constant 0.000000e+00 : f32
    %142 = vector.broadcast %cst_52 : f32 to vector<3x256xf32>
    %143 = arith.cmpf oge, %141, %142 : vector<3x256xf32>
    %cst_53 = arith.constant 5.000000e-02 : f32
    %144 = vector.broadcast %cst_53 : f32 to vector<3x256xf32>
    %145 = arith.mulf %144, %141 : vector<3x256xf32>
    %146 = arith.select %143, %141, %145 : vector<3x256xi1>, vector<3x256xf32>
    %c0_54 = arith.constant 0 : index
    %c128_55 = arith.constant 128 : index
    %147 = vector.load %arg10[%c0_54, %c128_55] : memref<3x512xf32, #tpu.memory_space<vmem>>, vector<3x256xf32>
    tpu.vector_store %arg10[%c0_54, %c128_55], %146 {strides = array<i32>} : memref<3x512xf32, #tpu.memory_space<vmem>>, vector<3x256xf32>,
    %c0_56 = arith.constant 0 : index
    %c111_57 = arith.constant 111 : index
    %148 = vector.load %arg10[%c0_56, %c111_57] : memref<3x512xf32, #tpu.memory_space<vmem>>, vector<3x256xf32>
    %149 = vector.extract_strided_slice %2 {offsets = [0, 0], sizes = [1, 256], strides = [1, 1]} : vector<9x256xf32> to vector<1x256xf32>
    %150 = vector.broadcast %149 : vector<1x256xf32> to vector<3x256xf32>
    %151 = arith.mulf %148, %150 : vector<3x256xf32>
    %c0_58 = arith.constant 0 : index
    %c112_59 = arith.constant 112 : index
    %152 = vector.load %arg10[%c0_58, %c112_59] : memref<3x512xf32, #tpu.memory_space<vmem>>, vector<3x256xf32>
    %153 = vector.extract_strided_slice %2 {offsets = [1, 0], sizes = [1, 256], strides = [1, 1]} : vector<9x256xf32> to vector<1x256xf32>
    %154 = vector.broadcast %153 : vector<1x256xf32> to vector<3x256xf32>
    %155 = arith.mulf %152, %154 : vector<3x256xf32>
    %c0_60 = arith.constant 0 : index
    %c113_61 = arith.constant 113 : index
    %156 = vector.load %arg10[%c0_60, %c113_61] : memref<3x512xf32, #tpu.memory_space<vmem>>, vector<3x256xf32>
    %157 = vector.extract_strided_slice %2 {offsets = [2, 0], sizes = [1, 256], strides = [1, 1]} : vector<9x256xf32> to vector<1x256xf32>
    %158 = vector.broadcast %157 : vector<1x256xf32> to vector<3x256xf32>
    %159 = arith.mulf %156, %158 : vector<3x256xf32>
    %c0_62 = arith.constant 0 : index
    %c127_63 = arith.constant 127 : index
    %160 = vector.load %arg10[%c0_62, %c127_63] : memref<3x512xf32, #tpu.memory_space<vmem>>, vector<3x256xf32>
    %161 = vector.extract_strided_slice %2 {offsets = [3, 0], sizes = [1, 256], strides = [1, 1]} : vector<9x256xf32> to vector<1x256xf32>
    %162 = vector.broadcast %161 : vector<1x256xf32> to vector<3x256xf32>
    %163 = arith.mulf %160, %162 : vector<3x256xf32>
    %c0_64 = arith.constant 0 : index
    %c129_65 = arith.constant 129 : index
    %164 = vector.load %arg10[%c0_64, %c129_65] : memref<3x512xf32, #tpu.memory_space<vmem>>, vector<3x256xf32>
    %165 = vector.extract_strided_slice %2 {offsets = [5, 0], sizes = [1, 256], strides = [1, 1]} : vector<9x256xf32> to vector<1x256xf32>
    %166 = vector.broadcast %165 : vector<1x256xf32> to vector<3x256xf32>
    %167 = arith.mulf %164, %166 : vector<3x256xf32>
    %c0_66 = arith.constant 0 : index
    %c143_67 = arith.constant 143 : index
    %168 = vector.load %arg10[%c0_66, %c143_67] : memref<3x512xf32, #tpu.memory_space<vmem>>, vector<3x256xf32>
    %169 = vector.extract_strided_slice %2 {offsets = [6, 0], sizes = [1, 256], strides = [1, 1]} : vector<9x256xf32> to vector<1x256xf32>
    %170 = vector.broadcast %169 : vector<1x256xf32> to vector<3x256xf32>
    %171 = arith.mulf %168, %170 : vector<3x256xf32>
    %c0_68 = arith.constant 0 : index
    %c144_69 = arith.constant 144 : index
    %172 = vector.load %arg10[%c0_68, %c144_69] : memref<3x512xf32, #tpu.memory_space<vmem>>, vector<3x256xf32>
    %173 = vector.extract_strided_slice %2 {offsets = [7, 0], sizes = [1, 256], strides = [1, 1]} : vector<9x256xf32> to vector<1x256xf32>
    %174 = vector.broadcast %173 : vector<1x256xf32> to vector<3x256xf32>
    %175 = arith.mulf %172, %174 : vector<3x256xf32>
    %c0_70 = arith.constant 0 : index
    %c145_71 = arith.constant 145 : index
    %176 = vector.load %arg10[%c0_70, %c145_71] : memref<3x512xf32, #tpu.memory_space<vmem>>, vector<3x256xf32>
    %177 = vector.extract_strided_slice %2 {offsets = [8, 0], sizes = [1, 256], strides = [1, 1]} : vector<9x256xf32> to vector<1x256xf32>
    %178 = vector.broadcast %177 : vector<1x256xf32> to vector<3x256xf32>
    %179 = arith.mulf %176, %178 : vector<3x256xf32>
    %180 = vector.extract_strided_slice %21 {offsets = [18, 0, 0], sizes = [9, 3, 3], strides = [1, 1, 1]} : vector<63x3x3xf32> to vector<9x3x3xf32>
    %181 = vector.extract_strided_slice %22 {offsets = [6, 0], sizes = [3, 1], strides = [1, 1]} : vector<21x1xf32> to vector<3x1xf32>
    %182 = vector.extract_strided_slice %180 {offsets = [0, 0, 0], sizes = [1, 3, 3], strides = [1, 1, 1]} : vector<9x3x3xf32> to vector<1x3x3xf32>
    %183 = vector.shape_cast %182 : vector<1x3x3xf32> to vector<3x3xf32>
    %cst_72 = arith.constant dense<0.000000e+00> : vector<3x256xf32>
    %184 = tpu.matmul %183, %151, %cst_72 {dimension_numbers = #tpu.dot_dimension_numbers<[1], [0], [0], [1], [0, 0, 1, 1], [], []>} : vector<3x3xf32>, vector<3x256xf32>, vector<3x256xf32> -> vector<3x256xf32>
    %185 = vector.extract_strided_slice %180 {offsets = [1, 0, 0], sizes = [1, 3, 3], strides = [1, 1, 1]} : vector<9x3x3xf32> to vector<1x3x3xf32>
    %186 = vector.shape_cast %185 : vector<1x3x3xf32> to vector<3x3xf32>
    %cst_73 = arith.constant dense<0.000000e+00> : vector<3x256xf32>
    %187 = tpu.matmul %186, %155, %cst_73 {dimension_numbers = #tpu.dot_dimension_numbers<[1], [0], [0], [1], [0, 0, 1, 1], [], []>} : vector<3x3xf32>, vector<3x256xf32>, vector<3x256xf32> -> vector<3x256xf32>
    %188 = arith.addf %184, %187 : vector<3x256xf32>
    %189 = vector.extract_strided_slice %180 {offsets = [2, 0, 0], sizes = [1, 3, 3], strides = [1, 1, 1]} : vector<9x3x3xf32> to vector<1x3x3xf32>
    %190 = vector.shape_cast %189 : vector<1x3x3xf32> to vector<3x3xf32>
    %cst_74 = arith.constant dense<0.000000e+00> : vector<3x256xf32>
    %191 = tpu.matmul %190, %159, %cst_74 {dimension_numbers = #tpu.dot_dimension_numbers<[1], [0], [0], [1], [0, 0, 1, 1], [], []>} : vector<3x3xf32>, vector<3x256xf32>, vector<3x256xf32> -> vector<3x256xf32>
    %192 = arith.addf %188, %191 : vector<3x256xf32>
    %193 = vector.extract_strided_slice %180 {offsets = [3, 0, 0], sizes = [1, 3, 3], strides = [1, 1, 1]} : vector<9x3x3xf32> to vector<1x3x3xf32>
    %194 = vector.shape_cast %193 : vector<1x3x3xf32> to vector<3x3xf32>
    %cst_75 = arith.constant dense<0.000000e+00> : vector<3x256xf32>
    %195 = tpu.matmul %194, %163, %cst_75 {dimension_numbers = #tpu.dot_dimension_numbers<[1], [0], [0], [1], [0, 0, 1, 1], [], []>} : vector<3x3xf32>, vector<3x256xf32>, vector<3x256xf32> -> vector<3x256xf32>
    %196 = arith.addf %192, %195 : vector<3x256xf32>
    %197 = vector.extract_strided_slice %180 {offsets = [4, 0, 0], sizes = [1, 3, 3], strides = [1, 1, 1]} : vector<9x3x3xf32> to vector<1x3x3xf32>
    %198 = vector.shape_cast %197 : vector<1x3x3xf32> to vector<3x3xf32>
    %cst_76 = arith.constant dense<0.000000e+00> : vector<3x256xf32>
    %199 = tpu.matmul %198, %146, %cst_76 {dimension_numbers = #tpu.dot_dimension_numbers<[1], [0], [0], [1], [0, 0, 1, 1], [], []>} : vector<3x3xf32>, vector<3x256xf32>, vector<3x256xf32> -> vector<3x256xf32>
    %200 = arith.addf %196, %199 : vector<3x256xf32>
    %201 = vector.extract_strided_slice %180 {offsets = [5, 0, 0], sizes = [1, 3, 3], strides = [1, 1, 1]} : vector<9x3x3xf32> to vector<1x3x3xf32>
    %202 = vector.shape_cast %201 : vector<1x3x3xf32> to vector<3x3xf32>
    %cst_77 = arith.constant dense<0.000000e+00> : vector<3x256xf32>
    %203 = tpu.matmul %202, %167, %cst_77 {dimension_numbers = #tpu.dot_dimension_numbers<[1], [0], [0], [1], [0, 0, 1, 1], [], []>} : vector<3x3xf32>, vector<3x256xf32>, vector<3x256xf32> -> vector<3x256xf32>
    %204 = arith.addf %200, %203 : vector<3x256xf32>
    %205 = vector.extract_strided_slice %180 {offsets = [6, 0, 0], sizes = [1, 3, 3], strides = [1, 1, 1]} : vector<9x3x3xf32> to vector<1x3x3xf32>
    %206 = vector.shape_cast %205 : vector<1x3x3xf32> to vector<3x3xf32>
    %cst_78 = arith.constant dense<0.000000e+00> : vector<3x256xf32>
    %207 = tpu.matmul %206, %171, %cst_78 {dimension_numbers = #tpu.dot_dimension_numbers<[1], [0], [0], [1], [0, 0, 1, 1], [], []>} : vector<3x3xf32>, vector<3x256xf32>, vector<3x256xf32> -> vector<3x256xf32>
    %208 = arith.addf %204, %207 : vector<3x256xf32>
    %209 = vector.extract_strided_slice %180 {offsets = [7, 0, 0], sizes = [1, 3, 3], strides = [1, 1, 1]} : vector<9x3x3xf32> to vector<1x3x3xf32>
    %210 = vector.shape_cast %209 : vector<1x3x3xf32> to vector<3x3xf32>
    %cst_79 = arith.constant dense<0.000000e+00> : vector<3x256xf32>
    %211 = tpu.matmul %210, %175, %cst_79 {dimension_numbers = #tpu.dot_dimension_numbers<[1], [0], [0], [1], [0, 0, 1, 1], [], []>} : vector<3x3xf32>, vector<3x256xf32>, vector<3x256xf32> -> vector<3x256xf32>
    %212 = arith.addf %208, %211 : vector<3x256xf32>
    %213 = vector.extract_strided_slice %180 {offsets = [8, 0, 0], sizes = [1, 3, 3], strides = [1, 1, 1]} : vector<9x3x3xf32> to vector<1x3x3xf32>
    %214 = vector.shape_cast %213 : vector<1x3x3xf32> to vector<3x3xf32>
    %cst_80 = arith.constant dense<0.000000e+00> : vector<3x256xf32>
    %215 = tpu.matmul %214, %179, %cst_80 {dimension_numbers = #tpu.dot_dimension_numbers<[1], [0], [0], [1], [0, 0, 1, 1], [], []>} : vector<3x3xf32>, vector<3x256xf32>, vector<3x256xf32> -> vector<3x256xf32>
    %216 = arith.addf %212, %215 : vector<3x256xf32>
    %217 = vector.broadcast %181 : vector<3x1xf32> to vector<3x256xf32>
    %218 = arith.addf %216, %217 : vector<3x256xf32>
    %cst_81 = arith.constant 0.000000e+00 : f32
    %219 = vector.broadcast %cst_81 : f32 to vector<3x256xf32>
    %220 = arith.cmpf oge, %218, %219 : vector<3x256xf32>
    %cst_82 = arith.constant 5.000000e-02 : f32
    %221 = vector.broadcast %cst_82 : f32 to vector<3x256xf32>
    %222 = arith.mulf %221, %218 : vector<3x256xf32>
    %223 = arith.select %220, %218, %222 : vector<3x256xi1>, vector<3x256xf32>
    %224 = vector.extract_strided_slice %21 {offsets = [27, 0, 0], sizes = [9, 3, 3], strides = [1, 1, 1]} : vector<63x3x3xf32> to vector<9x3x3xf32>
    %225 = vector.extract_strided_slice %22 {offsets = [9, 0], sizes = [3, 1], strides = [1, 1]} : vector<21x1xf32> to vector<3x1xf32>
    %226 = vector.extract_strided_slice %224 {offsets = [0, 0, 0], sizes = [1, 3, 3], strides = [1, 1, 1]} : vector<9x3x3xf32> to vector<1x3x3xf32>
    %227 = vector.shape_cast %226 : vector<1x3x3xf32> to vector<3x3xf32>
    %cst_83 = arith.constant dense<0.000000e+00> : vector<3x256xf32>
    %228 = tpu.matmul %227, %151, %cst_83 {dimension_numbers = #tpu.dot_dimension_numbers<[1], [0], [0], [1], [0, 0, 1, 1], [], []>} : vector<3x3xf32>, vector<3x256xf32>, vector<3x256xf32> -> vector<3x256xf32>
    %229 = vector.extract_strided_slice %224 {offsets = [1, 0, 0], sizes = [1, 3, 3], strides = [1, 1, 1]} : vector<9x3x3xf32> to vector<1x3x3xf32>
    %230 = vector.shape_cast %229 : vector<1x3x3xf32> to vector<3x3xf32>
    %cst_84 = arith.constant dense<0.000000e+00> : vector<3x256xf32>
    %231 = tpu.matmul %230, %155, %cst_84 {dimension_numbers = #tpu.dot_dimension_numbers<[1], [0], [0], [1], [0, 0, 1, 1], [], []>} : vector<3x3xf32>, vector<3x256xf32>, vector<3x256xf32> -> vector<3x256xf32>
    %232 = arith.addf %228, %231 : vector<3x256xf32>
    %233 = vector.extract_strided_slice %224 {offsets = [2, 0, 0], sizes = [1, 3, 3], strides = [1, 1, 1]} : vector<9x3x3xf32> to vector<1x3x3xf32>
    %234 = vector.shape_cast %233 : vector<1x3x3xf32> to vector<3x3xf32>
    %cst_85 = arith.constant dense<0.000000e+00> : vector<3x256xf32>
    %235 = tpu.matmul %234, %159, %cst_85 {dimension_numbers = #tpu.dot_dimension_numbers<[1], [0], [0], [1], [0, 0, 1, 1], [], []>} : vector<3x3xf32>, vector<3x256xf32>, vector<3x256xf32> -> vector<3x256xf32>
    %236 = arith.addf %232, %235 : vector<3x256xf32>
    %237 = vector.extract_strided_slice %224 {offsets = [3, 0, 0], sizes = [1, 3, 3], strides = [1, 1, 1]} : vector<9x3x3xf32> to vector<1x3x3xf32>
    %238 = vector.shape_cast %237 : vector<1x3x3xf32> to vector<3x3xf32>
    %cst_86 = arith.constant dense<0.000000e+00> : vector<3x256xf32>
    %239 = tpu.matmul %238, %163, %cst_86 {dimension_numbers = #tpu.dot_dimension_numbers<[1], [0], [0], [1], [0, 0, 1, 1], [], []>} : vector<3x3xf32>, vector<3x256xf32>, vector<3x256xf32> -> vector<3x256xf32>
    %240 = arith.addf %236, %239 : vector<3x256xf32>
    %241 = vector.extract_strided_slice %224 {offsets = [4, 0, 0], sizes = [1, 3, 3], strides = [1, 1, 1]} : vector<9x3x3xf32> to vector<1x3x3xf32>
    %242 = vector.shape_cast %241 : vector<1x3x3xf32> to vector<3x3xf32>
    %cst_87 = arith.constant dense<0.000000e+00> : vector<3x256xf32>
    %243 = tpu.matmul %242, %146, %cst_87 {dimension_numbers = #tpu.dot_dimension_numbers<[1], [0], [0], [1], [0, 0, 1, 1], [], []>} : vector<3x3xf32>, vector<3x256xf32>, vector<3x256xf32> -> vector<3x256xf32>
    %244 = arith.addf %240, %243 : vector<3x256xf32>
    %245 = vector.extract_strided_slice %224 {offsets = [5, 0, 0], sizes = [1, 3, 3], strides = [1, 1, 1]} : vector<9x3x3xf32> to vector<1x3x3xf32>
    %246 = vector.shape_cast %245 : vector<1x3x3xf32> to vector<3x3xf32>
    %cst_88 = arith.constant dense<0.000000e+00> : vector<3x256xf32>
    %247 = tpu.matmul %246, %167, %cst_88 {dimension_numbers = #tpu.dot_dimension_numbers<[1], [0], [0], [1], [0, 0, 1, 1], [], []>} : vector<3x3xf32>, vector<3x256xf32>, vector<3x256xf32> -> vector<3x256xf32>
    %248 = arith.addf %244, %247 : vector<3x256xf32>
    %249 = vector.extract_strided_slice %224 {offsets = [6, 0, 0], sizes = [1, 3, 3], strides = [1, 1, 1]} : vector<9x3x3xf32> to vector<1x3x3xf32>
    %250 = vector.shape_cast %249 : vector<1x3x3xf32> to vector<3x3xf32>
    %cst_89 = arith.constant dense<0.000000e+00> : vector<3x256xf32>
    %251 = tpu.matmul %250, %171, %cst_89 {dimension_numbers = #tpu.dot_dimension_numbers<[1], [0], [0], [1], [0, 0, 1, 1], [], []>} : vector<3x3xf32>, vector<3x256xf32>, vector<3x256xf32> -> vector<3x256xf32>
    %252 = arith.addf %248, %251 : vector<3x256xf32>
    %253 = vector.extract_strided_slice %224 {offsets = [7, 0, 0], sizes = [1, 3, 3], strides = [1, 1, 1]} : vector<9x3x3xf32> to vector<1x3x3xf32>
    %254 = vector.shape_cast %253 : vector<1x3x3xf32> to vector<3x3xf32>
    %cst_90 = arith.constant dense<0.000000e+00> : vector<3x256xf32>
    %255 = tpu.matmul %254, %175, %cst_90 {dimension_numbers = #tpu.dot_dimension_numbers<[1], [0], [0], [1], [0, 0, 1, 1], [], []>} : vector<3x3xf32>, vector<3x256xf32>, vector<3x256xf32> -> vector<3x256xf32>
    %256 = arith.addf %252, %255 : vector<3x256xf32>
    %257 = vector.extract_strided_slice %224 {offsets = [8, 0, 0], sizes = [1, 3, 3], strides = [1, 1, 1]} : vector<9x3x3xf32> to vector<1x3x3xf32>
    %258 = vector.shape_cast %257 : vector<1x3x3xf32> to vector<3x3xf32>
    %cst_91 = arith.constant dense<0.000000e+00> : vector<3x256xf32>
    %259 = tpu.matmul %258, %179, %cst_91 {dimension_numbers = #tpu.dot_dimension_numbers<[1], [0], [0], [1], [0, 0, 1, 1], [], []>} : vector<3x3xf32>, vector<3x256xf32>, vector<3x256xf32> -> vector<3x256xf32>
    %260 = arith.addf %256, %259 : vector<3x256xf32>
    %261 = vector.broadcast %225 : vector<3x1xf32> to vector<3x256xf32>
    %262 = arith.addf %260, %261 : vector<3x256xf32>
    %263 = arith.addf %262, %146 : vector<3x256xf32>
    %cst_92 = arith.constant 0.000000e+00 : f32
    %264 = vector.broadcast %cst_92 : f32 to vector<3x256xf32>
    %265 = arith.cmpf oge, %263, %264 : vector<3x256xf32>
    %cst_93 = arith.constant 5.000000e-02 : f32
    %266 = vector.broadcast %cst_93 : f32 to vector<3x256xf32>
    %267 = arith.mulf %266, %263 : vector<3x256xf32>
    %268 = arith.select %265, %263, %267 : vector<3x256xi1>, vector<3x256xf32>
    %c0_94 = arith.constant 0 : index
    %c128_95 = arith.constant 128 : index
    %269 = vector.load %arg10[%c0_94, %c128_95] : memref<3x512xf32, #tpu.memory_space<vmem>>, vector<3x256xf32>
    tpu.vector_store %arg10[%c0_94, %c128_95], %268 {strides = array<i32>} : memref<3x512xf32, #tpu.memory_space<vmem>>, vector<3x256xf32>,
    %c0_96 = arith.constant 0 : index
    %c111_97 = arith.constant 111 : index
    %270 = vector.load %arg10[%c0_96, %c111_97] : memref<3x512xf32, #tpu.memory_space<vmem>>, vector<3x256xf32>
    %271 = vector.extract_strided_slice %2 {offsets = [0, 0], sizes = [1, 256], strides = [1, 1]} : vector<9x256xf32> to vector<1x256xf32>
    %272 = vector.broadcast %271 : vector<1x256xf32> to vector<3x256xf32>
    %273 = arith.mulf %270, %272 : vector<3x256xf32>
    %c0_98 = arith.constant 0 : index
    %c112_99 = arith.constant 112 : index
    %274 = vector.load %arg10[%c0_98, %c112_99] : memref<3x512xf32, #tpu.memory_space<vmem>>, vector<3x256xf32>
    %275 = vector.extract_strided_slice %2 {offsets = [1, 0], sizes = [1, 256], strides = [1, 1]} : vector<9x256xf32> to vector<1x256xf32>
    %276 = vector.broadcast %275 : vector<1x256xf32> to vector<3x256xf32>
    %277 = arith.mulf %274, %276 : vector<3x256xf32>
    %c0_100 = arith.constant 0 : index
    %c113_101 = arith.constant 113 : index
    %278 = vector.load %arg10[%c0_100, %c113_101] : memref<3x512xf32, #tpu.memory_space<vmem>>, vector<3x256xf32>
    %279 = vector.extract_strided_slice %2 {offsets = [2, 0], sizes = [1, 256], strides = [1, 1]} : vector<9x256xf32> to vector<1x256xf32>
    %280 = vector.broadcast %279 : vector<1x256xf32> to vector<3x256xf32>
    %281 = arith.mulf %278, %280 : vector<3x256xf32>
    %c0_102 = arith.constant 0 : index
    %c127_103 = arith.constant 127 : index
    %282 = vector.load %arg10[%c0_102, %c127_103] : memref<3x512xf32, #tpu.memory_space<vmem>>, vector<3x256xf32>
    %283 = vector.extract_strided_slice %2 {offsets = [3, 0], sizes = [1, 256], strides = [1, 1]} : vector<9x256xf32> to vector<1x256xf32>
    %284 = vector.broadcast %283 : vector<1x256xf32> to vector<3x256xf32>
    %285 = arith.mulf %282, %284 : vector<3x256xf32>
    %c0_104 = arith.constant 0 : index
    %c129_105 = arith.constant 129 : index
    %286 = vector.load %arg10[%c0_104, %c129_105] : memref<3x512xf32, #tpu.memory_space<vmem>>, vector<3x256xf32>
    %287 = vector.extract_strided_slice %2 {offsets = [5, 0], sizes = [1, 256], strides = [1, 1]} : vector<9x256xf32> to vector<1x256xf32>
    %288 = vector.broadcast %287 : vector<1x256xf32> to vector<3x256xf32>
    %289 = arith.mulf %286, %288 : vector<3x256xf32>
    %c0_106 = arith.constant 0 : index
    %c143_107 = arith.constant 143 : index
    %290 = vector.load %arg10[%c0_106, %c143_107] : memref<3x512xf32, #tpu.memory_space<vmem>>, vector<3x256xf32>
    %291 = vector.extract_strided_slice %2 {offsets = [6, 0], sizes = [1, 256], strides = [1, 1]} : vector<9x256xf32> to vector<1x256xf32>
    %292 = vector.broadcast %291 : vector<1x256xf32> to vector<3x256xf32>
    %293 = arith.mulf %290, %292 : vector<3x256xf32>
    %c0_108 = arith.constant 0 : index
    %c144_109 = arith.constant 144 : index
    %294 = vector.load %arg10[%c0_108, %c144_109] : memref<3x512xf32, #tpu.memory_space<vmem>>, vector<3x256xf32>
    %295 = vector.extract_strided_slice %2 {offsets = [7, 0], sizes = [1, 256], strides = [1, 1]} : vector<9x256xf32> to vector<1x256xf32>
    %296 = vector.broadcast %295 : vector<1x256xf32> to vector<3x256xf32>
    %297 = arith.mulf %294, %296 : vector<3x256xf32>
    %c0_110 = arith.constant 0 : index
    %c145_111 = arith.constant 145 : index
    %298 = vector.load %arg10[%c0_110, %c145_111] : memref<3x512xf32, #tpu.memory_space<vmem>>, vector<3x256xf32>
    %299 = vector.extract_strided_slice %2 {offsets = [8, 0], sizes = [1, 256], strides = [1, 1]} : vector<9x256xf32> to vector<1x256xf32>
    %300 = vector.broadcast %299 : vector<1x256xf32> to vector<3x256xf32>
    %301 = arith.mulf %298, %300 : vector<3x256xf32>
    %302 = vector.extract_strided_slice %21 {offsets = [36, 0, 0], sizes = [9, 3, 3], strides = [1, 1, 1]} : vector<63x3x3xf32> to vector<9x3x3xf32>
    %303 = vector.extract_strided_slice %22 {offsets = [12, 0], sizes = [3, 1], strides = [1, 1]} : vector<21x1xf32> to vector<3x1xf32>
    %304 = vector.extract_strided_slice %302 {offsets = [0, 0, 0], sizes = [1, 3, 3], strides = [1, 1, 1]} : vector<9x3x3xf32> to vector<1x3x3xf32>
    %305 = vector.shape_cast %304 : vector<1x3x3xf32> to vector<3x3xf32>
    %cst_112 = arith.constant dense<0.000000e+00> : vector<3x256xf32>
    %306 = tpu.matmul %305, %273, %cst_112 {dimension_numbers = #tpu.dot_dimension_numbers<[1], [0], [0], [1], [0, 0, 1, 1], [], []>} : vector<3x3xf32>, vector<3x256xf32>, vector<3x256xf32> -> vector<3x256xf32>
    %307 = vector.extract_strided_slice %302 {offsets = [1, 0, 0], sizes = [1, 3, 3], strides = [1, 1, 1]} : vector<9x3x3xf32> to vector<1x3x3xf32>
    %308 = vector.shape_cast %307 : vector<1x3x3xf32> to vector<3x3xf32>
    %cst_113 = arith.constant dense<0.000000e+00> : vector<3x256xf32>
    %309 = tpu.matmul %308, %277, %cst_113 {dimension_numbers = #tpu.dot_dimension_numbers<[1], [0], [0], [1], [0, 0, 1, 1], [], []>} : vector<3x3xf32>, vector<3x256xf32>, vector<3x256xf32> -> vector<3x256xf32>
    %310 = arith.addf %306, %309 : vector<3x256xf32>
    %311 = vector.extract_strided_slice %302 {offsets = [2, 0, 0], sizes = [1, 3, 3], strides = [1, 1, 1]} : vector<9x3x3xf32> to vector<1x3x3xf32>
    %312 = vector.shape_cast %311 : vector<1x3x3xf32> to vector<3x3xf32>
    %cst_114 = arith.constant dense<0.000000e+00> : vector<3x256xf32>
    %313 = tpu.matmul %312, %281, %cst_114 {dimension_numbers = #tpu.dot_dimension_numbers<[1], [0], [0], [1], [0, 0, 1, 1], [], []>} : vector<3x3xf32>, vector<3x256xf32>, vector<3x256xf32> -> vector<3x256xf32>
    %314 = arith.addf %310, %313 : vector<3x256xf32>
    %315 = vector.extract_strided_slice %302 {offsets = [3, 0, 0], sizes = [1, 3, 3], strides = [1, 1, 1]} : vector<9x3x3xf32> to vector<1x3x3xf32>
    %316 = vector.shape_cast %315 : vector<1x3x3xf32> to vector<3x3xf32>
    %cst_115 = arith.constant dense<0.000000e+00> : vector<3x256xf32>
    %317 = tpu.matmul %316, %285, %cst_115 {dimension_numbers = #tpu.dot_dimension_numbers<[1], [0], [0], [1], [0, 0, 1, 1], [], []>} : vector<3x3xf32>, vector<3x256xf32>, vector<3x256xf32> -> vector<3x256xf32>
    %318 = arith.addf %314, %317 : vector<3x256xf32>
    %319 = vector.extract_strided_slice %302 {offsets = [4, 0, 0], sizes = [1, 3, 3], strides = [1, 1, 1]} : vector<9x3x3xf32> to vector<1x3x3xf32>
    %320 = vector.shape_cast %319 : vector<1x3x3xf32> to vector<3x3xf32>
    %cst_116 = arith.constant dense<0.000000e+00> : vector<3x256xf32>
    %321 = tpu.matmul %320, %268, %cst_116 {dimension_numbers = #tpu.dot_dimension_numbers<[1], [0], [0], [1], [0, 0, 1, 1], [], []>} : vector<3x3xf32>, vector<3x256xf32>, vector<3x256xf32> -> vector<3x256xf32>
    %322 = arith.addf %318, %321 : vector<3x256xf32>
    %323 = vector.extract_strided_slice %302 {offsets = [5, 0, 0], sizes = [1, 3, 3], strides = [1, 1, 1]} : vector<9x3x3xf32> to vector<1x3x3xf32>
    %324 = vector.shape_cast %323 : vector<1x3x3xf32> to vector<3x3xf32>
    %cst_117 = arith.constant dense<0.000000e+00> : vector<3x256xf32>
    %325 = tpu.matmul %324, %289, %cst_117 {dimension_numbers = #tpu.dot_dimension_numbers<[1], [0], [0], [1], [0, 0, 1, 1], [], []>} : vector<3x3xf32>, vector<3x256xf32>, vector<3x256xf32> -> vector<3x256xf32>
    %326 = arith.addf %322, %325 : vector<3x256xf32>
    %327 = vector.extract_strided_slice %302 {offsets = [6, 0, 0], sizes = [1, 3, 3], strides = [1, 1, 1]} : vector<9x3x3xf32> to vector<1x3x3xf32>
    %328 = vector.shape_cast %327 : vector<1x3x3xf32> to vector<3x3xf32>
    %cst_118 = arith.constant dense<0.000000e+00> : vector<3x256xf32>
    %329 = tpu.matmul %328, %293, %cst_118 {dimension_numbers = #tpu.dot_dimension_numbers<[1], [0], [0], [1], [0, 0, 1, 1], [], []>} : vector<3x3xf32>, vector<3x256xf32>, vector<3x256xf32> -> vector<3x256xf32>
    %330 = arith.addf %326, %329 : vector<3x256xf32>
    %331 = vector.extract_strided_slice %302 {offsets = [7, 0, 0], sizes = [1, 3, 3], strides = [1, 1, 1]} : vector<9x3x3xf32> to vector<1x3x3xf32>
    %332 = vector.shape_cast %331 : vector<1x3x3xf32> to vector<3x3xf32>
    %cst_119 = arith.constant dense<0.000000e+00> : vector<3x256xf32>
    %333 = tpu.matmul %332, %297, %cst_119 {dimension_numbers = #tpu.dot_dimension_numbers<[1], [0], [0], [1], [0, 0, 1, 1], [], []>} : vector<3x3xf32>, vector<3x256xf32>, vector<3x256xf32> -> vector<3x256xf32>
    %334 = arith.addf %330, %333 : vector<3x256xf32>
    %335 = vector.extract_strided_slice %302 {offsets = [8, 0, 0], sizes = [1, 3, 3], strides = [1, 1, 1]} : vector<9x3x3xf32> to vector<1x3x3xf32>
    %336 = vector.shape_cast %335 : vector<1x3x3xf32> to vector<3x3xf32>
    %cst_120 = arith.constant dense<0.000000e+00> : vector<3x256xf32>
    %337 = tpu.matmul %336, %301, %cst_120 {dimension_numbers = #tpu.dot_dimension_numbers<[1], [0], [0], [1], [0, 0, 1, 1], [], []>} : vector<3x3xf32>, vector<3x256xf32>, vector<3x256xf32> -> vector<3x256xf32>
    %338 = arith.addf %334, %337 : vector<3x256xf32>
    %339 = vector.broadcast %303 : vector<3x1xf32> to vector<3x256xf32>
    %340 = arith.addf %338, %339 : vector<3x256xf32>
    %cst_121 = arith.constant 0.000000e+00 : f32
    %341 = vector.broadcast %cst_121 : f32 to vector<3x256xf32>
    %342 = arith.cmpf oge, %340, %341 : vector<3x256xf32>
    %cst_122 = arith.constant 5.000000e-02 : f32
    %343 = vector.broadcast %cst_122 : f32 to vector<3x256xf32>
    %344 = arith.mulf %343, %340 : vector<3x256xf32>
    %345 = arith.select %342, %340, %344 : vector<3x256xi1>, vector<3x256xf32>
    %346 = vector.extract_strided_slice %21 {offsets = [45, 0, 0], sizes = [9, 3, 3], strides = [1, 1, 1]} : vector<63x3x3xf32> to vector<9x3x3xf32>
    %347 = vector.extract_strided_slice %22 {offsets = [15, 0], sizes = [3, 1], strides = [1, 1]} : vector<21x1xf32> to vector<3x1xf32>
    %348 = vector.extract_strided_slice %346 {offsets = [0, 0, 0], sizes = [1, 3, 3], strides = [1, 1, 1]} : vector<9x3x3xf32> to vector<1x3x3xf32>
    %349 = vector.shape_cast %348 : vector<1x3x3xf32> to vector<3x3xf32>
    %cst_123 = arith.constant dense<0.000000e+00> : vector<3x256xf32>
    %350 = tpu.matmul %349, %273, %cst_123 {dimension_numbers = #tpu.dot_dimension_numbers<[1], [0], [0], [1], [0, 0, 1, 1], [], []>} : vector<3x3xf32>, vector<3x256xf32>, vector<3x256xf32> -> vector<3x256xf32>
    %351 = vector.extract_strided_slice %346 {offsets = [1, 0, 0], sizes = [1, 3, 3], strides = [1, 1, 1]} : vector<9x3x3xf32> to vector<1x3x3xf32>
    %352 = vector.shape_cast %351 : vector<1x3x3xf32> to vector<3x3xf32>
    %cst_124 = arith.constant dense<0.000000e+00> : vector<3x256xf32>
    %353 = tpu.matmul %352, %277, %cst_124 {dimension_numbers = #tpu.dot_dimension_numbers<[1], [0], [0], [1], [0, 0, 1, 1], [], []>} : vector<3x3xf32>, vector<3x256xf32>, vector<3x256xf32> -> vector<3x256xf32>
    %354 = arith.addf %350, %353 : vector<3x256xf32>
    %355 = vector.extract_strided_slice %346 {offsets = [2, 0, 0], sizes = [1, 3, 3], strides = [1, 1, 1]} : vector<9x3x3xf32> to vector<1x3x3xf32>
    %356 = vector.shape_cast %355 : vector<1x3x3xf32> to vector<3x3xf32>
    %cst_125 = arith.constant dense<0.000000e+00> : vector<3x256xf32>
    %357 = tpu.matmul %356, %281, %cst_125 {dimension_numbers = #tpu.dot_dimension_numbers<[1], [0], [0], [1], [0, 0, 1, 1], [], []>} : vector<3x3xf32>, vector<3x256xf32>, vector<3x256xf32> -> vector<3x256xf32>
    %358 = arith.addf %354, %357 : vector<3x256xf32>
    %359 = vector.extract_strided_slice %346 {offsets = [3, 0, 0], sizes = [1, 3, 3], strides = [1, 1, 1]} : vector<9x3x3xf32> to vector<1x3x3xf32>
    %360 = vector.shape_cast %359 : vector<1x3x3xf32> to vector<3x3xf32>
    %cst_126 = arith.constant dense<0.000000e+00> : vector<3x256xf32>
    %361 = tpu.matmul %360, %285, %cst_126 {dimension_numbers = #tpu.dot_dimension_numbers<[1], [0], [0], [1], [0, 0, 1, 1], [], []>} : vector<3x3xf32>, vector<3x256xf32>, vector<3x256xf32> -> vector<3x256xf32>
    %362 = arith.addf %358, %361 : vector<3x256xf32>
    %363 = vector.extract_strided_slice %346 {offsets = [4, 0, 0], sizes = [1, 3, 3], strides = [1, 1, 1]} : vector<9x3x3xf32> to vector<1x3x3xf32>
    %364 = vector.shape_cast %363 : vector<1x3x3xf32> to vector<3x3xf32>
    %cst_127 = arith.constant dense<0.000000e+00> : vector<3x256xf32>
    %365 = tpu.matmul %364, %268, %cst_127 {dimension_numbers = #tpu.dot_dimension_numbers<[1], [0], [0], [1], [0, 0, 1, 1], [], []>} : vector<3x3xf32>, vector<3x256xf32>, vector<3x256xf32> -> vector<3x256xf32>
    %366 = arith.addf %362, %365 : vector<3x256xf32>
    %367 = vector.extract_strided_slice %346 {offsets = [5, 0, 0], sizes = [1, 3, 3], strides = [1, 1, 1]} : vector<9x3x3xf32> to vector<1x3x3xf32>
    %368 = vector.shape_cast %367 : vector<1x3x3xf32> to vector<3x3xf32>
    %cst_128 = arith.constant dense<0.000000e+00> : vector<3x256xf32>
    %369 = tpu.matmul %368, %289, %cst_128 {dimension_numbers = #tpu.dot_dimension_numbers<[1], [0], [0], [1], [0, 0, 1, 1], [], []>} : vector<3x3xf32>, vector<3x256xf32>, vector<3x256xf32> -> vector<3x256xf32>
    %370 = arith.addf %366, %369 : vector<3x256xf32>
    %371 = vector.extract_strided_slice %346 {offsets = [6, 0, 0], sizes = [1, 3, 3], strides = [1, 1, 1]} : vector<9x3x3xf32> to vector<1x3x3xf32>
    %372 = vector.shape_cast %371 : vector<1x3x3xf32> to vector<3x3xf32>
    %cst_129 = arith.constant dense<0.000000e+00> : vector<3x256xf32>
    %373 = tpu.matmul %372, %293, %cst_129 {dimension_numbers = #tpu.dot_dimension_numbers<[1], [0], [0], [1], [0, 0, 1, 1], [], []>} : vector<3x3xf32>, vector<3x256xf32>, vector<3x256xf32> -> vector<3x256xf32>
    %374 = arith.addf %370, %373 : vector<3x256xf32>
    %375 = vector.extract_strided_slice %346 {offsets = [7, 0, 0], sizes = [1, 3, 3], strides = [1, 1, 1]} : vector<9x3x3xf32> to vector<1x3x3xf32>
    %376 = vector.shape_cast %375 : vector<1x3x3xf32> to vector<3x3xf32>
    %cst_130 = arith.constant dense<0.000000e+00> : vector<3x256xf32>
    %377 = tpu.matmul %376, %297, %cst_130 {dimension_numbers = #tpu.dot_dimension_numbers<[1], [0], [0], [1], [0, 0, 1, 1], [], []>} : vector<3x3xf32>, vector<3x256xf32>, vector<3x256xf32> -> vector<3x256xf32>
    %378 = arith.addf %374, %377 : vector<3x256xf32>
    %379 = vector.extract_strided_slice %346 {offsets = [8, 0, 0], sizes = [1, 3, 3], strides = [1, 1, 1]} : vector<9x3x3xf32> to vector<1x3x3xf32>
    %380 = vector.shape_cast %379 : vector<1x3x3xf32> to vector<3x3xf32>
    %cst_131 = arith.constant dense<0.000000e+00> : vector<3x256xf32>
    %381 = tpu.matmul %380, %301, %cst_131 {dimension_numbers = #tpu.dot_dimension_numbers<[1], [0], [0], [1], [0, 0, 1, 1], [], []>} : vector<3x3xf32>, vector<3x256xf32>, vector<3x256xf32> -> vector<3x256xf32>
    %382 = arith.addf %378, %381 : vector<3x256xf32>
    %383 = vector.broadcast %347 : vector<3x1xf32> to vector<3x256xf32>
    %384 = arith.addf %382, %383 : vector<3x256xf32>
    %385 = arith.addf %384, %268 : vector<3x256xf32>
    %cst_132 = arith.constant 0.000000e+00 : f32
    %386 = vector.broadcast %cst_132 : f32 to vector<3x256xf32>
    %387 = arith.cmpf oge, %385, %386 : vector<3x256xf32>
    %cst_133 = arith.constant 5.000000e-02 : f32
    %388 = vector.broadcast %cst_133 : f32 to vector<3x256xf32>
    %389 = arith.mulf %388, %385 : vector<3x256xf32>
    %390 = arith.select %387, %385, %389 : vector<3x256xi1>, vector<3x256xf32>
    %c0_134 = arith.constant 0 : index
    %c128_135 = arith.constant 128 : index
    %391 = vector.load %arg10[%c0_134, %c128_135] : memref<3x512xf32, #tpu.memory_space<vmem>>, vector<3x256xf32>
    tpu.vector_store %arg10[%c0_134, %c128_135], %390 {strides = array<i32>} : memref<3x512xf32, #tpu.memory_space<vmem>>, vector<3x256xf32>,
    %c0_136 = arith.constant 0 : index
    %c111_137 = arith.constant 111 : index
    %392 = vector.load %arg10[%c0_136, %c111_137] : memref<3x512xf32, #tpu.memory_space<vmem>>, vector<3x256xf32>
    %393 = vector.extract_strided_slice %2 {offsets = [0, 0], sizes = [1, 256], strides = [1, 1]} : vector<9x256xf32> to vector<1x256xf32>
    %394 = vector.broadcast %393 : vector<1x256xf32> to vector<3x256xf32>
    %395 = arith.mulf %392, %394 : vector<3x256xf32>
    %c0_138 = arith.constant 0 : index
    %c112_139 = arith.constant 112 : index
    %396 = vector.load %arg10[%c0_138, %c112_139] : memref<3x512xf32, #tpu.memory_space<vmem>>, vector<3x256xf32>
    %397 = vector.extract_strided_slice %2 {offsets = [1, 0], sizes = [1, 256], strides = [1, 1]} : vector<9x256xf32> to vector<1x256xf32>
    %398 = vector.broadcast %397 : vector<1x256xf32> to vector<3x256xf32>
    %399 = arith.mulf %396, %398 : vector<3x256xf32>
    %c0_140 = arith.constant 0 : index
    %c113_141 = arith.constant 113 : index
    %400 = vector.load %arg10[%c0_140, %c113_141] : memref<3x512xf32, #tpu.memory_space<vmem>>, vector<3x256xf32>
    %401 = vector.extract_strided_slice %2 {offsets = [2, 0], sizes = [1, 256], strides = [1, 1]} : vector<9x256xf32> to vector<1x256xf32>
    %402 = vector.broadcast %401 : vector<1x256xf32> to vector<3x256xf32>
    %403 = arith.mulf %400, %402 : vector<3x256xf32>
    %c0_142 = arith.constant 0 : index
    %c127_143 = arith.constant 127 : index
    %404 = vector.load %arg10[%c0_142, %c127_143] : memref<3x512xf32, #tpu.memory_space<vmem>>, vector<3x256xf32>
    %405 = vector.extract_strided_slice %2 {offsets = [3, 0], sizes = [1, 256], strides = [1, 1]} : vector<9x256xf32> to vector<1x256xf32>
    %406 = vector.broadcast %405 : vector<1x256xf32> to vector<3x256xf32>
    %407 = arith.mulf %404, %406 : vector<3x256xf32>
    %c0_144 = arith.constant 0 : index
    %c129_145 = arith.constant 129 : index
    %408 = vector.load %arg10[%c0_144, %c129_145] : memref<3x512xf32, #tpu.memory_space<vmem>>, vector<3x256xf32>
    %409 = vector.extract_strided_slice %2 {offsets = [5, 0], sizes = [1, 256], strides = [1, 1]} : vector<9x256xf32> to vector<1x256xf32>
    %410 = vector.broadcast %409 : vector<1x256xf32> to vector<3x256xf32>
    %411 = arith.mulf %408, %410 : vector<3x256xf32>
    %c0_146 = arith.constant 0 : index
    %c143_147 = arith.constant 143 : index
    %412 = vector.load %arg10[%c0_146, %c143_147] : memref<3x512xf32, #tpu.memory_space<vmem>>, vector<3x256xf32>
    %413 = vector.extract_strided_slice %2 {offsets = [6, 0], sizes = [1, 256], strides = [1, 1]} : vector<9x256xf32> to vector<1x256xf32>
    %414 = vector.broadcast %413 : vector<1x256xf32> to vector<3x256xf32>
    %415 = arith.mulf %412, %414 : vector<3x256xf32>
    %c0_148 = arith.constant 0 : index
    %c144_149 = arith.constant 144 : index
    %416 = vector.load %arg10[%c0_148, %c144_149] : memref<3x512xf32, #tpu.memory_space<vmem>>, vector<3x256xf32>
    %417 = vector.extract_strided_slice %2 {offsets = [7, 0], sizes = [1, 256], strides = [1, 1]} : vector<9x256xf32> to vector<1x256xf32>
    %418 = vector.broadcast %417 : vector<1x256xf32> to vector<3x256xf32>
    %419 = arith.mulf %416, %418 : vector<3x256xf32>
    %c0_150 = arith.constant 0 : index
    %c145_151 = arith.constant 145 : index
    %420 = vector.load %arg10[%c0_150, %c145_151] : memref<3x512xf32, #tpu.memory_space<vmem>>, vector<3x256xf32>
    %421 = vector.extract_strided_slice %2 {offsets = [8, 0], sizes = [1, 256], strides = [1, 1]} : vector<9x256xf32> to vector<1x256xf32>
    %422 = vector.broadcast %421 : vector<1x256xf32> to vector<3x256xf32>
    %423 = arith.mulf %420, %422 : vector<3x256xf32>
    %424 = vector.extract_strided_slice %21 {offsets = [54, 0, 0], sizes = [9, 3, 3], strides = [1, 1, 1]} : vector<63x3x3xf32> to vector<9x3x3xf32>
    %425 = vector.extract_strided_slice %22 {offsets = [18, 0], sizes = [3, 1], strides = [1, 1]} : vector<21x1xf32> to vector<3x1xf32>
    %426 = vector.extract_strided_slice %424 {offsets = [0, 0, 0], sizes = [1, 3, 3], strides = [1, 1, 1]} : vector<9x3x3xf32> to vector<1x3x3xf32>
    %427 = vector.shape_cast %426 : vector<1x3x3xf32> to vector<3x3xf32>
    %cst_152 = arith.constant dense<0.000000e+00> : vector<3x256xf32>
    %428 = tpu.matmul %427, %395, %cst_152 {dimension_numbers = #tpu.dot_dimension_numbers<[1], [0], [0], [1], [0, 0, 1, 1], [], []>} : vector<3x3xf32>, vector<3x256xf32>, vector<3x256xf32> -> vector<3x256xf32>
    %429 = vector.extract_strided_slice %424 {offsets = [1, 0, 0], sizes = [1, 3, 3], strides = [1, 1, 1]} : vector<9x3x3xf32> to vector<1x3x3xf32>
    %430 = vector.shape_cast %429 : vector<1x3x3xf32> to vector<3x3xf32>
    %cst_153 = arith.constant dense<0.000000e+00> : vector<3x256xf32>
    %431 = tpu.matmul %430, %399, %cst_153 {dimension_numbers = #tpu.dot_dimension_numbers<[1], [0], [0], [1], [0, 0, 1, 1], [], []>} : vector<3x3xf32>, vector<3x256xf32>, vector<3x256xf32> -> vector<3x256xf32>
    %432 = arith.addf %428, %431 : vector<3x256xf32>
    %433 = vector.extract_strided_slice %424 {offsets = [2, 0, 0], sizes = [1, 3, 3], strides = [1, 1, 1]} : vector<9x3x3xf32> to vector<1x3x3xf32>
    %434 = vector.shape_cast %433 : vector<1x3x3xf32> to vector<3x3xf32>
    %cst_154 = arith.constant dense<0.000000e+00> : vector<3x256xf32>
    %435 = tpu.matmul %434, %403, %cst_154 {dimension_numbers = #tpu.dot_dimension_numbers<[1], [0], [0], [1], [0, 0, 1, 1], [], []>} : vector<3x3xf32>, vector<3x256xf32>, vector<3x256xf32> -> vector<3x256xf32>
    %436 = arith.addf %432, %435 : vector<3x256xf32>
    %437 = vector.extract_strided_slice %424 {offsets = [3, 0, 0], sizes = [1, 3, 3], strides = [1, 1, 1]} : vector<9x3x3xf32> to vector<1x3x3xf32>
    %438 = vector.shape_cast %437 : vector<1x3x3xf32> to vector<3x3xf32>
    %cst_155 = arith.constant dense<0.000000e+00> : vector<3x256xf32>
    %439 = tpu.matmul %438, %407, %cst_155 {dimension_numbers = #tpu.dot_dimension_numbers<[1], [0], [0], [1], [0, 0, 1, 1], [], []>} : vector<3x3xf32>, vector<3x256xf32>, vector<3x256xf32> -> vector<3x256xf32>
    %440 = arith.addf %436, %439 : vector<3x256xf32>
    %441 = vector.extract_strided_slice %424 {offsets = [4, 0, 0], sizes = [1, 3, 3], strides = [1, 1, 1]} : vector<9x3x3xf32> to vector<1x3x3xf32>
    %442 = vector.shape_cast %441 : vector<1x3x3xf32> to vector<3x3xf32>
    %cst_156 = arith.constant dense<0.000000e+00> : vector<3x256xf32>
    %443 = tpu.matmul %442, %390, %cst_156 {dimension_numbers = #tpu.dot_dimension_numbers<[1], [0], [0], [1], [0, 0, 1, 1], [], []>} : vector<3x3xf32>, vector<3x256xf32>, vector<3x256xf32> -> vector<3x256xf32>
    %444 = arith.addf %440, %443 : vector<3x256xf32>
    %445 = vector.extract_strided_slice %424 {offsets = [5, 0, 0], sizes = [1, 3, 3], strides = [1, 1, 1]} : vector<9x3x3xf32> to vector<1x3x3xf32>
    %446 = vector.shape_cast %445 : vector<1x3x3xf32> to vector<3x3xf32>
    %cst_157 = arith.constant dense<0.000000e+00> : vector<3x256xf32>
    %447 = tpu.matmul %446, %411, %cst_157 {dimension_numbers = #tpu.dot_dimension_numbers<[1], [0], [0], [1], [0, 0, 1, 1], [], []>} : vector<3x3xf32>, vector<3x256xf32>, vector<3x256xf32> -> vector<3x256xf32>
    %448 = arith.addf %444, %447 : vector<3x256xf32>
    %449 = vector.extract_strided_slice %424 {offsets = [6, 0, 0], sizes = [1, 3, 3], strides = [1, 1, 1]} : vector<9x3x3xf32> to vector<1x3x3xf32>
    %450 = vector.shape_cast %449 : vector<1x3x3xf32> to vector<3x3xf32>
    %cst_158 = arith.constant dense<0.000000e+00> : vector<3x256xf32>
    %451 = tpu.matmul %450, %415, %cst_158 {dimension_numbers = #tpu.dot_dimension_numbers<[1], [0], [0], [1], [0, 0, 1, 1], [], []>} : vector<3x3xf32>, vector<3x256xf32>, vector<3x256xf32> -> vector<3x256xf32>
    %452 = arith.addf %448, %451 : vector<3x256xf32>
    %453 = vector.extract_strided_slice %424 {offsets = [7, 0, 0], sizes = [1, 3, 3], strides = [1, 1, 1]} : vector<9x3x3xf32> to vector<1x3x3xf32>
    %454 = vector.shape_cast %453 : vector<1x3x3xf32> to vector<3x3xf32>
    %cst_159 = arith.constant dense<0.000000e+00> : vector<3x256xf32>
    %455 = tpu.matmul %454, %419, %cst_159 {dimension_numbers = #tpu.dot_dimension_numbers<[1], [0], [0], [1], [0, 0, 1, 1], [], []>} : vector<3x3xf32>, vector<3x256xf32>, vector<3x256xf32> -> vector<3x256xf32>
    %456 = arith.addf %452, %455 : vector<3x256xf32>
    %457 = vector.extract_strided_slice %424 {offsets = [8, 0, 0], sizes = [1, 3, 3], strides = [1, 1, 1]} : vector<9x3x3xf32> to vector<1x3x3xf32>
    %458 = vector.shape_cast %457 : vector<1x3x3xf32> to vector<3x3xf32>
    %cst_160 = arith.constant dense<0.000000e+00> : vector<3x256xf32>
    %459 = tpu.matmul %458, %423, %cst_160 {dimension_numbers = #tpu.dot_dimension_numbers<[1], [0], [0], [1], [0, 0, 1, 1], [], []>} : vector<3x3xf32>, vector<3x256xf32>, vector<3x256xf32> -> vector<3x256xf32>
    %460 = arith.addf %456, %459 : vector<3x256xf32>
    %461 = vector.broadcast %425 : vector<3x1xf32> to vector<3x256xf32>
    %462 = arith.addf %460, %461 : vector<3x256xf32>
    %cst_161 = arith.constant 0.000000e+00 : f32
    %463 = vector.broadcast %cst_161 : f32 to vector<3x256xf32>
    %464 = arith.cmpf oge, %462, %463 : vector<3x256xf32>
    %cst_162 = arith.constant 5.000000e-02 : f32
    %465 = vector.broadcast %cst_162 : f32 to vector<3x256xf32>
    %466 = arith.mulf %465, %462 : vector<3x256xf32>
    %467 = arith.select %464, %462, %466 : vector<3x256xi1>, vector<3x256xf32>
    %468 = vector.extract_strided_slice %23 {offsets = [0, 0], sizes = [3, 3], strides = [1, 1]} : vector<3x12xf32> to vector<3x3xf32>
    %cst_163 = arith.constant dense<0.000000e+00> : vector<3x256xf32>
    %469 = tpu.matmul %468, %101, %cst_163 {dimension_numbers = #tpu.dot_dimension_numbers<[1], [0], [0], [1], [0, 0, 1, 1], [], []>} : vector<3x3xf32>, vector<3x256xf32>, vector<3x256xf32> -> vector<3x256xf32>
    %470 = vector.extract_strided_slice %23 {offsets = [0, 3], sizes = [3, 3], strides = [1, 1]} : vector<3x12xf32> to vector<3x3xf32>
    %cst_164 = arith.constant dense<0.000000e+00> : vector<3x256xf32>
    %471 = tpu.matmul %470, %223, %cst_164 {dimension_numbers = #tpu.dot_dimension_numbers<[1], [0], [0], [1], [0, 0, 1, 1], [], []>} : vector<3x3xf32>, vector<3x256xf32>, vector<3x256xf32> -> vector<3x256xf32>
    %472 = arith.addf %469, %471 : vector<3x256xf32>
    %473 = vector.extract_strided_slice %23 {offsets = [0, 6], sizes = [3, 3], strides = [1, 1]} : vector<3x12xf32> to vector<3x3xf32>
    %cst_165 = arith.constant dense<0.000000e+00> : vector<3x256xf32>
    %474 = tpu.matmul %473, %345, %cst_165 {dimension_numbers = #tpu.dot_dimension_numbers<[1], [0], [0], [1], [0, 0, 1, 1], [], []>} : vector<3x3xf32>, vector<3x256xf32>, vector<3x256xf32> -> vector<3x256xf32>
    %475 = arith.addf %472, %474 : vector<3x256xf32>
    %476 = vector.extract_strided_slice %23 {offsets = [0, 9], sizes = [3, 3], strides = [1, 1]} : vector<3x12xf32> to vector<3x3xf32>
    %cst_166 = arith.constant dense<0.000000e+00> : vector<3x256xf32>
    %477 = tpu.matmul %476, %467, %cst_166 {dimension_numbers = #tpu.dot_dimension_numbers<[1], [0], [0], [1], [0, 0, 1, 1], [], []>} : vector<3x3xf32>, vector<3x256xf32>, vector<3x256xf32> -> vector<3x256xf32>
    %478 = arith.addf %475, %477 : vector<3x256xf32>
    %479 = vector.broadcast %24 : vector<3x1xf32> to vector<3x256xf32>
    %480 = arith.addf %478, %479 : vector<3x256xf32>
    %cst_167 = arith.constant 0.000000e+00 : f32
    %481 = vector.broadcast %cst_167 : f32 to vector<3x256xf32>
    %482 = arith.subf %481, %480 : vector<3x256xf32>
    %483 = math.exp %482 : vector<3x256xf32>
    %cst_168 = arith.constant 1.000000e+00 : f32
    %484 = vector.broadcast %cst_168 : f32 to vector<3x256xf32>
    %485 = arith.addf %484, %483 : vector<3x256xf32>
    %cst_169 = arith.constant 1.000000e+00 : f32
    %486 = vector.broadcast %cst_169 : f32 to vector<3x256xf32>
    %487 = arith.divf %486, %485 : vector<3x256xf32>
    %cst_170 = arith.constant 9.99999974E-5 : f32
    %cst_171 = arith.constant 1.000000e+00 : f32
    %488 = vector.broadcast %cst_170 : f32 to vector<3x256xf32>
    %489 = arith.maximumf %488, %487 : vector<3x256xf32>
    %490 = vector.broadcast %cst_171 : f32 to vector<3x256xf32>
    %491 = arith.minimumf %490, %489 : vector<3x256xf32>
    %492 = tpu.reciprocal %491 {approx = true} : vector<3x256xf32> -> vector<3x256xf32>
    %493 = arith.mulf %4, %492 : vector<3x256xf32>
    %cst_172 = arith.constant 0.000000e+00 : f32
    %cst_173 = arith.constant 1.000000e+00 : f32
    %494 = vector.broadcast %cst_172 : f32 to vector<3x256xf32>
    %495 = arith.maximumf %494, %493 : vector<3x256xf32>
    %496 = vector.broadcast %cst_173 : f32 to vector<3x256xf32>
    %497 = arith.minimumf %496, %495 : vector<3x256xf32>
    %c0_174 = arith.constant 0 : index
    %c0_175 = arith.constant 0 : index
    %c0_176 = arith.constant 0 : index
    %498 = vector.load %arg8[%c0_174, %c0_175, %c0_176] : memref<1x3x256xf32, #tpu.memory_space<vmem>>, vector<1x3x256xf32>
    %499 = vector.shape_cast %498 : vector<1x3x256xf32> to vector<3x256xf32>
    %500 = vector.shape_cast %497 : vector<3x256xf32> to vector<1x3x256xf32>
    tpu.vector_store %arg8[%c0_174, %c0_175, %c0_176], %500 {strides = array<i32>} : memref<1x3x256xf32, #tpu.memory_space<vmem>>, vector<1x3x256xf32>,
    %c0_177 = arith.constant 0 : index
    %c0_178 = arith.constant 0 : index
    %c0_179 = arith.constant 0 : index
    %501 = vector.load %arg9[%c0_177, %c0_178, %c0_179] : memref<1x3x256xf32, #tpu.memory_space<vmem>>, vector<1x3x256xf32>
    %502 = vector.shape_cast %501 : vector<1x3x256xf32> to vector<3x256xf32>
    %503 = vector.shape_cast %491 : vector<3x256xf32> to vector<1x3x256xf32>
    tpu.vector_store %arg9[%c0_177, %c0_178, %c0_179], %503 {strides = array<i32>} : memref<1x3x256xf32, #tpu.memory_space<vmem>>, vector<1x3x256xf32>,
    return
  }
  func.func @transform_0(%arg0: i32) -> (i32, i32) {
    %c0_i32 = arith.constant 0 : i32
    %c0_i32_0 = arith.constant 0 : i32
    %c0_i32_1 = arith.constant 0 : i32
    return %c0_i32, %c0_i32_0 : i32, i32
  }
  func.func @transform_1(%arg0: i32) -> (i32, i32, i32) {
    %c0_i32 = arith.constant 0 : i32
    %c0_i32_0 = arith.constant 0 : i32
    %c0_i32_1 = arith.constant 0 : i32
    return %arg0, %c0_i32, %c0_i32_0 : i32, i32, i32
  }
  func.func @transform_2(%arg0: i32) -> (i32, i32, i32) {
    %c0_i32 = arith.constant 0 : i32
    %c0_i32_0 = arith.constant 0 : i32
    %c0_i32_1 = arith.constant 0 : i32
    return %arg0, %c0_i32, %c0_i32_0 : i32, i32, i32
  }
  func.func @transform_3(%arg0: i32) -> (i32, i32, i32) {
    %c0_i32 = arith.constant 0 : i32
    %c0_i32_0 = arith.constant 0 : i32
    %c0_i32_1 = arith.constant 0 : i32
    %c0_i32_2 = arith.constant 0 : i32
    return %c0_i32, %c0_i32_0, %c0_i32_1 : i32, i32, i32
  }
  func.func @transform_4(%arg0: i32) -> (i32, i32) {
    %c0_i32 = arith.constant 0 : i32
    %c0_i32_0 = arith.constant 0 : i32
    %c0_i32_1 = arith.constant 0 : i32
    return %c0_i32, %c0_i32_0 : i32, i32
  }
  func.func @transform_5(%arg0: i32) -> (i32, i32) {
    %c0_i32 = arith.constant 0 : i32
    %c0_i32_0 = arith.constant 0 : i32
    %c0_i32_1 = arith.constant 0 : i32
    return %c0_i32, %c0_i32_0 : i32, i32
  }
  func.func @transform_6(%arg0: i32) -> (i32, i32) {
    %c0_i32 = arith.constant 0 : i32
    %c0_i32_0 = arith.constant 0 : i32
    %c0_i32_1 = arith.constant 0 : i32
    return %c0_i32, %c0_i32_0 : i32, i32
  }
  func.func @transform_7(%arg0: i32) -> (i32, i32, i32) {
    %c0_i32 = arith.constant 0 : i32
    %c0_i32_0 = arith.constant 0 : i32
    %c0_i32_1 = arith.constant 0 : i32
    return %arg0, %c0_i32, %c0_i32_0 : i32, i32, i32
  }
  func.func @transform_8(%arg0: i32) -> (i32, i32, i32) {
    %c0_i32 = arith.constant 0 : i32
    %c0_i32_0 = arith.constant 0 : i32
    %c0_i32_1 = arith.constant 0 : i32
    return %arg0, %c0_i32, %c0_i32_0 : i32, i32, i32
  }
}

</mosaic_0001>

<bundles_post_ra>
// kernel: tpu_custom_call.1
= control target key start
LH: loop header
LB: loop body
LE: loop exit
PB: predicated region body
PF: predicated region fallthrough
CT: control target
= control target key end

     0   :  { %s6839_s27 = smov 0   ;;  %s7827_s0 = inlined_call_operand.vmem [shape: f32[9,256], index: 0, kind: input, shape index: {}]   ;;  %s7828_s1 = inlined_call_operand.vmem [shape: f32[2,3,256], index: 1, kind: input, shape index: {}]   ;;  %s7829_s2 = inlined_call_operand.vmem [shape: f32[2,3,256], index: 2, kind: input, shape index: {}]   ;;  %s7830_s3 = inlined_call_operand.vmem [shape: f32[63,3,3], index: 3, kind: input, shape index: {}]   ;;  %s7831_s4 = inlined_call_operand.vmem [shape: f32[21,1], index: 4, kind: input, shape index: {}]   ;;  %s7832_s5 = inlined_call_operand.vmem [shape: f32[3,12], index: 5, kind: input, shape index: {}]   ;;  %s7833_s6 = inlined_call_operand.vmem [shape: f32[3,1], index: 6, kind: input, shape index: {}]   ;;  %s7834_s7 = inlined_call_operand.vmem [shape: f32[2,3,256], index: 7, kind: output, shape index: {0}]   ;;  %s7835_s8 = inlined_call_operand.vmem [shape: f32[2,3,256], index: 8, kind: output, shape index: {1}]  }
   0x1 LB: > { %s6519_s2 = sadd.s32 4294967295, %s6779_s27   ;;  %p6523_p0 = scmp.ge.s32.totalorder %s6779_s27, 1  ;;  %s6779_s27 = sphi %s6839_s27, %s19_s27  }
   0x2   : > { %p275_p1 = scmp.lt.s32.totalorder %s6779_s27, 3 }
   0x4   : > { %p276_p2 = pnand %p6523_p0, %p275_p1 }
   0x5   : > { %p319_p3 = scmp.lt.s32.totalorder (!%p276_p2), %s6519_s2, 1  ;;  %s6782_s14 = smov (!%p276_p2), 17  }
   0x6   : > { %279 = sbr.rel (%p276_p2) target bundleno = 2083 (0x823), region = 48  ;;  %s6783_s19 = smov (!%p276_p2), 1  }
   0x7   : > { %s6784_s20 = smov (!%p276_p2), 16   ;;  %s6785_s21 = smov (!%p276_p2), 127  }
   0x8   : > { %s6786_s22 = smov (!%p276_p2), 112   ;;  %s6787_s23 = smov (!%p276_p2), 111  }
   0x9   : > { %s6788_s24 = smov (!%p276_p2), 113   ;;  %s6789_s25 = smov (!%p276_p2), 15  }
   0xb   : > { %v349_v0 = vlaneseq  ;;  %v6530_v1 = vld [vmem:[%s7827_s0 + $0x10] ss:$0 sm:$0xff]  ;;  %v6531_v2 = vld [vmem:[%s7827_s0 + $0x18] ss:$0 sm:$0xff]  ;;  %v6781_v5 = vmov 0.0   ;;  %v341_v6 = vld [vmem:[%s7827_s0] sm:$0xff] }
   0xc   : > { %v426_v4 = vcombine.low %v6530_v1, %v6531_v2  ;;  %340 = vst [vmem:[#allocation2 + $0x8] sm:$0x77] %v6781_v5  ;;  %339 = vst [vmem:[#allocation2] sm:$0x77] %v6781_v5  ;;  %798 = vmatprep.mubr.f32.mxu1 %v6781_v5  ;;  %709 = vmatprep.mubr.f32.mxu0 %v6781_v5  ;;  %v342_v7 = vld [vmem:[%s7827_s0 + $0x8] sm:$0xff]  ;;  %s7837_s2 = smov (!%p319_p3, %s6519_s2), 1 }
   0xd   : > { %v350_v3 = vshrl.u32 %v349_v0, 7  ;;  %s6864_s15 = sshll.u32 %s7837_s2, 3  ;;  %vm363_vm0 = vcmask 7168   ;;  %vm397_vm1 = vcmask 130048   ;;  %vm430_vm2 = vcmask 138240  }
   0xe   : > { %427 = vrot.lane.b32.xlu1 %v426_v4, %s6782_s14  ;;  %s323_s18 = scalar_lea.vmem %s7828_s1, %s6864_s15  ;;  %v6790_v57 = vmov 0   ;;  %vm377_vm3 = vcmask 1043456   ;;  %vm379_vm4 = vcmask 1039360   ;;  %vm412_vm5 = vcmask 916480   ;;  %s333_s17 = scalar_lea.vmem %s7834_s7, %s6864_s15 }
   0xf   : > { %v351_v8 = vsub.s32 5, %v350_v3  ;;  %v385_v9 = vsub.s32 7, %v350_v3  ;;  %v6870_v15 = vld [vmem:[%s323_s18] sm:$0x77]  ;;  %v541_v16 = vsub.s32 1, %v350_v3  ;;  %v522_v20 = vsub.s32 0, %v350_v3  ;;  %6759 = vset.pattern.permute.xlu0 %v6790_v57  ;;  %6760 = vset.pattern.permute.xlu1 %v6790_v57 }
  0x10   : > { %346 = vst [vmem:[#allocation2 + $0x4] sm:$0x77] %v6870_v15  ;;  %v560_v22 = vsub.s32 2, %v350_v3  ;;  %v580_v28 = vsub.s32 3, %v350_v3  ;;  %v603_v30 = vsub.s32 6, %v350_v3  ;;  %vm445_vm6 = vcmask 908288  }
  0x11   : > { %v352_v10 = vrot.slane %v341_v6, %v351_v8  ;;  %v356_v11 = vrot.slane %v342_v7, %v351_v8  ;;  %v386_v12 = vrot.slane %v341_v6, %v385_v9  ;;  %v390_v13 = vrot.slane %v342_v7, %v385_v9 }
  0x12   : > { %v542_v18 = vrot.slane %v341_v6, %v541_v16  ;;  %v546_v19 = vrot.slane %v342_v7, %v541_v16  ;;  %v523_v23 = vrot.slane %v341_v6, %v522_v20  ;;  %v527_v24 = vrot.slane %v342_v7, %v522_v20 }
  0x13   : > { %v359_v14 = vcombine.low %v352_v10, %v356_v11  ;;  %v393_v17 = vcombine.low %v386_v12, %v390_v13  ;;  %v561_v25 = vrot.slane %v341_v6, %v560_v22  ;;  %v565_v26 = vrot.slane %v342_v7, %v560_v22  ;;  %v348_v38 = vld [vmem:[#allocation2 + $0xc] sm:$0x7] }
  0x14   : > { %v549_v21 = vcombine.low %v542_v18, %v546_v19  ;;  %v530_v27 = vcombine.low %v523_v23, %v527_v24  ;;  %v581_v31 = vrot.slane %v341_v6, %v580_v28  ;;  %v585_v32 = vrot.slane %v342_v7, %v580_v28  ;;  %v6909_v54 = vld [vmem:[#allocation2 + $0xc] sm:$0x7] }
  0x15   : > { %360 = vrot.lane.b32.xlu0 %v359_v14, %s6783_s19  ;;  %v568_v29 = vcombine.low %v561_v25, %v565_v26  ;;  %v604_v33 = vrot.slane %v341_v6, %v603_v30  ;;  %v608_v34 = vrot.slane %v342_v7, %v603_v30  ;;  %vm572_vm7 = vcmask 924672  }
  0x16   : > { %v588_v35 = vcombine.low %v581_v31, %v585_v32  ;;  %vm615_vm8 = vcmask 121856   ;;  %vm640_vm9 = vcmask 1042432   ;;  %vm636_vm10 = vcmask 23552  }
  0x17   : > { %v611_v36 = vcombine.low %v604_v33, %v608_v34  ;;  %v347_v40 = vld [vmem:[#allocation2 + $0x4] sm:$0x77]  ;;  %vm2972_vm13 = vcmask 1041408  }
  0x19   : > { %394 = vrot.lane.b32.xlu0 %v393_v17, %s6784_s20 }
  0x80   : > { %v428_v41 = vpop.permute.xlu1 %427 }
  0x81   : > { %v6886_v47 = vrot.slane %v428_v41, 4 }
  0x83   : > { %v6897_v51 = vsel %vm430_vm2, %v6886_v47, %v428_v41  ;;  %v435_v52 = vmul.f32 %v6886_v47, %v348_v38 }
  0x84   : > { %v434_v53 = vmul.f32 %v6897_v51, %v347_v40 }
  0x87   : > { %v361_v37 = vpop.permute.xlu0 %360 }
  0x88   : > { %v6875_v39 = vrot.slane %v361_v37, 4 }
  0x8a   : > { %v6879_v42 = vsel %vm363_vm0, %v6875_v39, %v361_v37  ;;  %v368_v43 = vmul.f32 %v6875_v39, %v348_v38  ;;  %v600_v55 = vmul.f32 %v6909_v54, %v6875_v39 }
  0x8b   : > { %v395_v44 = vpop.permute.xlu0 %394  ;;  %v367_v45 = vmul.f32 %v6879_v42, %v347_v40 }
  0x8c   : > { %v6883_v46 = vrot.slane %v395_v44, 4  ;;  %373 = vrot.lane.b32.xlu0 %v368_v43, %s6785_s21 }
  0x8d   : > { %371 = vrot.lane.b32.xlu1 %v367_v45, %s6785_s21 }
  0x8e   : > { %v6891_v48 = vsel %vm397_vm1, %v6883_v46, %v395_v44  ;;  %v402_v49 = vmul.f32 %v6883_v46, %v348_v38  ;;  %v622_v56 = vmul.f32 %v6909_v54, %v6883_v46 }
  0x8f   : > { %v401_v50 = vmul.f32 %v6891_v48, %v347_v40 }
  0x90   : > { %407 = vrot.lane.b32.xlu0 %v402_v49, %s6786_s22 }
  0x91   : > { %405 = vrot.lane.b32.xlu1 %v401_v50, %s6786_s22 }
  0x94   : > { %440 = vrot.lane.b32.xlu0 %v435_v52, %s6787_s23 }
  0x95   : > { %438 = vrot.lane.b32.xlu1 %v434_v53, %s6787_s23 }
  0x98   : > { %531 = vrot.lane.b32.xlu0 %v530_v27, %s6787_s23 }
  0x99   : > { %550 = vrot.lane.b32.xlu1 %v549_v21, %s6786_s22 }
  0x9c   : > { %589 = vrot.lane.b32.xlu0 %v588_v35, %s6785_s21 }
  0x9d   : > { %569 = vrot.lane.b32.xlu1 %v568_v29, %s6788_s24 }
  0xa1   : > { %612 = vrot.lane.b32.xlu1 %v611_v36, %s6789_s25 }
  0xa5   : > { %1076 = vrot.lane.b32.xlu1 %v600_v55, %s6785_s21 }
  0xa9   : > { %1258 = vrot.lane.b32.xlu1 %v622_v56, %s6786_s22 }
  0xfe   : > { %v374_v58 = vpop.permute.xlu0 %373 }
  0xff   : > { %v376_v59 = vrot.slane %v374_v58, 4  ;;  %v372_v60 = vpop.permute.xlu1 %371 }
 0x100   : > { %v375_v61 = vrot.slane %v372_v60, 4 }
 0x102   : > { %v378_v62 = vsel %vm377_vm3, %v375_v61, %v376_v59  ;;  %v408_v63 = vpop.permute.xlu0 %407 }
 0x103   : > { %v410_v0 = vrot.slane %v408_v63, 4  ;;  %v406_v1 = vpop.permute.xlu1 %405  ;;  %v380_v3 = vsel %vm379_vm4, %v372_v60, %v378_v62  ;;  %v6990_v62 = vld [vmem:[#allocation2 + $0xc] sm:$0x7] }
 0x104   : > { %v409_v2 = vrot.slane %v406_v1, 4  ;;  %v382_v10 = vmax.f32 %v6870_v15, %v380_v3  ;;  %v512_v3 = vld [vmem:[%s7831_s4] sm:$0xff] }
 0x106   : > { %v411_v4 = vsel %vm377_vm3, %v409_v2, %v410_v0  ;;  %v441_v6 = vpop.permute.xlu0 %440  ;;  %v2157_v0 = vmul.f32 %v6990_v62, %v6875_v39  ;;  %v2161_v2 = vmul.f32 %v6990_v62, %v6883_v46 }
 0x107   : > { %v413_v7 = vsel %vm412_vm5, %v406_v1, %v411_v4  ;;  %v443_v8 = vrot.slane %v441_v6, 4  ;;  %v439_v9 = vpop.permute.xlu1 %438  ;;  %v624_v1 = vmul.f32 %v6909_v54, %v6886_v47 }
 0x108   : > { %v442_v11 = vrot.slane %v439_v9, 4  ;;  %v415_v12 = vmax.f32 %v382_v10, %v413_v7 }
 0x10a   : > { %v444_v13 = vsel %vm377_vm3, %v442_v11, %v443_v8  ;;  %v532_v19 = vpop.permute.xlu0 %531  ;;  %vm5200_vm3 = vcmask 1040384  }
 0x10b   : > { %v446_v14 = vsel %vm445_vm6, %v439_v9, %v444_v13  ;;  %v551_v16 = vpop.permute.xlu1 %550  ;;  %v6928_v20 = vrot.slane %v532_v19, 4 }
 0x10c   : > { %v6925_v17 = vmax.f32 %v415_v12, %v446_v14  ;;  %v6930_v22 = vrot.slane %v551_v16, 4 }
 0x10d   : > { %v6939_v27 = vsel %vm445_vm6, %v6928_v20, %v532_v19 }
 0x10e   : > { %517 = vst [vmem:[#allocation2 + $0x4] sm:$0x77] %v6925_v17  ;;  %v590_v29 = vpop.permute.xlu0 %589  ;;  %v6945_v30 = vsel %vm412_vm5, %v6930_v22, %v551_v16 }
 0x10f   : > { %v570_v18 = vpop.permute.xlu1 %569  ;;  %v6949_v33 = vrot.slane %v590_v29, 4 }
 0x110   : > { %v6951_v34 = vrot.slane %v570_v18, 4 }
 0x111   : > { %v6959_v37 = vsel %vm379_vm4, %v6949_v33, %v590_v29 }
 0x112   : > { %v6965_v38 = vsel %vm572_vm7, %v6951_v34, %v570_v18 }
 0x113   : > { %v613_v21 = vpop.permute.xlu1 %612 }
 0x114   : > { %v6932_v23 = vrot.slane %v613_v21, 4 }
 0x115   : > { %v519_v24 = vld [vmem:[#allocation2 + $0x8] sm:$0x7]  ;;  %v518_v28 = vld [vmem:[#allocation2] sm:$0x77] }
 0x116   : > { %v557_v25 = vmul.f32 %v6930_v22, %v519_v24  ;;  %v620_v26 = vmul.f32 %v6932_v23, %v6909_v54  ;;  %v537_v31 = vmul.f32 %v6939_v27, %v518_v28  ;;  %v556_v32 = vmul.f32 %v6945_v30, %v518_v28  ;;  %v597_v44 = vld [vmem:[#allocation2 + $0x4] sm:$0x77] }
 0x117   : > { %v577_v35 = vmul.f32 %v6951_v34, %v519_v24  ;;  %v538_v36 = vmul.f32 %v6928_v20, %v519_v24  ;;  %v595_v40 = vmul.f32 %v6959_v37, %v518_v28  ;;  %v576_v41 = vmul.f32 %v6965_v38, %v518_v28  ;;  %v1077_v6 = vpop.permute.xlu1 %1076 }
 0x118   : > { %632 = vrot.lane.b32.xlu1 %v557_v25, %s6784_s20  ;;  %1167 = vrot.lane.b32.xlu0 %v620_v26, %s6788_s24  ;;  %v6971_v43 = vsel %vm615_vm8, %v6932_v23, %v613_v21  ;;  %v596_v45 = vmul.f32 %v6949_v33, %v519_v24  ;;  %v599_v50 = vmul.f32 %v597_v44, %v6879_v42  ;;  %v449_v26 = vld [vmem:[%s7830_s3] sm:$0x7] }
 0x119   : > { %v619_v49 = vmul.f32 %v6971_v43, %v597_v44  ;;  %v718_v52 = vcombine.high %v537_v31, %v537_v31  ;;  %v621_v53 = vmul.f32 %v597_v44, %v6891_v48  ;;  %v898_v55 = vcombine.high %v595_v40, %v595_v40 }
 0x11a   : > { %v627_v56 = vcombine.high %v556_v32, %v556_v32  ;;  %v623_v58 = vmul.f32 %v597_v44, %v6897_v51  ;;  %v807_v59 = vcombine.high %v576_v41, %v576_v41  ;;  %v1071_v61 = vcombine.high %v599_v50, %v599_v50  ;;  %v450_v44 = vld [vmem:[%s7830_s3 + $0x4] sm:$0x7] }
 0x11b   : > { %v1162_v57 = vcombine.high %v619_v49, %v619_v49  ;;  %v1253_v63 = vcombine.high %v621_v53, %v621_v53  ;;  %v2159_v4 = vmul.f32 %v6990_v62, %v6932_v23  ;;  %v7010_v7 = vpop.permute.xlu1 %1258 }
 0x11c   : > { %719 = vrot.lane.b32.xlu1 %v537_v31, %s6782_s14  ;;  %628 = vrot.lane.b32.xlu0 %v556_v32, %s6784_s20  ;;  %v1344_v60 = vcombine.high %v623_v58, %v623_v58 }
 0x120   : > { %812 = vrot.lane.b32.xlu1 %v577_v35, %s6789_s25  ;;  %723 = vrot.lane.b32.xlu0 %v538_v36, %s6782_s14  ;;  %v452_v35 = vld [vmem:[%s7830_s3 + $0xc] sm:$0x7] }
 0x124   : > { %899 = vrot.lane.b32.xlu1 %v595_v40, %s6783_s19  ;;  %808 = vrot.lane.b32.xlu0 %v576_v41, %s6789_s25 }
 0x128   : > { %903 = vrot.lane.b32.xlu0 %v596_v45, %s6783_s19  ;;  %1163 = vrot.lane.b32.xlu1 %v619_v49, %s6788_s24 }
 0x12c   : > { %1072 = vrot.lane.b32.xlu0 %v599_v50, %s6785_s21  ;;  %721 = vrot.lane.b32.xlu1 %v718_v52, %s6782_s14 }
 0x130   : > { %1254 = vrot.lane.b32.xlu0 %v621_v53, %s6786_s22  ;;  %901 = vrot.lane.b32.xlu1 %v898_v55, %s6783_s19  ;;  %v451_v53 = vld [vmem:[%s7830_s3 + $0x8] sm:$0x7]  ;;  %v7059_v55 = vcombine.high %v6925_v17, %v6925_v17 }
 0x134   : > { %630 = vrot.lane.b32.xlu0 %v627_v56, %s6784_s20  ;;  %1165 = vrot.lane.b32.xlu1 %v1162_v57, %s6788_s24 }
 0x138   : > { %810 = vrot.lane.b32.xlu0 %v807_v59, %s6789_s25  ;;  %1347 = vrot.lane.b32.xlu1 %v1344_v60, %s6787_s23 }
 0x13c   : > { %1074 = vrot.lane.b32.xlu0 %v1071_v61, %s6785_s21  ;;  %1345 = vrot.lane.b32.xlu1 %v623_v58, %s6787_s23  ;;  %v453_v61 = vld [vmem:[%s7830_s3 + $0x10] sm:$0x7] }
 0x140   : > { %1256 = vrot.lane.b32.xlu0 %v1253_v63, %s6786_s22  ;;  %2611 = vrot.lane.b32.xlu1 %v2157_v0, %s6785_s21  ;;  %v454_v63 = vld [vmem:[%s7830_s3 + $0x14] sm:$0x7] }
 0x144   : > { %1349 = vrot.lane.b32.xlu0 %v624_v1, %s6787_s23  ;;  %2793 = vrot.lane.b32.xlu1 %v2161_v2, %s6786_s22 }
 0x148   : > { %1435 = vperm.xlu0 %6759, %v512_v3  }
 0x14c   : > { %2702 = vrot.lane.b32.xlu0 %v2159_v4, %s6788_s24  ;;  %v455_v4 = vld [vmem:[%s7830_s3 + $0x18] sm:$0x7] }
 0x18a   : > { %v1168_v54 = vpop.permute.xlu0 %1167  ;;  %v633_v8 = vpop.permute.xlu1 %632 }
 0x18e   : > { %v629_v9 = vpop.permute.xlu0 %628  ;;  %v720_v10 = vpop.permute.xlu1 %719 }
 0x192   : > { %v724_v11 = vpop.permute.xlu0 %723  ;;  %v813_v12 = vpop.permute.xlu1 %812 }
 0x196   : > { %v809_v13 = vpop.permute.xlu0 %808  ;;  %v900_v14 = vpop.permute.xlu1 %899 }
 0x19a   : > { %v904_v16 = vpop.permute.xlu0 %903  ;;  %v1164_v18 = vpop.permute.xlu1 %1163 }
 0x19e   : > { %v1073_v19 = vpop.permute.xlu0 %1072  ;;  %v722_v21 = vpop.permute.xlu1 %721 }
 0x19f   : > { %v7013_v24 = vsel %vm430_vm2, %v722_v21, %v724_v11  ;;  %v7016_v25 = vsel %vm430_vm2, %v720_v10, %v722_v21  ;;  %v459_v11 = vld [vmem:[%s7830_s3 + $0x28] sm:$0x7]  ;;  %v465_v21 = vld [vmem:[%s7830_s3 + $0x40] sm:$0x7] }
 0x1a0   : > { %6535 = vmatprep.subr.msk.mxu1 %vm640_vm9, %v7013_v24 }
 0x1a1   : > { %6536 = vmatpush1.msk.msra.mxu1 %vm640_vm9, %v7016_v25 }
 0x1a2   : > { %v1255_v28 = vpop.permute.xlu0 %1254  ;;  %v902_v29 = vpop.permute.xlu1 %901  ;;  %6537 = vmatmul.mubr.msk.f32.vlgmr.msra.gmra.mxu1 %vm636_vm10, %v449_v26 }
 0x1a3   : > { %v7027_v31 = vsel %vm363_vm0, %v900_v14, %v902_v29  ;;  %v7030_v32 = vsel %vm363_vm0, %v902_v29, %v904_v16  ;;  %978 = vmatprep.mubr.f32.mxu1 %v6781_v5  ;;  %v461_v14 = vld [vmem:[%s7830_s3 + $0x30] sm:$0x7]  ;;  %v462_v16 = vld [vmem:[%s7830_s3 + $0x34] sm:$0x7] }
 0x1a4   : > { %6541 = vmatprep.subr.msk.mxu1 %vm640_vm9, %v7030_v32 }
 0x1a5   : > { %6542 = vmatpush1.msk.msra.mxu1 %vm640_vm9, %v7027_v31 }
 0x1a6   : > { %v631_v36 = vpop.permute.xlu0 %630  ;;  %6543 = vmatmul.mubr.msk.f32.vlgmr.msra.gmra.mxu1 %vm636_vm10, %v452_v35  ;;  %v1166_v45 = vpop.permute.xlu1 %1165 }
 0x1a7   : > { %v635_v40 = vsel %vm397_vm1, %v631_v36, %v633_v8  ;;  %v634_v41 = vsel %vm397_vm1, %v629_v9, %v631_v36  ;;  %1151 = vmatprep.mubr.f32.mxu1 %v6781_v5  ;;  %v1170_v57 = vsel %vm572_vm7, %v1166_v45, %v1168_v54  ;;  %v1169_v0 = vsel %vm572_vm7, %v1164_v18, %v1166_v45  ;;  %v457_v9 = vld [vmem:[%s7830_s3 + $0x20] sm:$0x7]  ;;  %v463_v18 = vld [vmem:[%s7830_s3 + $0x38] sm:$0x7] }
 0x1a8   : > { %6532 = vmatprep.subr.msk.mxu0 %vm640_vm9, %v635_v40 }
 0x1a9   : > { %6533 = vmatpush1.msk.msra.mxu0 %vm640_vm9, %v634_v41 }
 0x1aa   : > { %v811_v49 = vpop.permute.xlu0 %810  ;;  %6534 = vmatmul.mubr.msk.f32.vlgmr.msra.gmra.mxu0 %vm636_vm10, %v450_v44  ;;  %v1348_v58 = vpop.permute.xlu1 %1347 }
 0x1ab   : > { %v814_v50 = vsel %vm615_vm8, %v809_v13, %v811_v49  ;;  %v815_v52 = vsel %vm615_vm8, %v811_v49, %v813_v12  ;;  %887 = vmatprep.mubr.f32.mxu0 %v6781_v5  ;;  %v458_v12 = vld [vmem:[%s7830_s3 + $0x24] sm:$0x7]  ;;  %v460_v13 = vld [vmem:[%s7830_s3 + $0x2c] sm:$0x7] }
 0x1ac   : > { %6538 = vmatprep.subr.msk.mxu0 %vm640_vm9, %v815_v52 }
 0x1ad   : > { %6539 = vmatpush1.msk.msra.mxu0 %vm640_vm9, %v814_v50 }
 0x1ae   : > { %v1075_v56 = vpop.permute.xlu0 %1074  ;;  %6540 = vmatmul.mubr.msk.f32.vlgmr.msra.gmra.mxu0 %vm636_vm10, %v451_v53  ;;  %6544 = vmatprep.subr.msk.mxu0 %vm640_vm9, %v7059_v55  ;;  %v1346_v54 = vpop.permute.xlu1 %1345 }
 0x1af   : > { %v1078_v59 = vsel %vm379_vm4, %v1073_v19, %v1075_v56  ;;  %v1079_v60 = vsel %vm379_vm4, %v1075_v56, %v1077_v6  ;;  %6545 = vmatpush1.msk.msra.mxu0 %vm640_vm9, %v6925_v17  ;;  %1060 = vmatprep.mubr.f32.mxu0 %v6781_v5  ;;  %v456_v6 = vld [vmem:[%s7830_s3 + $0x1c] sm:$0x7]  ;;  %v1351_v10 = vsel %vm445_vm6, %v1346_v54, %v1348_v58 }
 0x1b0   : > { %6547 = vmatprep.subr.msk.mxu1 %vm640_vm9, %v1079_v60  ;;  %6550 = vmatprep.subr.msk.mxu0 %vm640_vm9, %v1170_v57  ;;  %v464_v19 = vld [vmem:[%s7830_s3 + $0x3c] sm:$0x7] }
 0x1b1   : > { %6548 = vmatpush1.msk.msra.mxu1 %vm640_vm9, %v1078_v59 }
 0x1b2   : > { %v1257_v1 = vpop.permute.xlu0 %1256  ;;  %6546 = vmatmul.mubr.msk.f32.vlgmr.msra.gmra.mxu0 %vm636_vm10, %v453_v61  ;;  %6549 = vmatmul.mubr.msk.f32.vlgmr.msra.gmra.mxu1 %vm636_vm10, %v454_v63 }
 0x1b3   : > { %v1260_v2 = vsel %vm412_vm5, %v1255_v28, %v1257_v1  ;;  %v1261_v3 = vsel %vm412_vm5, %v1257_v1, %v7010_v7  ;;  %6551 = vmatpush1.msk.msra.mxu0 %vm640_vm9, %v1169_v0  ;;  %1242 = vmatprep.mubr.f32.mxu0 %v6781_v5 }
 0x1b4   : > { %6553 = vmatprep.subr.msk.mxu1 %vm640_vm9, %v1261_v3  ;;  %1333 = vmatprep.mubr.f32.mxu1 %v6781_v5 }
 0x1b5   : > { %6554 = vmatpush1.msk.msra.mxu1 %vm640_vm9, %v1260_v2 }
 0x1b6   : > { %v1350_v7 = vpop.permute.xlu0 %1349  ;;  %6552 = vmatmul.mubr.msk.f32.vlgmr.msra.gmra.mxu0 %vm636_vm10, %v455_v4  ;;  %6555 = vmatmul.mubr.msk.f32.vlgmr.msra.gmra.mxu1 %vm636_vm10, %v456_v6 }
 0x1b7   : > { %v1352_v8 = vsel %vm445_vm6, %v1348_v58, %v1350_v7  ;;  %6559 = vmatprep.subr.msk.mxu1 %vm640_vm9, %v635_v40  ;;  %1424 = vmatprep.mubr.f32.mxu0 %v6781_v5 }
 0x1b8   : > { %6560 = vmatpush1.msk.msra.mxu1 %vm640_vm9, %v634_v41  ;;  %6556 = vmatprep.subr.msk.mxu0 %vm640_vm9, %v1352_v8 }
 0x1b9   : > { %6565 = vmatprep.subr.msk.mxu1 %vm640_vm9, %v815_v52  ;;  %6557 = vmatpush1.msk.msra.mxu0 %vm640_vm9, %v1351_v10 }
 0x1ba   : > { %1513 = vmatprep.mubr.f32.mxu1 %v6781_v5  ;;  %6558 = vmatmul.mubr.msk.f32.vlgmr.msra.gmra.mxu0 %vm636_vm10, %v457_v9 }
 0x1bb   : > { %6561 = vmatmul.mubr.msk.f32.vlgmr.msra.gmra.mxu1 %vm636_vm10, %v459_v11  ;;  %6562 = vmatprep.subr.msk.mxu0 %vm640_vm9, %v7013_v24  ;;  %v466_v24 = vld [vmem:[%s7830_s3 + $0x44] sm:$0x7] }
 0x1bc   : > { %6566 = vmatpush1.msk.msra.mxu1 %vm640_vm9, %v814_v50  ;;  %6563 = vmatpush1.msk.msra.mxu0 %vm640_vm9, %v7016_v25 }
 0x1bd   : > { %6571 = vmatprep.subr.msk.mxu1 %vm640_vm9, %v7059_v55  ;;  %6568 = vmatprep.subr.msk.mxu0 %vm640_vm9, %v7030_v32 }
 0x1be   : > { %1587 = vmatprep.mubr.f32.mxu0 %v6781_v5  ;;  %1661 = vmatprep.mubr.f32.mxu1 %v6781_v5 }
 0x1bf   : > { %6564 = vmatmul.mubr.msk.f32.vlgmr.msra.gmra.mxu0 %vm636_vm10, %v458_v12  ;;  %6567 = vmatmul.mubr.msk.f32.vlgmr.msra.gmra.mxu1 %vm636_vm10, %v460_v13 }
 0x1c0   : > { %6569 = vmatpush1.msk.msra.mxu0 %vm640_vm9, %v7027_v31  ;;  %6572 = vmatpush1.msk.msra.mxu1 %vm640_vm9, %v6925_v17 }
 0x1c1   : > { %6574 = vmatprep.subr.msk.mxu0 %vm640_vm9, %v1079_v60  ;;  %6577 = vmatprep.subr.msk.mxu1 %vm640_vm9, %v1170_v57 }
 0x1c2   : > { %1737 = vmatprep.mubr.f32.mxu0 %v6781_v5  ;;  %1813 = vmatprep.mubr.f32.mxu1 %v6781_v5 }
 0x1c3   : > { %6570 = vmatmul.mubr.msk.f32.vlgmr.msra.gmra.mxu0 %vm636_vm10, %v461_v14  ;;  %6573 = vmatmul.mubr.msk.f32.vlgmr.msra.gmra.mxu1 %vm636_vm10, %v462_v16 }
 0x1c4   : > { %6575 = vmatpush1.msk.msra.mxu0 %vm640_vm9, %v1078_v59  ;;  %6578 = vmatpush1.msk.msra.mxu1 %vm640_vm9, %v1169_v0 }
 0x1c5   : > { %6580 = vmatprep.subr.msk.mxu0 %vm640_vm9, %v1261_v3  ;;  %6583 = vmatprep.subr.msk.mxu1 %vm640_vm9, %v1352_v8 }
 0x1c6   : > { %1889 = vmatprep.mubr.f32.mxu0 %v6781_v5  ;;  %1965 = vmatprep.mubr.f32.mxu1 %v6781_v5 }
 0x1c7   : > { %6576 = vmatmul.mubr.msk.f32.vlgmr.msra.gmra.mxu0 %vm636_vm10, %v463_v18  ;;  %6579 = vmatmul.mubr.msk.f32.vlgmr.msra.gmra.mxu1 %vm636_vm10, %v464_v19 }
 0x1c8   : > { %6581 = vmatpush1.msk.msra.mxu0 %vm640_vm9, %v1260_v2  ;;  %6584 = vmatpush1.msk.msra.mxu1 %vm640_vm9, %v1351_v10 }
 0x1c9   : > { %2041 = vmatprep.mubr.f32.mxu0 %v6781_v5  ;;  %2117 = vmatprep.mubr.f32.mxu1 %v6781_v5 }
 0x1cb   : > { %6582 = vmatmul.mubr.msk.f32.vlgmr.msra.gmra.mxu0 %vm636_vm10, %v465_v21  ;;  %6585 = vmatmul.mubr.msk.f32.vlgmr.msra.gmra.mxu1 %vm636_vm10, %v466_v24 }
 0x1cc   : > { %2246 = vmatprep.mubr.f32.mxu0 %v6781_v5  ;;  %2335 = vmatprep.mubr.f32.mxu1 %v6781_v5 }
 0x262   : > { %v800_v25 = vpop.f32.mrf.mxu1 }
 0x264   : > { %v802_v26 = vpop.f32.mrf.mxu1 }
 0x266   : > { %v980_v29 = vpop.f32.mrf.mxu1 }
 0x268   : > { %v982_v40 = vpop.f32.mrf.mxu1 }
 0x26a   : > { %v711_v28 = vpop.f32.mrf.mxu0 }
 0x26b   : > { %v801_v31 = vadd.f32 %v800_v25, %v711_v28 }
 0x26c   : > { %v713_v32 = vpop.f32.mrf.mxu0 }
 0x26d   : > { %v803_v35 = vadd.f32 %v802_v26, %v713_v32 }
 0x26e   : > { %v889_v36 = vpop.f32.mrf.mxu0 }
 0x26f   : > { %v894_v41 = vadd.f32 %v889_v36, %v801_v31 }
 0x270   : > { %v891_v44 = vpop.f32.mrf.mxu0 }
 0x271   : > { %v985_v45 = vadd.f32 %v980_v29, %v894_v41  ;;  %v895_v49 = vadd.f32 %v891_v44, %v803_v35 }
 0x272   : > { %v1062_v50 = vpop.f32.mrf.mxu0  ;;  %v1153_v52 = vpop.f32.mrf.mxu1 }
 0x273   : > { %v986_v53 = vadd.f32 %v982_v40, %v895_v49  ;;  %v1067_v56 = vadd.f32 %v1062_v50, %v985_v45 }
 0x274   : > { %v1064_v57 = vpop.f32.mrf.mxu0  ;;  %v1155_v58 = vpop.f32.mrf.mxu1 }
 0x275   : > { %v1158_v59 = vadd.f32 %v1153_v52, %v1067_v56  ;;  %v1068_v60 = vadd.f32 %v1064_v57, %v986_v53  ;;  %v7183_v52 = vpop.permute.xlu0 %1435 }
 0x276   : > { %v1244_v61 = vpop.f32.mrf.mxu0  ;;  %v1335_v63 = vpop.f32.mrf.mxu1 }
 0x277   : > { %v1159_v0 = vadd.f32 %v1155_v58, %v1068_v60  ;;  %v1249_v1 = vadd.f32 %v1244_v61, %v1158_v59  ;;  %v2126_v61 = vrot.slane %v7183_v52, 3 }
 0x278   : > { %v1246_v2 = vpop.f32.mrf.mxu0  ;;  %v1337_v3 = vpop.f32.mrf.mxu1 }
 0x279   : > { %v1340_v4 = vadd.f32 %v1335_v63, %v1249_v1  ;;  %v1250_v6 = vadd.f32 %v1246_v2, %v1159_v0 }
 0x27a   : > { %v1426_v54 = vpop.f32.mrf.mxu0 }
 0x27b   : > { %v1341_v7 = vadd.f32 %v1337_v3, %v1250_v6  ;;  %v7179_v8 = vadd.f32 %v1426_v54, %v1340_v4  ;;  %v1515_v9 = vpop.f32.mrf.mxu1 }
 0x27c   : > { %v1428_v10 = vpop.f32.mrf.mxu0 }
 0x27d   : > { %v7181_v11 = vadd.f32 %v1428_v10, %v1341_v7  ;;  %v1517_v12 = vpop.f32.mrf.mxu1 }
 0x27f   : > { %v1589_v13 = vpop.f32.mrf.mxu0  ;;  %v1663_v14 = vpop.f32.mrf.mxu1 }
 0x280   : > { %v1590_v16 = vadd.f32 %v1589_v13, %v1515_v9 }
 0x281   : > { %v1591_v18 = vpop.f32.mrf.mxu0  ;;  %v1665_v19 = vpop.f32.mrf.mxu1 }
 0x282   : > { %v1668_v21 = vadd.f32 %v1663_v14, %v1590_v16  ;;  %v1592_v24 = vadd.f32 %v1591_v18, %v1517_v12 }
 0x283   : > { %v1739_v25 = vpop.f32.mrf.mxu0  ;;  %v1815_v26 = vpop.f32.mrf.mxu1 }
 0x284   : > { %v1669_v28 = vadd.f32 %v1665_v19, %v1592_v24  ;;  %v1744_v29 = vadd.f32 %v1739_v25, %v1668_v21 }
 0x285   : > { %v1741_v31 = vpop.f32.mrf.mxu0  ;;  %v1817_v32 = vpop.f32.mrf.mxu1 }
 0x286   : > { %v1820_v35 = vadd.f32 %v1815_v26, %v1744_v29  ;;  %v1745_v36 = vadd.f32 %v1741_v31, %v1669_v28 }
 0x287   : > { %v1891_v40 = vpop.f32.mrf.mxu0  ;;  %v1967_v41 = vpop.f32.mrf.mxu1 }
 0x288   : > { %v1821_v44 = vadd.f32 %v1817_v32, %v1745_v36  ;;  %v1896_v45 = vadd.f32 %v1891_v40, %v1820_v35 }
 0x289   : > { %v1893_v49 = vpop.f32.mrf.mxu0  ;;  %v1969_v50 = vpop.f32.mrf.mxu1 }
 0x28a   : > { %v1972_v53 = vadd.f32 %v1967_v41, %v1896_v45  ;;  %v1897_v56 = vadd.f32 %v1893_v49, %v1821_v44 }
 0x28b   : > { %v2043_v57 = vpop.f32.mrf.mxu0  ;;  %v2119_v58 = vpop.f32.mrf.mxu1 }
 0x28c   : > { %v1973_v59 = vadd.f32 %v1969_v50, %v1897_v56  ;;  %v2048_v60 = vadd.f32 %v2043_v57, %v1972_v53  ;;  %v2163_v56 = vmul.f32 %v6990_v62, %v6886_v47 }
 0x28d   : > { %v2045_v63 = vpop.f32.mrf.mxu0  ;;  %v2121_v2 = vpop.f32.mrf.mxu1 }
 0x28e   : > { %v2124_v0 = vadd.f32 %v2119_v58, %v2048_v60  ;;  %v2049_v1 = vadd.f32 %v2045_v63, %v1973_v59  ;;  %v513_v58 = vld [vmem:[%s7831_s4 + $0x8] sm:$0xff]  ;;  %v2612_v63 = vpop.permute.xlu1 %2611 }
 0x28f   : > { %v7231_v59 = vld [vmem:[#allocation2 + $0xc] sm:$0x7] }
 0x290   : > { %v2128_v3 = vadd.f32 %v2126_v61, %v2124_v0  ;;  %v2125_v4 = vadd.f32 %v2121_v2, %v2049_v1  ;;  %v3695_v60 = vmul.f32 %v7231_v59, %v6875_v39  ;;  %v3697_v62 = vmul.f32 %v7231_v59, %v6932_v23  ;;  %v2703_v1 = vpop.permute.xlu0 %2702 }
 0x292   : > { %v2131_v6 = vadd.f32 %v2128_v3, %v6925_v17  ;;  %v2129_v54 = vadd.f32 %v2126_v61, %v2125_v4  ;;  %v3699_v61 = vmul.f32 %v7231_v59, %v6883_v46  ;;  %v2794_v0 = vpop.permute.xlu1 %2793 }
 0x294   : > { %v2135_v7 = vmul.f32 0.05, %v2131_v6  ;;  %v2132_v9 = vadd.f32 %v2129_v54, %v7059_v55  ;;  %vm2133_vm11 = vcmp.ge.f32.partialorder %v2131_v6, 0.0 }
 0x296   : > { %vm2134_vm12 = vcmp.ge.f32.partialorder %v2132_v9, 0.0  ;;  %v2136_v10 = vmul.f32 0.05, %v2132_v9  ;;  %v7188_v12 = vsel %vm2133_vm11, %v2131_v6, %v2135_v7 }
 0x298   : > { %v7190_v13 = vsel %vm2134_vm12, %v2132_v9, %v2136_v10 }
 0x299   : > { %v2141_v14 = vcombine.low %v7188_v12, %v7190_v13 }
 0x29b   : > { %2143 = vst [vmem:[#allocation2 + $0x4] sm:$0x77] %v2141_v14 }
 0x2a2   : > { %v2145_v16 = vld [vmem:[#allocation2 + $0x8] sm:$0x7]  ;;  %v2144_v18 = vld [vmem:[#allocation2] sm:$0x77] }
 0x2a3   : > { %v2149_v19 = vmul.f32 %v2145_v16, %v6930_v22  ;;  %v2148_v17 = vmul.f32 %v2144_v18, %v6945_v30  ;;  %v2147_v55 = vmul.f32 %v2145_v16, %v6928_v20  ;;  %v2146_v21 = vmul.f32 %v2144_v18, %v6939_v27  ;;  %v2154_v29 = vld [vmem:[#allocation2 + $0x4] sm:$0x77] }
 0x2a4   : > { %v2150_v24 = vmul.f32 %v2144_v18, %v6965_v38  ;;  %v2151_v25 = vmul.f32 %v2145_v16, %v6951_v34  ;;  %v2153_v26 = vmul.f32 %v2145_v16, %v6949_v33  ;;  %v2152_v28 = vmul.f32 %v2144_v18, %v6959_v37 }
 0x2a5   : > { %2171 = vrot.lane.b32.xlu1 %v2149_v19, %s6784_s20  ;;  %2167 = vrot.lane.b32.xlu0 %v2148_v17, %s6784_s20  ;;  %v2156_v31 = vmul.f32 %v2154_v29, %v6879_v42  ;;  %v2158_v32 = vmul.f32 %v2154_v29, %v6971_v43  ;;  %v2160_v35 = vmul.f32 %v2154_v29, %v6891_v48 }
 0x2a6   : > { %v2166_v36 = vcombine.high %v2148_v17, %v2148_v17  ;;  %v2344_v40 = vcombine.high %v2150_v24, %v2150_v24  ;;  %v2255_v41 = vcombine.high %v2146_v21, %v2146_v21  ;;  %v2435_v45 = vcombine.high %v2152_v28, %v2152_v28 }
 0x2a7   : > { %v2606_v44 = vcombine.high %v2156_v31, %v2156_v31  ;;  %v2788_v49 = vcombine.high %v2160_v35, %v2160_v35  ;;  %v2697_v50 = vcombine.high %v2158_v32, %v2158_v32  ;;  %v2162_v53 = vmul.f32 %v2154_v29, %v6897_v51 }
 0x2a9   : > { %2260 = vrot.lane.b32.xlu0 %v2147_v55, %s6782_s14  ;;  %2256 = vrot.lane.b32.xlu1 %v2146_v21, %s6782_s14  ;;  %v2879_v57 = vcombine.high %v2162_v53, %v2162_v53  ;;  %v468_v21 = vld [vmem:[%s7830_s3 + $0x4c] sm:$0x7] }
 0x2ad   : > { %2345 = vrot.lane.b32.xlu0 %v2150_v24, %s6789_s25  ;;  %2349 = vrot.lane.b32.xlu1 %v2151_v25, %s6789_s25 }
 0x2b1   : > { %2440 = vrot.lane.b32.xlu0 %v2153_v26, %s6783_s19  ;;  %2436 = vrot.lane.b32.xlu1 %v2152_v28, %s6783_s19 }
 0x2b5   : > { %2607 = vrot.lane.b32.xlu0 %v2156_v31, %s6785_s21  ;;  %2698 = vrot.lane.b32.xlu1 %v2158_v32, %s6788_s24  ;;  %v467_v32 = vld [vmem:[%s7830_s3 + $0x48] sm:$0x7] }
 0x2b9   : > { %2789 = vrot.lane.b32.xlu0 %v2160_v35, %s6786_s22  ;;  %2169 = vrot.lane.b32.xlu1 %v2166_v36, %s6784_s20  ;;  %v469_v35 = vld [vmem:[%s7830_s3 + $0x50] sm:$0x7] }
 0x2bd   : > { %2347 = vrot.lane.b32.xlu0 %v2344_v40, %s6789_s25  ;;  %2258 = vrot.lane.b32.xlu1 %v2255_v41, %s6782_s14 }
 0x2c1   : > { %2609 = vrot.lane.b32.xlu0 %v2606_v44, %s6785_s21  ;;  %2438 = vrot.lane.b32.xlu1 %v2435_v45, %s6783_s19  ;;  %v470_v45 = vld [vmem:[%s7830_s3 + $0x54] sm:$0x7] }
 0x2c5   : > { %2791 = vrot.lane.b32.xlu0 %v2788_v49, %s6786_s22  ;;  %2700 = vrot.lane.b32.xlu1 %v2697_v50, %s6788_s24  ;;  %v471_v49 = vld [vmem:[%s7830_s3 + $0x58] sm:$0x7] }
 0x2c9   : > { %2884 = vrot.lane.b32.xlu0 %v2163_v56, %s6787_s23  ;;  %2882 = vrot.lane.b32.xlu1 %v2879_v57, %s6787_s23 }
 0x2cd   : > { %2970 = vperm.xlu0 %6759, %v513_v58   ;;  %2880 = vrot.lane.b32.xlu1 %v2162_v53, %s6787_s23 }
 0x2d1   : > { %4149 = vrot.lane.b32.xlu0 %v3695_v60, %s6785_s21  ;;  %4240 = vrot.lane.b32.xlu1 %v3697_v62, %s6788_s24 }
 0x2d5   : > { %4331 = vrot.lane.b32.xlu0 %v3699_v61, %s6786_s22  ;;  %v472_v61 = vld [vmem:[%s7830_s3 + $0x5c] sm:$0x7] }
 0x317   : > { %v2168_v2 = vpop.permute.xlu0 %2167  ;;  %v2172_v3 = vpop.permute.xlu1 %2171 }
 0x31b   : > { %v2261_v4 = vpop.permute.xlu0 %2260  ;;  %v2257_v6 = vpop.permute.xlu1 %2256 }
 0x31f   : > { %v2346_v54 = vpop.permute.xlu0 %2345  ;;  %v2350_v7 = vpop.permute.xlu1 %2349 }
 0x323   : > { %v2441_v9 = vpop.permute.xlu0 %2440  ;;  %v2437_v10 = vpop.permute.xlu1 %2436 }
 0x327   : > { %v2608_v14 = vpop.permute.xlu0 %2607  ;;  %v2699_v16 = vpop.permute.xlu1 %2698 }
 0x32b   : > { %v2790_v18 = vpop.permute.xlu0 %2789  ;;  %v2170_v19 = vpop.permute.xlu1 %2169 }
 0x32c   : > { %v7244_v17 = vsel %vm397_vm1, %v2168_v2, %v2170_v19  ;;  %v2174_v55 = vsel %vm397_vm1, %v2170_v19, %v2172_v3  ;;  %v481_v19 = vld [vmem:[%s7830_s3 + $0x80] sm:$0x7] }
 0x32d   : > { %6586 = vmatprep.subr.msk.mxu0 %vm640_vm9, %v2174_v55 }
 0x32e   : > { %6587 = vmatpush1.msk.msra.mxu0 %vm640_vm9, %v7244_v17 }
 0x32f   : > { %v2348_v24 = vpop.permute.xlu0 %2347  ;;  %v2259_v25 = vpop.permute.xlu1 %2258  ;;  %6588 = vmatmul.mubr.msk.f32.vlgmr.msra.gmra.mxu0 %vm636_vm10, %v468_v21  ;;  %v484_v21 = vld [vmem:[%s7830_s3 + $0x8c] sm:$0x7] }
 0x330   : > { %v7255_v26 = vsel %vm615_vm8, %v2346_v54, %v2348_v24  ;;  %v2352_v28 = vsel %vm615_vm8, %v2348_v24, %v2350_v7  ;;  %v7259_v29 = vsel %vm430_vm2, %v2257_v6, %v2259_v25  ;;  %v2263_v31 = vsel %vm430_vm2, %v2259_v25, %v2261_v4  ;;  %2424 = vmatprep.mubr.f32.mxu0 %v6781_v5  ;;  %v474_v4 = vld [vmem:[%s7830_s3 + $0x64] sm:$0x7]  ;;  %v475_v54 = vld [vmem:[%s7830_s3 + $0x68] sm:$0x7] }
 0x331   : > { %6589 = vmatprep.subr.msk.mxu1 %vm640_vm9, %v2263_v31  ;;  %6592 = vmatprep.subr.msk.mxu0 %vm640_vm9, %v2352_v28 }
 0x332   : > { %6590 = vmatpush1.msk.msra.mxu1 %vm640_vm9, %v7259_v29  ;;  %6593 = vmatpush1.msk.msra.mxu0 %vm640_vm9, %v7255_v26 }
 0x333   : > { %v2610_v36 = vpop.permute.xlu0 %2609  ;;  %6591 = vmatmul.mubr.msk.f32.vlgmr.msra.gmra.mxu1 %vm636_vm10, %v467_v32  ;;  %6598 = vmatprep.subr.msk.mxu0 %vm640_vm9, %v7190_v13  ;;  %v2439_v40 = vpop.permute.xlu1 %2438 }
 0x334   : > { %v2442_v41 = vsel %vm363_vm0, %v2437_v10, %v2439_v40  ;;  %v2443_v44 = vsel %vm363_vm0, %v2439_v40, %v2441_v9  ;;  %6594 = vmatmul.mubr.msk.f32.vlgmr.msra.gmra.mxu0 %vm636_vm10, %v469_v35  ;;  %2515 = vmatprep.mubr.f32.mxu1 %v6781_v5  ;;  %v2614_v50 = vsel %vm379_vm4, %v2610_v36, %v2612_v63  ;;  %v473_v63 = vld [vmem:[%s7830_s3 + $0x60] sm:$0x7]  ;;  %v477_v9 = vld [vmem:[%s7830_s3 + $0x70] sm:$0x7]  ;;  %v476_v10 = vld [vmem:[%s7830_s3 + $0x6c] sm:$0x7] }
 0x335   : > { %6599 = vmatpush1.msk.msra.mxu0 %vm640_vm9, %v7188_v12  ;;  %6595 = vmatprep.subr.msk.mxu1 %vm640_vm9, %v2443_v44  ;;  %v2613_v57 = vsel %vm379_vm4, %v2608_v14, %v2610_v36  ;;  %v478_v14 = vld [vmem:[%s7830_s3 + $0x74] sm:$0x7] }
 0x336   : > { %6596 = vmatpush1.msk.msra.mxu1 %vm640_vm9, %v2442_v41  ;;  %2595 = vmatprep.mubr.f32.mxu0 %v6781_v5 }
 0x337   : > { %v2792_v53 = vpop.permute.xlu0 %2791  ;;  %6597 = vmatmul.mubr.msk.f32.vlgmr.msra.gmra.mxu1 %vm636_vm10, %v470_v45  ;;  %v2701_v56 = vpop.permute.xlu1 %2700  ;;  %6601 = vmatprep.subr.msk.mxu1 %vm640_vm9, %v2614_v50 }
 0x338   : > { %v2796_v58 = vsel %vm412_vm5, %v2792_v53, %v2794_v0  ;;  %v2704_v60 = vsel %vm572_vm7, %v2699_v16, %v2701_v56  ;;  %v2705_v62 = vsel %vm572_vm7, %v2701_v56, %v2703_v1  ;;  %6600 = vmatmul.mubr.msk.f32.vlgmr.msra.gmra.mxu0 %vm636_vm10, %v471_v49  ;;  %6602 = vmatpush1.msk.msra.mxu1 %vm640_vm9, %v2613_v57  ;;  %v479_v16 = vld [vmem:[%s7830_s3 + $0x78] sm:$0x7] }
 0x339   : > { %6604 = vmatprep.subr.msk.mxu0 %vm640_vm9, %v2705_v62  ;;  %6607 = vmatprep.subr.msk.mxu1 %vm640_vm9, %v2796_v58  ;;  %v2795_v2 = vsel %vm412_vm5, %v2790_v18, %v2792_v53  ;;  %v480_v18 = vld [vmem:[%s7830_s3 + $0x7c] sm:$0x7] }
 0x33a   : > { %2686 = vmatprep.mubr.f32.mxu1 %v6781_v5  ;;  %6605 = vmatpush1.msk.msra.mxu0 %vm640_vm9, %v2704_v60 }
 0x33b   : > { %v2885_v0 = vpop.permute.xlu0 %2884  ;;  %v2883_v1 = vpop.permute.xlu1 %2882  ;;  %6603 = vmatmul.mubr.msk.f32.vlgmr.msra.gmra.mxu1 %vm636_vm10, %v472_v61  ;;  %2777 = vmatprep.mubr.f32.mxu0 %v6781_v5 }
 0x33c   : > { %v2887_v3 = vsel %vm445_vm6, %v2883_v1, %v2885_v0  ;;  %6608 = vmatpush1.msk.msra.mxu1 %vm640_vm9, %v2795_v2  ;;  %6606 = vmatmul.mubr.msk.f32.vlgmr.msra.gmra.mxu0 %vm636_vm10, %v473_v63 }
 0x33d   : > { %6613 = vmatprep.subr.msk.mxu1 %vm640_vm9, %v2174_v55  ;;  %6610 = vmatprep.subr.msk.mxu0 %vm640_vm9, %v2887_v3  ;;  %v483_v55 = vld [vmem:[%s7830_s3 + $0x88] sm:$0x7] }
 0x33e   : > { %2868 = vmatprep.mubr.f32.mxu1 %v6781_v5  ;;  %2959 = vmatprep.mubr.f32.mxu0 %v6781_v5 }
 0x33f   : > { %v2881_v6 = vpop.permute.xlu1 %2880  ;;  %6609 = vmatmul.mubr.msk.f32.vlgmr.msra.gmra.mxu1 %vm636_vm10, %v474_v4 }
 0x340   : > { %v2886_v7 = vsel %vm445_vm6, %v2881_v6, %v2883_v1  ;;  %6614 = vmatpush1.msk.msra.mxu1 %vm640_vm9, %v7244_v17  ;;  %3052 = vmatprep.mubr.f32.mxu1 %v6781_v5  ;;  %v482_v17 = vld [vmem:[%s7830_s3 + $0x84] sm:$0x7] }
 0x341   : > { %6611 = vmatpush1.msk.msra.mxu0 %vm640_vm9, %v2886_v7  ;;  %6619 = vmatprep.subr.msk.mxu1 %vm640_vm9, %v2352_v28 }
 0x342   : > { %6612 = vmatmul.mubr.msk.f32.vlgmr.msra.gmra.mxu0 %vm636_vm10, %v475_v54  ;;  %6616 = vmatprep.subr.msk.mxu0 %vm640_vm9, %v2263_v31 }
 0x343   : > { %6615 = vmatmul.mubr.msk.f32.vlgmr.msra.gmra.mxu1 %vm636_vm10, %v477_v9  ;;  %6617 = vmatpush1.msk.msra.mxu0 %vm640_vm9, %v7259_v29 }
 0x344   : > { %6620 = vmatpush1.msk.msra.mxu1 %vm640_vm9, %v7255_v26  ;;  %6622 = vmatprep.subr.msk.mxu0 %vm640_vm9, %v2443_v44 }
 0x345   : > { %6625 = vmatprep.subr.msk.mxu1 %vm640_vm9, %v7190_v13  ;;  %3126 = vmatprep.mubr.f32.mxu0 %v6781_v5 }
 0x346   : > { %6618 = vmatmul.mubr.msk.f32.vlgmr.msra.gmra.mxu0 %vm636_vm10, %v476_v10  ;;  %3200 = vmatprep.mubr.f32.mxu1 %v6781_v5 }
 0x347   : > { %6623 = vmatpush1.msk.msra.mxu0 %vm640_vm9, %v2442_v41  ;;  %6621 = vmatmul.mubr.msk.f32.vlgmr.msra.gmra.mxu1 %vm636_vm10, %v478_v14 }
 0x348   : > { %6626 = vmatpush1.msk.msra.mxu1 %vm640_vm9, %v7188_v12  ;;  %6628 = vmatprep.subr.msk.mxu0 %vm640_vm9, %v2614_v50 }
 0x349   : > { %6631 = vmatprep.subr.msk.mxu1 %vm640_vm9, %v2705_v62  ;;  %3276 = vmatprep.mubr.f32.mxu0 %v6781_v5 }
 0x34a   : > { %6624 = vmatmul.mubr.msk.f32.vlgmr.msra.gmra.mxu0 %vm636_vm10, %v479_v16  ;;  %3352 = vmatprep.mubr.f32.mxu1 %v6781_v5 }
 0x34b   : > { %6629 = vmatpush1.msk.msra.mxu0 %vm640_vm9, %v2613_v57  ;;  %6627 = vmatmul.mubr.msk.f32.vlgmr.msra.gmra.mxu1 %vm636_vm10, %v480_v18 }
 0x34c   : > { %6632 = vmatpush1.msk.msra.mxu1 %vm640_vm9, %v2704_v60  ;;  %6634 = vmatprep.subr.msk.mxu0 %vm640_vm9, %v2796_v58  ;;  %v7401_v60 = vpop.permute.xlu0 %2970 }
 0x34d   : > { %6637 = vmatprep.subr.msk.mxu1 %vm640_vm9, %v2887_v3  ;;  %3428 = vmatprep.mubr.f32.mxu0 %v6781_v5  ;;  %v2974_v3 = vrot.slane %v7401_v60, 6 }
 0x34e   : > { %6630 = vmatmul.mubr.msk.f32.vlgmr.msra.gmra.mxu0 %vm636_vm10, %v481_v19  ;;  %3504 = vmatprep.mubr.f32.mxu1 %v6781_v5 }
 0x34f   : > { %6635 = vmatpush1.msk.msra.mxu0 %vm640_vm9, %v2795_v2  ;;  %6633 = vmatmul.mubr.msk.f32.vlgmr.msra.gmra.mxu1 %vm636_vm10, %v482_v17 }
 0x350   : > { %6638 = vmatpush1.msk.msra.mxu1 %vm640_vm9, %v2886_v7  ;;  %3580 = vmatprep.mubr.f32.mxu0 %v6781_v5  ;;  %v2973_v7 = vrot.slane %v7183_v52, 6 }
 0x351   : > { %3656 = vmatprep.mubr.f32.mxu1 %v6781_v5 }
 0x352   : > { %6636 = vmatmul.mubr.msk.f32.vlgmr.msra.gmra.mxu0 %vm636_vm10, %v483_v55  ;;  %v2975_v18 = vsel %vm2972_vm13, %v2973_v7, %v2974_v3 }
 0x353   : > { %6639 = vmatmul.mubr.msk.f32.vlgmr.msra.gmra.mxu1 %vm636_vm10, %v484_v21  ;;  %3784 = vmatprep.mubr.f32.mxu0 %v6781_v5 }
 0x354   : > { %3873 = vmatprep.mubr.f32.mxu1 %v6781_v5 }
 0x3ef   : > { %v2248_v24 = vpop.f32.mrf.mxu0 }
 0x3f1   : > { %v2250_v25 = vpop.f32.mrf.mxu0 }
 0x3f3   : > { %v2337_v26 = vpop.f32.mrf.mxu1 }
 0x3f4   : > { %v2338_v28 = vadd.f32 %v2337_v26, %v2248_v24  ;;  %v2426_v29 = vpop.f32.mrf.mxu0 }
 0x3f5   : > { %v2339_v31 = vpop.f32.mrf.mxu1 }
 0x3f6   : > { %v2431_v32 = vadd.f32 %v2426_v29, %v2338_v28  ;;  %v2340_v35 = vadd.f32 %v2339_v31, %v2250_v25  ;;  %v2428_v36 = vpop.f32.mrf.mxu0 }
 0x3f7   : > { %v2517_v40 = vpop.f32.mrf.mxu1 }
 0x3f8   : > { %v2432_v41 = vadd.f32 %v2428_v36, %v2340_v35  ;;  %v2522_v44 = vadd.f32 %v2517_v40, %v2431_v32  ;;  %v2597_v45 = vpop.f32.mrf.mxu0 }
 0x3f9   : > { %v2519_v49 = vpop.f32.mrf.mxu1 }
 0x3fa   : > { %v2602_v50 = vadd.f32 %v2597_v45, %v2522_v44  ;;  %v2523_v53 = vadd.f32 %v2519_v49, %v2432_v41  ;;  %v2599_v56 = vpop.f32.mrf.mxu0 }
 0x3fb   : > { %v2688_v58 = vpop.f32.mrf.mxu1 }
 0x3fc   : > { %v2603_v57 = vadd.f32 %v2599_v56, %v2523_v53  ;;  %v2693_v62 = vadd.f32 %v2688_v58, %v2602_v50  ;;  %v2779_v61 = vpop.f32.mrf.mxu0 }
 0x3fd   : > { %v2690_v63 = vpop.f32.mrf.mxu1 }
 0x3fe   : > { %v2784_v0 = vadd.f32 %v2779_v61, %v2693_v62  ;;  %v2694_v1 = vadd.f32 %v2690_v63, %v2603_v57  ;;  %v2781_v2 = vpop.f32.mrf.mxu0 }
 0x3ff   : > { %v2870_v4 = vpop.f32.mrf.mxu1 }
 0x400   : > { %v2785_v6 = vadd.f32 %v2781_v2, %v2694_v1  ;;  %v2875_v54 = vadd.f32 %v2870_v4, %v2784_v0 }
 0x401   : > { %v2872_v9 = vpop.f32.mrf.mxu1 }
 0x402   : > { %v2961_v10 = vpop.f32.mrf.mxu0  ;;  %v2876_v14 = vadd.f32 %v2872_v9, %v2785_v6 }
 0x403   : > { %v2966_v16 = vadd.f32 %v2961_v10, %v2875_v54  ;;  %v3054_v19 = vpop.f32.mrf.mxu1  ;;  %v3665_v10 = vrot.slane %v7401_v60, 1 }
 0x404   : > { %v2963_v17 = vpop.f32.mrf.mxu0 }
 0x405   : > { %v7405_v55 = vadd.f32 %v2975_v18, %v2966_v16  ;;  %v2967_v21 = vadd.f32 %v2963_v17, %v2876_v14  ;;  %v3056_v24 = vpop.f32.mrf.mxu1 }
 0x406   : > { %v3128_v26 = vpop.f32.mrf.mxu0 }
 0x407   : > { %v7407_v25 = vadd.f32 %v2975_v18, %v2967_v21  ;;  %v3129_v28 = vadd.f32 %v3128_v26, %v3054_v19  ;;  %v3202_v29 = vpop.f32.mrf.mxu1 }
 0x408   : > { %v3130_v31 = vpop.f32.mrf.mxu0 }
 0x409   : > { %v3207_v32 = vadd.f32 %v3202_v29, %v3129_v28  ;;  %v3131_v35 = vadd.f32 %v3130_v31, %v3056_v24  ;;  %v3204_v36 = vpop.f32.mrf.mxu1 }
 0x40a   : > { %v3278_v40 = vpop.f32.mrf.mxu0 }
 0x40b   : > { %v3208_v41 = vadd.f32 %v3204_v36, %v3131_v35  ;;  %v3283_v44 = vadd.f32 %v3278_v40, %v3207_v32  ;;  %v3354_v45 = vpop.f32.mrf.mxu1 }
 0x40c   : > { %v3280_v49 = vpop.f32.mrf.mxu0 }
 0x40d   : > { %v3359_v50 = vadd.f32 %v3354_v45, %v3283_v44  ;;  %v3284_v53 = vadd.f32 %v3280_v49, %v3208_v41  ;;  %v3356_v56 = vpop.f32.mrf.mxu1 }
 0x40e   : > { %v3430_v57 = vpop.f32.mrf.mxu0 }
 0x40f   : > { %v3360_v58 = vadd.f32 %v3356_v56, %v3284_v53  ;;  %v3435_v62 = vadd.f32 %v3430_v57, %v3359_v50  ;;  %v3506_v61 = vpop.f32.mrf.mxu1 }
 0x410   : > { %v3432_v63 = vpop.f32.mrf.mxu0 }
 0x411   : > { %v3511_v0 = vadd.f32 %v3506_v61, %v3435_v62  ;;  %v3436_v1 = vadd.f32 %v3432_v63, %v3360_v58  ;;  %v3508_v2 = vpop.f32.mrf.mxu1 }
 0x412   : > { %v3582_v3 = vpop.f32.mrf.mxu0 }
 0x413   : > { %v3512_v4 = vadd.f32 %v3508_v2, %v3436_v1  ;;  %v3587_v6 = vadd.f32 %v3582_v3, %v3511_v0  ;;  %v3658_v54 = vpop.f32.mrf.mxu1 }
 0x414   : > { %v3584_v7 = vpop.f32.mrf.mxu0 }
 0x415   : > { %v3663_v9 = vadd.f32 %v3658_v54, %v3587_v6  ;;  %v3588_v14 = vadd.f32 %v3584_v7, %v3512_v4  ;;  %v3660_v16 = vpop.f32.mrf.mxu1  ;;  %v7450_v54 = vld [vmem:[#allocation2 + $0xc] sm:$0x7]  ;;  %v3701_v7 = vmul.f32 %v7231_v59, %v6886_v47 }
 0x416   : > { %v5237_v59 = vmul.f32 %v7450_v54, %v6883_v46 }
 0x417   : > { %v3667_v18 = vadd.f32 %v3665_v10, %v3663_v9  ;;  %v3664_v19 = vadd.f32 %v3660_v16, %v3588_v14  ;;  %v5235_v9 = vmul.f32 %v7450_v54, %v6932_v23  ;;  %v5233_v14 = vmul.f32 %v7450_v54, %v6875_v39  ;;  %v4150_v23 = vpop.permute.xlu0 %4149  ;;  %v4241_v16 = vpop.permute.xlu1 %4240 }
 0x419   : > { %v3669_v17 = vadd.f32 %v3667_v18, %v7188_v12  ;;  %v3668_v21 = vadd.f32 %v3665_v10, %v3664_v19  ;;  %v514_v10 = vld [vmem:[%s7831_s4 + $0x10] sm:$0x1f] }
 0x41b   : > { %v3673_v24 = vmul.f32 0.05, %v3669_v17  ;;  %v3670_v26 = vadd.f32 %v3668_v21, %v7190_v13  ;;  %vm3671_vm14 = vcmp.ge.f32.partialorder %v3669_v17, 0.0  ;;  %v7467_v18 = vpop.permute.xlu0 %4331 }
 0x41d   : > { %vm3672_vm15 = vcmp.ge.f32.partialorder %v3670_v26, 0.0  ;;  %v3674_v28 = vmul.f32 0.05, %v3670_v26  ;;  %v7412_v29 = vsel %vm3671_vm14, %v3669_v17, %v3673_v24 }
 0x41f   : > { %v7414_v31 = vsel %vm3672_vm15, %v3670_v26, %v3674_v28 }
 0x420   : > { %v3679_v32 = vcombine.low %v7412_v29, %v7414_v31 }
 0x422   : > { %3681 = vst [vmem:[#allocation2 + $0x4] sm:$0x77] %v3679_v32 }
 0x429   : > { %v3683_v35 = vld [vmem:[#allocation2 + $0x8] sm:$0x7]  ;;  %v3682_v36 = vld [vmem:[#allocation2] sm:$0x77] }
 0x42a   : > { %v3687_v40 = vmul.f32 %v3683_v35, %v6930_v22  ;;  %v3686_v12 = vmul.f32 %v3682_v36, %v6945_v30  ;;  %v3685_v13 = vmul.f32 %v3683_v35, %v6928_v20  ;;  %v3684_v41 = vmul.f32 %v3682_v36, %v6939_v27  ;;  %v3692_v53 = vld [vmem:[#allocation2 + $0x4] sm:$0x77] }
 0x42b   : > { %v3688_v44 = vmul.f32 %v3682_v36, %v6965_v38  ;;  %v3689_v45 = vmul.f32 %v3683_v35, %v6951_v34  ;;  %v3691_v49 = vmul.f32 %v3683_v35, %v6949_v33  ;;  %v3690_v50 = vmul.f32 %v3682_v36, %v6959_v37 }
 0x42c   : > { %3709 = vrot.lane.b32.xlu0 %v3687_v40, %s6784_s20  ;;  %3705 = vrot.lane.b32.xlu1 %v3686_v12, %s6784_s20  ;;  %v3694_v56 = vmul.f32 %v3692_v53, %v6879_v42  ;;  %v3696_v57 = vmul.f32 %v3692_v53, %v6971_v43  ;;  %v3698_v58 = vmul.f32 %v3692_v53, %v6891_v48 }
 0x42d   : > { %v3793_v62 = vcombine.high %v3684_v41, %v3684_v41  ;;  %v3704_v61 = vcombine.high %v3686_v12, %v3686_v12  ;;  %v3973_v63 = vcombine.high %v3690_v50, %v3690_v50  ;;  %v3882_v0 = vcombine.high %v3688_v44, %v3688_v44 }
 0x42e   : > { %v4235_v1 = vcombine.high %v3696_v57, %v3696_v57  ;;  %v3700_v2 = vmul.f32 %v3692_v53, %v6897_v51  ;;  %v4144_v3 = vcombine.high %v3694_v56, %v3694_v56  ;;  %v4326_v6 = vcombine.high %v3698_v58, %v3698_v58 }
 0x430   : > { %3798 = vrot.lane.b32.xlu1 %v3685_v13, %s6782_s14  ;;  %3794 = vrot.lane.b32.xlu0 %v3684_v41, %s6782_s14  ;;  %v4417_v4 = vcombine.high %v3700_v2, %v3700_v2  ;;  %v485_v41 = vld [vmem:[%s7830_s3 + $0x90] sm:$0x7] }
 0x434   : > { %3883 = vrot.lane.b32.xlu1 %v3688_v44, %s6789_s25  ;;  %3887 = vrot.lane.b32.xlu0 %v3689_v45, %s6789_s25 }
 0x438   : > { %3978 = vrot.lane.b32.xlu1 %v3691_v49, %s6783_s19  ;;  %3974 = vrot.lane.b32.xlu0 %v3690_v50, %s6783_s19 }
 0x43c   : > { %4145 = vrot.lane.b32.xlu1 %v3694_v56, %s6785_s21  ;;  %4236 = vrot.lane.b32.xlu0 %v3696_v57, %s6788_s24  ;;  %v486_v57 = vld [vmem:[%s7830_s3 + $0x94] sm:$0x7] }
 0x440   : > { %4327 = vrot.lane.b32.xlu1 %v3698_v58, %s6786_s22  ;;  %3796 = vrot.lane.b32.xlu0 %v3793_v62, %s6782_s14  ;;  %v488_v58 = vld [vmem:[%s7830_s3 + $0x9c] sm:$0x7] }
 0x444   : > { %3707 = vrot.lane.b32.xlu1 %v3704_v61, %s6784_s20  ;;  %3976 = vrot.lane.b32.xlu0 %v3973_v63, %s6783_s19 }
 0x448   : > { %3885 = vrot.lane.b32.xlu1 %v3882_v0, %s6789_s25  ;;  %4238 = vrot.lane.b32.xlu0 %v4235_v1, %s6788_s24  ;;  %v487_v1 = vld [vmem:[%s7830_s3 + $0x98] sm:$0x7] }
 0x44c   : > { %4147 = vrot.lane.b32.xlu1 %v4144_v3, %s6785_s21  ;;  %4420 = vrot.lane.b32.xlu0 %v4417_v4, %s6787_s23 }
 0x450   : > { %4329 = vrot.lane.b32.xlu1 %v4326_v6, %s6786_s22  ;;  %4418 = vrot.lane.b32.xlu0 %v3700_v2, %s6787_s23 }
 0x454   : > { %4422 = vrot.lane.b32.xlu1 %v3701_v7, %s6787_s23  ;;  %5778 = vrot.lane.b32.xlu0 %v5235_v9, %s6788_s24  ;;  %v489_v9 = vld [vmem:[%s7830_s3 + $0xa0] sm:$0x7] }
 0x458   : > { %5198 = vperm.xlu1 %6760, %v514_v10   ;;  %v490_v10 = vld [vmem:[%s7830_s3 + $0xa4] sm:$0x7] }
 0x45c   : > { %5687 = vrot.lane.b32.xlu1 %v5233_v14, %s6785_s21 }
 0x460   : > { %5869 = vrot.lane.b32.xlu1 %v5237_v59, %s6786_s22 }
 0x49e   : > { %v3710_v19 = vpop.permute.xlu0 %3709  ;;  %v3706_v17 = vpop.permute.xlu1 %3705 }
 0x4a2   : > { %v3795_v21 = vpop.permute.xlu0 %3794  ;;  %v3799_v24 = vpop.permute.xlu1 %3798 }
 0x4a6   : > { %v3888_v26 = vpop.permute.xlu0 %3887  ;;  %v3884_v28 = vpop.permute.xlu1 %3883 }
 0x4aa   : > { %v3975_v32 = vpop.permute.xlu0 %3974  ;;  %v3979_v35 = vpop.permute.xlu1 %3978 }
 0x4ae   : > { %v4237_v39 = vpop.permute.xlu0 %4236  ;;  %v4146_v36 = vpop.permute.xlu1 %4145 }
 0x4b2   : > { %v3797_v40 = vpop.permute.xlu0 %3796  ;;  %v4328_v12 = vpop.permute.xlu1 %4327 }
 0x4b3   : > { %v7470_v46 = vsel %vm430_vm2, %v3795_v21, %v3797_v40  ;;  %v7473_v13 = vsel %vm430_vm2, %v3797_v40, %v3799_v24  ;;  %v498_v40 = vld [vmem:[%s7830_s3 + $0xc4] sm:$0x7] }
 0x4b4   : > { %6643 = vmatprep.subr.msk.mxu1 %vm640_vm9, %v7473_v13 }
 0x4b5   : > { %6644 = vmatpush1.msk.msra.mxu1 %vm640_vm9, %v7470_v46 }
 0x4b6   : > { %v3977_v44 = vpop.permute.xlu0 %3976  ;;  %v3708_v45 = vpop.permute.xlu1 %3707  ;;  %6645 = vmatmul.mubr.msk.f32.vlgmr.msra.gmra.mxu1 %vm636_vm10, %v485_v41  ;;  %v502_v41 = vld [vmem:[%s7830_s3 + $0xd4] sm:$0x7] }
 0x4b7   : > { %v7484_v49 = vsel %vm363_vm0, %v3975_v32, %v3977_v44  ;;  %v7487_v50 = vsel %vm363_vm0, %v3977_v44, %v3979_v35  ;;  %v3711_v53 = vsel %vm397_vm1, %v3706_v17, %v3708_v45  ;;  %v3712_v56 = vsel %vm397_vm1, %v3708_v45, %v3710_v19  ;;  %4053 = vmatprep.mubr.f32.mxu1 %v6781_v5  ;;  %v491_v19 = vld [vmem:[%s7830_s3 + $0xa8] sm:$0x7]  ;;  %v492_v17 = vld [vmem:[%s7830_s3 + $0xac] sm:$0x7]  ;;  %v495_v32 = vld [vmem:[%s7830_s3 + $0xb8] sm:$0x7] }
 0x4b8   : > { %6640 = vmatprep.subr.msk.mxu0 %vm640_vm9, %v3712_v56  ;;  %6649 = vmatprep.subr.msk.mxu1 %vm640_vm9, %v7487_v50  ;;  %v494_v35 = vld [vmem:[%s7830_s3 + $0xb4] sm:$0x7] }
 0x4b9   : > { %6641 = vmatpush1.msk.msra.mxu0 %vm640_vm9, %v3711_v53  ;;  %6650 = vmatpush1.msk.msra.mxu1 %vm640_vm9, %v7484_v49 }
 0x4ba   : > { %v4239_v62 = vpop.permute.xlu0 %4238  ;;  %6642 = vmatmul.mubr.msk.f32.vlgmr.msra.gmra.mxu0 %vm636_vm10, %v486_v57  ;;  %v3886_v61 = vpop.permute.xlu1 %3885  ;;  %6651 = vmatmul.mubr.msk.f32.vlgmr.msra.gmra.mxu1 %vm636_vm10, %v488_v58 }
 0x4bb   : > { %v3889_v63 = vsel %vm615_vm8, %v3884_v28, %v3886_v61  ;;  %v3890_v0 = vsel %vm615_vm8, %v3886_v61, %v3888_v26  ;;  %3962 = vmatprep.mubr.f32.mxu0 %v6781_v5  ;;  %4224 = vmatprep.mubr.f32.mxu1 %v6781_v5  ;;  %v4243_v3 = vsel %vm572_vm7, %v4239_v62, %v4241_v16  ;;  %v493_v26 = vld [vmem:[%s7830_s3 + $0xb0] sm:$0x7] }
 0x4bc   : > { %6646 = vmatprep.subr.msk.mxu0 %vm640_vm9, %v3890_v0  ;;  %v4242_v14 = vsel %vm572_vm7, %v4237_v39, %v4239_v62  ;;  %v496_v39 = vld [vmem:[%s7830_s3 + $0xbc] sm:$0x7] }
 0x4bd   : > { %6647 = vmatpush1.msk.msra.mxu0 %vm640_vm9, %v3889_v63 }
 0x4be   : > { %6648 = vmatmul.mubr.msk.f32.vlgmr.msra.gmra.mxu0 %vm636_vm10, %v487_v1  ;;  %6652 = vmatprep.subr.msk.mxu0 %vm640_vm9, %v7414_v31  ;;  %v4148_v2 = vpop.permute.xlu1 %4147  ;;  %v4421_v4 = vpop.permute.xlu0 %4420 }
 0x4bf   : > { %v4151_v6 = vsel %vm379_vm4, %v4146_v36, %v4148_v2  ;;  %v4152_v7 = vsel %vm379_vm4, %v4148_v2, %v4150_v23  ;;  %6653 = vmatpush1.msk.msra.mxu0 %vm640_vm9, %v7412_v29  ;;  %4133 = vmatprep.mubr.f32.mxu0 %v6781_v5  ;;  %v497_v36 = vld [vmem:[%s7830_s3 + $0xc0] sm:$0x7] }
 0x4c0   : > { %6655 = vmatprep.subr.msk.mxu1 %vm640_vm9, %v4152_v7  ;;  %6658 = vmatprep.subr.msk.mxu0 %vm640_vm9, %v4243_v3 }
 0x4c1   : > { %6656 = vmatpush1.msk.msra.mxu1 %vm640_vm9, %v4151_v6 }
 0x4c2   : > { %6654 = vmatmul.mubr.msk.f32.vlgmr.msra.gmra.mxu0 %vm636_vm10, %v489_v9  ;;  %6657 = vmatmul.mubr.msk.f32.vlgmr.msra.gmra.mxu1 %vm636_vm10, %v490_v10  ;;  %v4330_v59 = vpop.permute.xlu1 %4329  ;;  %v4419_v21 = vpop.permute.xlu0 %4418 }
 0x4c3   : > { %6659 = vmatpush1.msk.msra.mxu0 %vm640_vm9, %v4242_v14  ;;  %v4333_v23 = vsel %vm412_vm5, %v4328_v12, %v4330_v59  ;;  %v4334_v16 = vsel %vm412_vm5, %v4330_v59, %v7467_v18  ;;  %4315 = vmatprep.mubr.f32.mxu0 %v6781_v5  ;;  %v4424_v28 = vsel %vm445_vm6, %v4419_v21, %v4421_v4  ;;  %v499_v12 = vld [vmem:[%s7830_s3 + $0xc8] sm:$0x7] }
 0x4c4   : > { %6661 = vmatprep.subr.msk.mxu1 %vm640_vm9, %v4334_v16  ;;  %4406 = vmatprep.mubr.f32.mxu1 %v6781_v5 }
 0x4c5   : > { %6662 = vmatpush1.msk.msra.mxu1 %vm640_vm9, %v4333_v23 }
 0x4c6   : > { %6660 = vmatmul.mubr.msk.f32.vlgmr.msra.gmra.mxu0 %vm636_vm10, %v491_v19  ;;  %6663 = vmatmul.mubr.msk.f32.vlgmr.msra.gmra.mxu1 %vm636_vm10, %v492_v17  ;;  %v4423_v18 = vpop.permute.xlu1 %4422 }
 0x4c7   : > { %6667 = vmatprep.subr.msk.mxu1 %vm640_vm9, %v3712_v56  ;;  %v4425_v24 = vsel %vm445_vm6, %v4421_v4, %v4423_v18  ;;  %4497 = vmatprep.mubr.f32.mxu0 %v6781_v5 }
 0x4c8   : > { %6668 = vmatpush1.msk.msra.mxu1 %vm640_vm9, %v3711_v53  ;;  %6664 = vmatprep.subr.msk.mxu0 %vm640_vm9, %v4425_v24 }
 0x4c9   : > { %6673 = vmatprep.subr.msk.mxu1 %vm640_vm9, %v3890_v0  ;;  %6665 = vmatpush1.msk.msra.mxu0 %vm640_vm9, %v4424_v28 }
 0x4ca   : > { %4583 = vmatprep.mubr.f32.mxu1 %v6781_v5  ;;  %6666 = vmatmul.mubr.msk.f32.vlgmr.msra.gmra.mxu0 %vm636_vm10, %v493_v26 }
 0x4cb   : > { %6669 = vmatmul.mubr.msk.f32.vlgmr.msra.gmra.mxu1 %vm636_vm10, %v495_v32  ;;  %6670 = vmatprep.subr.msk.mxu0 %vm640_vm9, %v7473_v13  ;;  %v501_v13 = vld [vmem:[%s7830_s3 + $0xd0] sm:$0x7] }
 0x4cc   : > { %6674 = vmatpush1.msk.msra.mxu1 %vm640_vm9, %v3889_v63  ;;  %6671 = vmatpush1.msk.msra.mxu0 %vm640_vm9, %v7470_v46  ;;  %v500_v46 = vld [vmem:[%s7830_s3 + $0xcc] sm:$0x7] }
 0x4cd   : > { %6679 = vmatprep.subr.msk.mxu1 %vm640_vm9, %v7414_v31  ;;  %6676 = vmatprep.subr.msk.mxu0 %vm640_vm9, %v7487_v50 }
 0x4ce   : > { %4657 = vmatprep.mubr.f32.mxu0 %v6781_v5  ;;  %4731 = vmatprep.mubr.f32.mxu1 %v6781_v5 }
 0x4cf   : > { %6672 = vmatmul.mubr.msk.f32.vlgmr.msra.gmra.mxu0 %vm636_vm10, %v494_v35  ;;  %6675 = vmatmul.mubr.msk.f32.vlgmr.msra.gmra.mxu1 %vm636_vm10, %v496_v39  ;;  %v4506_v35 = vrot.slane %v7401_v60, 4 }
 0x4d0   : > { %6677 = vmatpush1.msk.msra.mxu0 %vm640_vm9, %v7484_v49  ;;  %6680 = vmatpush1.msk.msra.mxu1 %vm640_vm9, %v7412_v29 }
 0x4d1   : > { %6682 = vmatprep.subr.msk.mxu0 %vm640_vm9, %v4152_v7  ;;  %6685 = vmatprep.subr.msk.mxu1 %vm640_vm9, %v4243_v3 }
 0x4d2   : > { %4807 = vmatprep.mubr.f32.mxu0 %v6781_v5  ;;  %4883 = vmatprep.mubr.f32.mxu1 %v6781_v5 }
 0x4d3   : > { %6678 = vmatmul.mubr.msk.f32.vlgmr.msra.gmra.mxu0 %vm636_vm10, %v497_v36  ;;  %6681 = vmatmul.mubr.msk.f32.vlgmr.msra.gmra.mxu1 %vm636_vm10, %v498_v40 }
 0x4d4   : > { %6683 = vmatpush1.msk.msra.mxu0 %vm640_vm9, %v4151_v6  ;;  %6686 = vmatpush1.msk.msra.mxu1 %vm640_vm9, %v4242_v14 }
 0x4d5   : > { %6688 = vmatprep.subr.msk.mxu0 %vm640_vm9, %v4334_v16  ;;  %6691 = vmatprep.subr.msk.mxu1 %vm640_vm9, %v4425_v24 }
 0x4d6   : > { %4959 = vmatprep.mubr.f32.mxu0 %v6781_v5  ;;  %5035 = vmatprep.mubr.f32.mxu1 %v6781_v5 }
 0x4d7   : > { %6684 = vmatmul.mubr.msk.f32.vlgmr.msra.gmra.mxu0 %vm636_vm10, %v499_v12  ;;  %6687 = vmatmul.mubr.msk.f32.vlgmr.msra.gmra.mxu1 %vm636_vm10, %v500_v46 }
 0x4d8   : > { %6689 = vmatpush1.msk.msra.mxu0 %vm640_vm9, %v4333_v23  ;;  %6692 = vmatpush1.msk.msra.mxu1 %vm640_vm9, %v4424_v28 }
 0x4d9   : > { %5111 = vmatprep.mubr.f32.mxu0 %v6781_v5  ;;  %5187 = vmatprep.mubr.f32.mxu1 %v6781_v5 }
 0x4db   : > { %6690 = vmatmul.mubr.msk.f32.vlgmr.msra.gmra.mxu0 %vm636_vm10, %v501_v13  ;;  %6693 = vmatmul.mubr.msk.f32.vlgmr.msra.gmra.mxu1 %vm636_vm10, %v502_v41 }
 0x4dc   : > { %5411 = vmatprep.mubr.f32.mxu1 %v6781_v5  ;;  %5322 = vmatprep.mubr.f32.mxu0 %v6781_v5 }
 0x576   : > { %v3875_v44 = vpop.f32.mrf.mxu1 }
 0x578   : > { %v3877_v45 = vpop.f32.mrf.mxu1 }
 0x57a   : > { %v3786_v49 = vpop.f32.mrf.mxu0  ;;  %v4055_v50 = vpop.f32.mrf.mxu1 }
 0x57b   : > { %v3876_v53 = vadd.f32 %v3875_v44, %v3786_v49 }
 0x57c   : > { %v3788_v56 = vpop.f32.mrf.mxu0  ;;  %v4057_v62 = vpop.f32.mrf.mxu1 }
 0x57d   : > { %v3878_v57 = vadd.f32 %v3877_v45, %v3788_v56 }
 0x57e   : > { %v3964_v58 = vpop.f32.mrf.mxu0 }
 0x57f   : > { %v3969_v61 = vadd.f32 %v3964_v58, %v3876_v53 }
 0x580   : > { %v3966_v63 = vpop.f32.mrf.mxu0 }
 0x581   : > { %v4060_v0 = vadd.f32 %v4055_v50, %v3969_v61  ;;  %v3970_v1 = vadd.f32 %v3966_v63, %v3878_v57 }
 0x582   : > { %v4135_v2 = vpop.f32.mrf.mxu0  ;;  %v4226_v3 = vpop.f32.mrf.mxu1 }
 0x583   : > { %v4061_v4 = vadd.f32 %v4057_v62, %v3970_v1  ;;  %v4140_v6 = vadd.f32 %v4135_v2, %v4060_v0 }
 0x584   : > { %v4137_v7 = vpop.f32.mrf.mxu0  ;;  %v4228_v9 = vpop.f32.mrf.mxu1 }
 0x585   : > { %v4231_v10 = vadd.f32 %v4226_v3, %v4140_v6  ;;  %v4141_v14 = vadd.f32 %v4137_v7, %v4061_v4  ;;  %v7637_v6 = vpop.permute.xlu1 %5198 }
 0x586   : > { %v4317_v59 = vpop.f32.mrf.mxu0  ;;  %v4408_v23 = vpop.f32.mrf.mxu1 }
 0x587   : > { %v4232_v16 = vadd.f32 %v4228_v9, %v4141_v14  ;;  %v4322_v19 = vadd.f32 %v4317_v59, %v4231_v10 }
 0x588   : > { %v4319_v17 = vpop.f32.mrf.mxu0  ;;  %v4410_v21 = vpop.f32.mrf.mxu1 }
 0x589   : > { %v4413_v18 = vadd.f32 %v4408_v23, %v4322_v19  ;;  %v4323_v24 = vadd.f32 %v4319_v17, %v4232_v16  ;;  %v5202_v16 = vrot.slane %v7637_v6, 7 }
 0x58a   : > { %v4499_v26 = vpop.f32.mrf.mxu0 }
 0x58b   : > { %v4414_v28 = vadd.f32 %v4410_v21, %v4323_v24  ;;  %v4504_v32 = vadd.f32 %v4499_v26, %v4413_v18  ;;  %v4585_v39 = vpop.f32.mrf.mxu1  ;;  %v5201_v24 = vrot.slane %v7401_v60, 7 }
 0x58c   : > { %v4501_v36 = vpop.f32.mrf.mxu0 }
 0x58d   : > { %v7633_v40 = vadd.f32 %v4506_v35, %v4504_v32  ;;  %v4505_v12 = vadd.f32 %v4501_v36, %v4414_v28  ;;  %v4587_v46 = vpop.f32.mrf.mxu1 }
 0x58f   : > { %v7635_v13 = vadd.f32 %v4506_v35, %v4505_v12  ;;  %v4659_v41 = vpop.f32.mrf.mxu0  ;;  %v4733_v44 = vpop.f32.mrf.mxu1  ;;  %v5203_v35 = vsel %vm5200_vm3, %v5201_v24, %v5202_v16 }
 0x590   : > { %v4660_v45 = vadd.f32 %v4659_v41, %v4585_v39 }
 0x591   : > { %v4661_v49 = vpop.f32.mrf.mxu0  ;;  %v4735_v50 = vpop.f32.mrf.mxu1 }
 0x592   : > { %v4738_v53 = vadd.f32 %v4733_v44, %v4660_v45  ;;  %v4662_v56 = vadd.f32 %v4661_v49, %v4587_v46 }
 0x593   : > { %v4809_v57 = vpop.f32.mrf.mxu0  ;;  %v4885_v58 = vpop.f32.mrf.mxu1 }
 0x594   : > { %v4739_v62 = vadd.f32 %v4735_v50, %v4662_v56  ;;  %v4814_v61 = vadd.f32 %v4809_v57, %v4738_v53 }
 0x595   : > { %v4811_v63 = vpop.f32.mrf.mxu0  ;;  %v4887_v0 = vpop.f32.mrf.mxu1 }
 0x596   : > { %v4890_v1 = vadd.f32 %v4885_v58, %v4814_v61  ;;  %v4815_v2 = vadd.f32 %v4811_v63, %v4739_v62 }
 0x597   : > { %v4961_v3 = vpop.f32.mrf.mxu0  ;;  %v5037_v4 = vpop.f32.mrf.mxu1 }
 0x598   : > { %v4891_v7 = vadd.f32 %v4887_v0, %v4815_v2  ;;  %v4966_v9 = vadd.f32 %v4961_v3, %v4890_v1 }
 0x599   : > { %v4963_v10 = vpop.f32.mrf.mxu0  ;;  %v5039_v14 = vpop.f32.mrf.mxu1 }
 0x59a   : > { %v5042_v59 = vadd.f32 %v5037_v4, %v4966_v9  ;;  %v4967_v23 = vadd.f32 %v4963_v10, %v4891_v7  ;;  %v7684_v4 = vld [vmem:[%s7832_s5] sm:$0x7]  ;;  %v5688_v9 = vpop.permute.xlu1 %5687  ;;  %v5779_v10 = vpop.permute.xlu0 %5778 }
 0x59b   : > { %v5113_v19 = vpop.f32.mrf.mxu0  ;;  %v5189_v17 = vpop.f32.mrf.mxu1  ;;  %v516_v7 = vld [vmem:[%s7833_s6] sm:$0x7] }
 0x59c   : > { %v5043_v21 = vadd.f32 %v5039_v14, %v4967_v23  ;;  %v5118_v18 = vadd.f32 %v5113_v19, %v5042_v59 }
 0x59d   : > { %v5115_v26 = vpop.f32.mrf.mxu0  ;;  %v5191_v39 = vpop.f32.mrf.mxu1 }
 0x59e   : > { %v5194_v28 = vadd.f32 %v5189_v17, %v5118_v18  ;;  %v5119_v32 = vadd.f32 %v5115_v26, %v5043_v21  ;;  %v7695_v14 = vpop.permute.xlu1 %5869 }
 0x5a0   : > { %v5205_v36 = vadd.f32 %v5203_v35, %v5194_v28  ;;  %v5195_v12 = vadd.f32 %v5191_v39, %v5119_v32  ;;  %v503_v39 = vld [vmem:[%s7830_s3 + $0xd8] sm:$0x7] }
 0x5a2   : > { %v5207_v46 = vadd.f32 %v5205_v36, %v7412_v29  ;;  %v5206_v41 = vadd.f32 %v5203_v35, %v5195_v12 }
 0x5a4   : > { %v5211_v44 = vmul.f32 0.05, %v5207_v46  ;;  %v5208_v45 = vadd.f32 %v5206_v41, %v7414_v31  ;;  %vm5209_vm11 = vcmp.ge.f32.partialorder %v5207_v46, 0.0 }
 0x5a6   : > { %vm5210_vm12 = vcmp.ge.f32.partialorder %v5208_v45, 0.0  ;;  %v5212_v49 = vmul.f32 0.05, %v5208_v45  ;;  %v7643_v50 = vsel %vm5209_vm11, %v5207_v46, %v5211_v44 }
 0x5a8   : > { %v7645_v53 = vsel %vm5210_vm12, %v5208_v45, %v5212_v49  ;;  %v504_v49 = vld [vmem:[%s7830_s3 + $0xdc] sm:$0x7] }
 0x5a9   : > { %v5217_v60 = vcombine.low %v7643_v50, %v7645_v53 }
 0x5ab   : > { %5219 = vst [vmem:[#allocation2 + $0x4] sm:$0x77] %v5217_v60  ;;  %v506_v60 = vld [vmem:[%s7830_s3 + $0xe4] sm:$0x7] }
 0x5b2   : > { %v5221_v56 = vld [vmem:[#allocation2 + $0x8] sm:$0x7]  ;;  %v5220_v57 = vld [vmem:[#allocation2] sm:$0x77] }
 0x5b3   : > { %v5225_v58 = vmul.f32 %v5221_v56, %v6930_v22  ;;  %v5224_v29 = vmul.f32 %v5220_v57, %v6945_v30  ;;  %v5223_v31 = vmul.f32 %v5221_v56, %v6928_v20  ;;  %v5222_v62 = vmul.f32 %v5220_v57, %v6939_v27  ;;  %v5230_v0 = vld [vmem:[#allocation2 + $0x4] sm:$0x77] }
 0x5b4   : > { %v5226_v61 = vmul.f32 %v5220_v57, %v6965_v38  ;;  %v5227_v63 = vmul.f32 %v5221_v56, %v6951_v34  ;;  %v5229_v22 = vmul.f32 %v5221_v56, %v6949_v33  ;;  %v5228_v30 = vmul.f32 %v5220_v57, %v6959_v37 }
 0x5b5   : > { %5247 = vrot.lane.b32.xlu1 %v5225_v58, %s6784_s20  ;;  %5243 = vrot.lane.b32.xlu0 %v5224_v29, %s6784_s20  ;;  %v5232_v20 = vmul.f32 %v5230_v0, %v6879_v42  ;;  %v5234_v27 = vmul.f32 %v5230_v0, %v6971_v43  ;;  %v5331_v34 = vcombine.high %v5222_v62, %v5222_v62 }
 0x5b6   : > { %v5236_v38 = vmul.f32 %v5230_v0, %v6891_v48  ;;  %v5242_v33 = vcombine.high %v5224_v29, %v5224_v29  ;;  %v5511_v37 = vcombine.high %v5228_v30, %v5228_v30  ;;  %v5420_v42 = vcombine.high %v5226_v61, %v5226_v61 }
 0x5b7   : > { %v5773_v1 = vcombine.high %v5234_v27, %v5234_v27  ;;  %v5238_v43 = vmul.f32 %v5230_v0, %v6897_v51  ;;  %v5682_v2 = vcombine.high %v5232_v20, %v5232_v20  ;;  %v5239_v51 = vmul.f32 %v7450_v54, %v6886_v47  ;;  %v507_v0 = vld [vmem:[%s7830_s3 + $0xe8] sm:$0x7] }
 0x5b8   : > { %v5864_v3 = vcombine.high %v5236_v38, %v5236_v38 }
 0x5b9   : > { %5336 = vrot.lane.b32.xlu0 %v5223_v31, %s6782_s14  ;;  %5332 = vrot.lane.b32.xlu1 %v5222_v62, %s6782_s14  ;;  %v5955_v48 = vcombine.high %v5238_v43, %v5238_v43  ;;  %v505_v31 = vld [vmem:[%s7830_s3 + $0xe0] sm:$0x7] }
 0x5bd   : > { %5421 = vrot.lane.b32.xlu0 %v5226_v61, %s6789_s25  ;;  %5425 = vrot.lane.b32.xlu1 %v5227_v63, %s6789_s25 }
 0x5c1   : > { %5516 = vrot.lane.b32.xlu0 %v5229_v22, %s6783_s19  ;;  %5512 = vrot.lane.b32.xlu1 %v5228_v30, %s6783_s19 }
 0x5c5   : > { %5683 = vrot.lane.b32.xlu0 %v5232_v20, %s6785_s21  ;;  %5774 = vrot.lane.b32.xlu1 %v5234_v27, %s6788_s24  ;;  %v1438_v20 = vadd.f32 %v7183_v52, %v7179_v8  ;;  %v2981_v27 = vmul.f32 0.05, %v7405_v55 }
 0x5c9   : > { %5865 = vrot.lane.b32.xlu0 %v5236_v38, %s6786_s22  ;;  %5334 = vrot.lane.b32.xlu1 %v5331_v34, %s6782_s14  ;;  %v2982_v34 = vmul.f32 0.05, %v7407_v25 }
 0x5cd   : > { %5245 = vrot.lane.b32.xlu0 %v5242_v33, %s6784_s20  ;;  %5514 = vrot.lane.b32.xlu1 %v5511_v37, %s6783_s19  ;;  %s6791_s20 = smov 122  }
 0x5d1   : > { %5423 = vrot.lane.b32.xlu0 %v5420_v42, %s6789_s25  ;;  %5776 = vrot.lane.b32.xlu1 %v5773_v1, %s6788_s24  ;;  %s6793_s25 = smov 119   ;;  %v4513_v42 = vmul.f32 0.05, %v7635_v13 }
 0x5d5   : > { %5685 = vrot.lane.b32.xlu0 %v5682_v2, %s6785_s21  ;;  %5958 = vrot.lane.b32.xlu1 %v5955_v48, %s6787_s23 }
 0x5d9   : > { %5867 = vrot.lane.b32.xlu0 %v5864_v3, %s6786_s22  ;;  %5956 = vrot.lane.b32.xlu1 %v5238_v43, %s6787_s23  ;;  %s6792_s22 = smov 125   ;;  %v1442_v43 = vmul.f32 0.05, %v1438_v20 }
 0x5dd   : > { %5960 = vrot.lane.b32.xlu0 %v5239_v51, %s6787_s23  ;;  %6215 = vrot.lane.b32.xlu1 %v7684_v4, %s6791_s20  ;;  %v4512_v51 = vmul.f32 0.05, %v7633_v40 }
 0x5e1   : > { %6055 = vrot.lane.b32.xlu0 %v7684_v4, %s6792_s22  ;;  %6383 = vperm.xlu1 %6760, %v516_v7  }
 0x5e5   : > { %6298 = vrot.lane.b32.xlu0 %v7684_v4, %s6793_s25  ;;  %s338_s25 = scalar_lea.vmem %s7835_s8, %s6864_s15 }
 0x627   : > { %v5244_v47 = vpop.permute.xlu0 %5243  ;;  %v5248_v54 = vpop.permute.xlu1 %5247 }
 0x62b   : > { %v5337_v59 = vpop.permute.xlu0 %5336  ;;  %v5333_v23 = vpop.permute.xlu1 %5332 }
 0x62f   : > { %v5422_v16 = vpop.permute.xlu0 %5421  ;;  %v5426_v19 = vpop.permute.xlu1 %5425 }
 0x633   : > { %v5517_v17 = vpop.permute.xlu0 %5516  ;;  %v5513_v21 = vpop.permute.xlu1 %5512 }
 0x637   : > { %v5684_v18 = vpop.permute.xlu0 %5683  ;;  %v5775_v24 = vpop.permute.xlu1 %5774 }
 0x63b   : > { %v5866_v26 = vpop.permute.xlu0 %5865  ;;  %v5335_v28 = vpop.permute.xlu1 %5334 }
 0x63c   : > { %v5338_v32 = vsel %vm430_vm2, %v5333_v23, %v5335_v28  ;;  %v5339_v35 = vsel %vm430_vm2, %v5335_v28, %v5337_v59  ;;  %vm4511_vm2 = vcmp.ge.f32.partialorder %v7635_v13, 0.0 }
 0x63d   : > { %6697 = vmatprep.subr.msk.mxu1 %vm640_vm9, %v5339_v35 }
 0x63e   : > { %6698 = vmatpush1.msk.msra.mxu1 %vm640_vm9, %v5338_v32 }
 0x63f   : > { %v5246_v36 = vpop.permute.xlu0 %5245  ;;  %v5515_v12 = vpop.permute.xlu1 %5514  ;;  %6699 = vmatmul.mubr.msk.f32.vlgmr.msra.gmra.mxu1 %vm636_vm10, %v503_v39 }
 0x640   : > { %v5249_v46 = vsel %vm397_vm1, %v5244_v47, %v5246_v36  ;;  %v5250_v41 = vsel %vm397_vm1, %v5246_v36, %v5248_v54  ;;  %v5518_v44 = vsel %vm363_vm0, %v5513_v21, %v5515_v12  ;;  %v5519_v45 = vsel %vm363_vm0, %v5515_v12, %v5517_v17  ;;  %5591 = vmatprep.mubr.f32.mxu1 %v6781_v5 }
 0x641   : > { %6694 = vmatprep.subr.msk.mxu0 %vm640_vm9, %v5250_v41  ;;  %6703 = vmatprep.subr.msk.mxu1 %vm640_vm9, %v5519_v45  ;;  %vm2980_vm0 = vcmp.ge.f32.partialorder %v7407_v25, 0.0  ;;  %vm2979_vm1 = vcmp.ge.f32.partialorder %v7405_v55, 0.0 }
 0x642   : > { %6695 = vmatpush1.msk.msra.mxu0 %vm640_vm9, %v5249_v46  ;;  %6704 = vmatpush1.msk.msra.mxu1 %vm640_vm9, %v5518_v44  ;;  %v2984_v3 = vsel %vm2980_vm0, %v7407_v25, %v2982_v34 }
 0x643   : > { %v5424_v56 = vpop.permute.xlu0 %5423  ;;  %6696 = vmatmul.mubr.msk.f32.vlgmr.msra.gmra.mxu0 %vm636_vm10, %v504_v49  ;;  %v5777_v57 = vpop.permute.xlu1 %5776  ;;  %6705 = vmatmul.mubr.msk.f32.vlgmr.msra.gmra.mxu1 %vm636_vm10, %v506_v60 }
 0x644   : > { %v5427_v58 = vsel %vm615_vm8, %v5422_v16, %v5424_v56  ;;  %v5428_v29 = vsel %vm615_vm8, %v5424_v56, %v5426_v19  ;;  %5500 = vmatprep.mubr.f32.mxu0 %v6781_v5  ;;  %5762 = vmatprep.mubr.f32.mxu1 %v6781_v5  ;;  %v5781_v61 = vsel %vm572_vm7, %v5777_v57, %v5779_v10  ;;  %v511_v10 = vld [vmem:[%s7830_s3 + $0xf8] sm:$0x7] }
 0x645   : > { %6700 = vmatprep.subr.msk.mxu0 %vm640_vm9, %v5428_v29  ;;  %v5780_v38 = vsel %vm572_vm7, %v5775_v24, %v5777_v57  ;;  %vm4510_vm7 = vcmp.ge.f32.partialorder %v7633_v40, 0.0 }
 0x646   : > { %6701 = vmatpush1.msk.msra.mxu0 %vm640_vm9, %v5427_v58  ;;  %v4514_v59 = vsel %vm4510_vm7, %v7633_v40, %v4512_v51 }
 0x647   : > { %v5686_v62 = vpop.permute.xlu0 %5685  ;;  %6702 = vmatmul.mubr.msk.f32.vlgmr.msra.gmra.mxu0 %vm636_vm10, %v505_v31  ;;  %6706 = vmatprep.subr.msk.mxu0 %vm640_vm9, %v7645_v53  ;;  %v5959_v30 = vpop.permute.xlu1 %5958  ;;  %v508_v53 = vld [vmem:[%s7830_s3 + $0xec] sm:$0x7] }
 0x648   : > { %v5689_v63 = vsel %vm379_vm4, %v5684_v18, %v5686_v62  ;;  %v5690_v22 = vsel %vm379_vm4, %v5686_v62, %v5688_v9  ;;  %6707 = vmatpush1.msk.msra.mxu0 %vm640_vm9, %v7643_v50  ;;  %5671 = vmatprep.mubr.f32.mxu0 %v6781_v5  ;;  %v1439_v50 = vadd.f32 %v7183_v52, %v7181_v11  ;;  %v509_v11 = vld [vmem:[%s7830_s3 + $0xf0] sm:$0x7]  ;;  %v510_v52 = vld [vmem:[%s7830_s3 + $0xf4] sm:$0x7] }
 0x649   : > { %6709 = vmatprep.subr.msk.mxu1 %vm640_vm9, %v5690_v22  ;;  %6712 = vmatprep.subr.msk.mxu0 %vm640_vm9, %v5781_v61  ;;  %v2983_v9 = vsel %vm2979_vm1, %v7405_v55, %v2981_v27  ;;  %v4515_v55 = vsel %vm4511_vm2, %v7635_v13, %v4513_v42 }
 0x64a   : > { %6710 = vmatpush1.msk.msra.mxu1 %vm640_vm9, %v5689_v63  ;;  %v1443_v2 = vmul.f32 0.05, %v1439_v50  ;;  %vm1441_vm4 = vcmp.ge.f32.partialorder %v1439_v50, 0.0  ;;  %v6044_v63 = vrot.slane %v7637_v6, 2 }
 0x64b   : > { %v5868_v33 = vpop.permute.xlu0 %5867  ;;  %6708 = vmatmul.mubr.msk.f32.vlgmr.msra.gmra.mxu0 %vm636_vm10, %v507_v0  ;;  %6711 = vmatmul.mubr.msk.f32.vlgmr.msra.gmra.mxu1 %vm636_vm10, %v508_v53  ;;  %v5957_v1 = vpop.permute.xlu1 %5956 }
 0x64c   : > { %v5871_v37 = vsel %vm412_vm5, %v5866_v26, %v5868_v33  ;;  %v5872_v8 = vsel %vm412_vm5, %v5868_v33, %v7695_v14  ;;  %6713 = vmatpush1.msk.msra.mxu0 %vm640_vm9, %v5780_v38  ;;  %5853 = vmatprep.mubr.f32.mxu0 %v6781_v5  ;;  %vm1440_vm5 = vcmp.ge.f32.partialorder %v1438_v20, 0.0  ;;  %v5962_v25 = vsel %vm445_vm6, %v5957_v1, %v5959_v30 }
 0x64d   : > { %6715 = vmatprep.subr.msk.mxu1 %vm640_vm9, %v5872_v8  ;;  %5944 = vmatprep.mubr.f32.mxu1 %v6781_v5  ;;  %v1445_v47 = vsel %vm1441_vm4, %v1439_v50, %v1443_v2  ;;  %v1444_v54 = vsel %vm1440_vm5, %v1438_v20, %v1442_v43 }
 0x64e   : > { %6716 = vmatpush1.msk.msra.mxu1 %vm640_vm9, %v5871_v37 }
 0x64f   : > { %v5961_v48 = vpop.permute.xlu0 %5960  ;;  %6714 = vmatmul.mubr.msk.f32.vlgmr.msra.gmra.mxu0 %vm636_vm10, %v509_v11  ;;  %6717 = vmatmul.mubr.msk.f32.vlgmr.msra.gmra.mxu1 %vm636_vm10, %v510_v52  ;;  %v6216_v13 = vpop.permute.xlu1 %6215 }
 0x650   : > { %v5963_v7 = vsel %vm445_vm6, %v5959_v30, %v5961_v48  ;;  %6721 = vmatprep.subr.msk.mxu1 %vm640_vm9, %v2984_v3  ;;  %6035 = vmatprep.mubr.f32.mxu0 %v6781_v5 }
 0x651   : > { %6722 = vmatpush1.msk.msra.mxu1 %vm640_vm9, %v2983_v9  ;;  %6718 = vmatprep.subr.msk.mxu0 %vm640_vm9, %v5963_v7 }
 0x652   : > { %6727 = vmatprep.subr.msk.mxu1 %vm640_vm9, %v4515_v55  ;;  %6719 = vmatpush1.msk.msra.mxu0 %vm640_vm9, %v5962_v25 }
 0x653   : > { %v6056_v14 = vpop.permute.xlu0 %6055  ;;  %6720 = vmatmul.mubr.msk.f32.vlgmr.msra.gmra.mxu0 %vm636_vm10, %v511_v10  ;;  %6129 = vmatprep.mubr.f32.mxu1 %v6781_v5 }
 0x654   : > { %6724 = vmatprep.subr.msk.mxu0 %vm640_vm9, %v1445_v47  ;;  %6723 = vmatmul.mubr.msk.f32.vlgmr.msra.gmra.mxu1 %vm636_vm10, %v6056_v14 }
 0x655   : > { %6725 = vmatpush1.msk.msra.mxu0 %vm640_vm9, %v1444_v54  ;;  %6728 = vmatpush1.msk.msra.mxu1 %vm640_vm9, %v4514_v59 }
 0x656   : > { %6208 = vmatprep.mubr.f32.mxu0 %v6781_v5  ;;  %6289 = vmatprep.mubr.f32.mxu1 %v6781_v5 }
 0x657   : > { %6726 = vmatmul.mubr.msk.f32.vlgmr.msra.gmra.mxu0 %vm636_vm10, %v7684_v4  ;;  %v6299_v33 = vpop.permute.xlu0 %6298 }
 0x658   : > { %6729 = vmatmul.mubr.msk.f32.vlgmr.msra.gmra.mxu1 %vm636_vm10, %v6216_v13  ;;  %6372 = vmatprep.mubr.f32.mxu0 %v6781_v5 }
 0x65c   : > { %v6384_v9 = vpop.permute.xlu1 %6383 }
 0x6ff   : > { %v5413_v23 = vpop.f32.mrf.mxu1 }
 0x701   : > { %v5415_v16 = vpop.f32.mrf.mxu1 }
 0x703   : > { %v5324_v19 = vpop.f32.mrf.mxu0  ;;  %v5593_v40 = vpop.f32.mrf.mxu1 }
 0x704   : > { %v5414_v21 = vadd.f32 %v5413_v23, %v5324_v19 }
 0x705   : > { %v5326_v17 = vpop.f32.mrf.mxu0  ;;  %v5595_v24 = vpop.f32.mrf.mxu1 }
 0x706   : > { %v5416_v26 = vadd.f32 %v5415_v16, %v5326_v17 }
 0x707   : > { %v5502_v18 = vpop.f32.mrf.mxu0 }
 0x708   : > { %v5507_v28 = vadd.f32 %v5502_v18, %v5414_v21 }
 0x709   : > { %v5504_v32 = vpop.f32.mrf.mxu0 }
 0x70a   : > { %v5598_v35 = vadd.f32 %v5593_v40, %v5507_v28  ;;  %v5508_v39 = vadd.f32 %v5504_v32, %v5416_v26 }
 0x70b   : > { %v5673_v36 = vpop.f32.mrf.mxu0  ;;  %v5764_v12 = vpop.f32.mrf.mxu1 }
 0x70c   : > { %v5599_v4 = vadd.f32 %v5595_v24, %v5508_v39  ;;  %v5678_v46 = vadd.f32 %v5673_v36, %v5598_v35 }
 0x70d   : > { %v5675_v41 = vpop.f32.mrf.mxu0  ;;  %v5766_v44 = vpop.f32.mrf.mxu1 }
 0x70e   : > { %v5769_v5 = vadd.f32 %v5764_v12, %v5678_v46  ;;  %v5679_v45 = vadd.f32 %v5675_v41, %v5599_v4 }
 0x70f   : > { %v5855_v49 = vpop.f32.mrf.mxu0  ;;  %v5946_v60 = vpop.f32.mrf.mxu1 }
 0x710   : > { %v5770_v56 = vadd.f32 %v5766_v44, %v5679_v45  ;;  %v5860_v57 = vadd.f32 %v5855_v49, %v5769_v5 }
 0x711   : > { %v5857_v58 = vpop.f32.mrf.mxu0  ;;  %v5948_v62 = vpop.f32.mrf.mxu1 }
 0x712   : > { %v5951_v29 = vadd.f32 %v5946_v60, %v5860_v57  ;;  %v5861_v31 = vadd.f32 %v5857_v58, %v5770_v56 }
 0x713   : > { %v6037_v61 = vpop.f32.mrf.mxu0 }
 0x714   : > { %v5952_v22 = vadd.f32 %v5948_v62, %v5861_v31  ;;  %v6042_v30 = vadd.f32 %v6037_v61, %v5951_v29  ;;  %v6131_v6 = vpop.f32.mrf.mxu1 }
 0x715   : > { %v6039_v0 = vpop.f32.mrf.mxu0 }
 0x716   : > { %v6046_v53 = vadd.f32 %v6044_v63, %v6042_v30  ;;  %v6043_v20 = vadd.f32 %v6039_v0, %v5952_v22  ;;  %v6133_v8 = vpop.f32.mrf.mxu1 }
 0x717   : > { %v6210_v11 = vpop.f32.mrf.mxu0 }
 0x718   : > { %v6047_v50 = vadd.f32 %v6044_v63, %v6043_v20  ;;  %v6050_v27 = vmul.f32 0.05, %v6046_v53  ;;  %vm6048_vm6 = vcmp.ge.f32.partialorder %v6046_v53, 0.0  ;;  %v6291_v42 = vpop.f32.mrf.mxu1  ;;  %v6211_v1 = vadd.f32 %v6210_v11, %v6131_v6 }
 0x719   : > { %v6212_v52 = vpop.f32.mrf.mxu0 }
 0x71a   : > { %v6051_v34 = vmul.f32 0.05, %v6047_v50  ;;  %vm6049_vm8 = vcmp.ge.f32.partialorder %v6047_v50, 0.0  ;;  %v6052_v37 = vsel %vm6048_vm6, %v6046_v53, %v6050_v27  ;;  %v6213_v43 = vadd.f32 %v6212_v52, %v6133_v8  ;;  %v6293_v2 = vpop.f32.mrf.mxu1 }
 0x71b   : > { %v6296_v48 = vadd.f32 %v6291_v42, %v6211_v1 }
 0x71c   : > { %v6053_v38 = vsel %vm6049_vm8, %v6047_v50, %v6051_v34  ;;  %v6297_v51 = vadd.f32 %v6293_v2, %v6213_v43 }
 0x71d   : > { %6730 = vmatprep.subr.msk.mxu0 %vm640_vm9, %v6053_v38 }
 0x71e   : > { %6731 = vmatpush1.msk.msra.mxu0 %vm640_vm9, %v6052_v37 }
 0x71f   : > { %6732 = vmatmul.mubr.msk.f32.vlgmr.msra.gmra.mxu0 %vm636_vm10, %v6299_v33 }
 0x7df   : > { %v6374_v3 = vpop.f32.mrf.mxu0 }
 0x7e0   : > { %v6379_v7 = vadd.f32 %v6374_v3, %v6296_v48 }
 0x7e1   : > { %v6376_v10 = vpop.f32.mrf.mxu0 }
 0x7e2   : > { %v6386_v25 = vadd.f32 %v6384_v9, %v6379_v7  ;;  %v6380_v55 = vadd.f32 %v6376_v10, %v6297_v51 }
 0x7e4   : > { %v6388_v14 = vsub.f32 0.0, %v6386_v25  ;;  %v6387_v47 = vadd.f32 %v6384_v9, %v6380_v55 }
 0x7e6   : > { %v6390_v54 = vmul.f32 1.442695, %v6388_v14  ;;  %v6389_v59 = vsub.f32 0.0, %v6387_v47 }
 0x7e8   : > { %6761 = vpow2.f32 %v6390_v54  ;;  %v6392_v13 = vmul.f32 1.442695, %v6389_v59 }
 0x7ea   : > { %6763 = vpow2.f32 %v6392_v13 }
 0x7f5   : > { %v6762_v23 = vpop.eup %6761 }
 0x7f6   : > { %v6394_v16 = vadd.f32 1.0, %v6762_v23 }
 0x7f7   : > { %v6764_v19 = vpop.eup %6763 }
 0x7f8   : > { %6765 = vrcp.f32 %v6394_v16  ;;  %v6395_v40 = vadd.f32 1.0, %v6764_v19 }
 0x7fa   : > { %6767 = vrcp.f32 %v6395_v40 }
 0x805   : > { %v6766_v17 = vpop.eup %6765 }
 0x806   : > { %v6400_v21 = vmax.f32 %v6766_v17, 0.0001 }
 0x807   : > { %v6768_v18 = vpop.eup %6767 }
 0x808   : > { %v6402_v24 = vmin.f32 %v6400_v21, 1.0  ;;  %v6401_v26 = vmax.f32 %v6768_v18, 0.0001 }
 0x80a   : > { %v6403_v28 = vmin.f32 %v6401_v26, 1.0  ;;  %6769 = vrcp.f32 %v6402_v24 }
 0x80c   : > { %6771 = vrcp.f32 %v6403_v28  ;;  %v6416_v32 = vcombine.low %v6402_v24, %v6403_v28 }
 0x80e   : > { %6418 = vst [vmem:[%s338_s25] sm:$0x77] %v6416_v32 }
 0x817   : > { %v6770_v35 = vpop.eup %6769 }
 0x819   : > { %v6772_v39 = vpop.eup %6771 }
 0x81a   : > { %v6408_v36 = vcombine.low %v6770_v35, %v6772_v39 }
 0x81c   : > { %v6410_v12 = vmul.f32 %v6408_v36, %v6870_v15 }
 0x81e   : > { %v6411_v4 = vmax.f32 %v6410_v12, 0.0 }
 0x820   : > { %v6412_v46 = vmin.f32 %v6411_v4, 1.0 }
 0x822   : > { %6413 = vst [vmem:[%s333_s17] sm:$0x77] %v6412_v46 }
 0x823 PF: > { %s19_s27 = sadd.s32 1, %s6779_s27  }
 0x824   : > { %p16_p4 = scmp.ge.s32.totalorder %s19_s27, 4  }
 0x826   :  { %18 = sbr.rel (!%p16_p4) target bundleno = 1 (0x1), region = 93 }

</bundles_post_ra>
